<compile_context>
chip_gen: v5e
topology: v5e:2x2
jax: 0.10.0
libtpu: 0.0.40
codegen_flags: <defaults>
</compile_context>

<pallas_src>
import numpy as np
import jax
import jax.numpy as jnp
from jax.experimental import pallas as pl
from jax.experimental.pallas import tpu as pltpu

# ----------------------------- model constants ------------------------------
B = 2                      # batch
C_EEG = 2                  # num_channels (the conv "height")
T = 750                    # time samples (chosen so the flattened size is 736)
K1, PAD1, F1 = 31, 15, 16  # firstconv Conv2d(1, 16, (1, 31), pad (0, 15))
K2, F2 = 15, 32            # depthwiseConv Conv2d(16, 32, (2, 15), groups=16)
KEFF = K1 + K2 - 1         # 45: firstconv composed with depthwise = one conv
CIN_EFF = C_EEG * KEFF     # 90: contraction size of the fused conv
T2 = T - K2 + 1            # 736: valid output length of the fused conv
T2B = 768                  # lane-aligned (6*128) per-batch slab width for stage 1
POOL1 = 4
T3 = T2 // POOL1           # 184: pooled length
K3, PAD3, F3 = 11, 5, 32   # separableConv Conv2d(32, 32, (1, 11), pad (0, 5))
T3B = 256                  # lane-aligned width holding the (0,5)-padded pooled signal
POOL2 = 8
T3P = T3 // POOL2          # 23
NCLS = 2
FLAT = F3 * T3P            # 736 == classify in_features
ELU_ALPHA = 0.001          # nn.ELU(alpha=0.001) in the reference module

assert FLAT == 736
assert T3 + 2 * PAD3 <= T3B            # padded pooled signal fits in 256 lanes
assert (K3 - 1) + T3 <= T3B            # every tap window stays in bounds


# --------------------------------- kernel -----------------------------------
def eegnet_kernel(x_ref, w2_ref, b_ref, p4_ref, w3_ref, m_ref, bl_ref, out_ref):
    def elu(z):  # ELU(alpha=0.001); exp only on the non-positive branch
        return jnp.where(z > 0, z, ELU_ALPHA * (jnp.exp(jnp.minimum(z, 0.0)) - 1.0))

    nb = x_ref.shape[1] // T2B                                       # batches in this call

    # firstconv + BN1 composed with depthwiseConv + BN2 -> ONE MXU matmul over
    # ALL batch elements at once (per-batch slabs are 768 lanes wide).
    z2 = jnp.dot(w2_ref[...], x_ref[...],
                 preferred_element_type=jnp.float32) + b_ref[0]      # (32, nb*768) f32
    h2 = elu(z2).astype(jnp.bfloat16)                                # (32, nb*768) bf16

    outs = []
    for bidx in range(nb):
        h2_b = h2[:, bidx * T2B:(bidx + 1) * T2B]                    # (32, 768) lane-aligned
        # AvgPool(1,4) + zero-pad(0,5) as one matmul with a lane-padded constant
        # (cols 0..4 and 189..255 are exact zeros; padded z2 cols are masked out
        # by the zero rows 736..767 of p4).
        h2p = jnp.dot(h2_b, p4_ref[...],
                      preferred_element_type=jnp.float32).astype(jnp.bfloat16)  # (32, 256)
        # Dropout(p=0.35): identity at inference.

        # separableConv + BN3: per-tap matmul accumulation -- no im2col buffer.
        z3 = jnp.dot(w3_ref[0], h2p[:, 0:T3],
                     preferred_element_type=jnp.float32)             # (32, 184) f32
        for k in range(1, K3):
            z3 = z3 + jnp.dot(w3_ref[k], h2p[:, k:k + T3],
                              preferred_element_type=jnp.float32)
        h3 = elu(z3 + b_ref[1])                                      # (32, 184) f32

        # AvgPool(1,8) + flatten + Linear folded into M[n,c,t] = WL[n, c*23+t//8]/8;
        # m is bf16, the products/sums accumulate in f32.
        prod = h3[None, :, :] * m_ref[...]                           # (NCLS, 32, 184) f32
        red = jnp.sum(jnp.sum(prod, axis=2), axis=1)                 # (NCLS,)
        outs.append(red.reshape(1, NCLS))

    out_ref[...] = jnp.concatenate(outs, axis=0) + bl_ref[...]       # (nb, NCLS)


# ------------------------------ host wrapper ---------------------------------
def eegnet_forward(x, params):
    """x: (B, 1, C_EEG, T) float32, NCHW like the PyTorch module."""
    bsz = x.shape[0]

    # Host-side im2col of the folded conv1∘conv2 stage, built directly in bf16
    # (no f32 intermediate).  Row index = h*45 + m; each batch's 736 valid time
    # columns are zero-padded to a 768-lane slab and slabs are concatenated
    # along lanes -> (90, bsz*768).
    x_pad = jnp.pad(x[:, 0, :, :], ((0, 0), (0, 0), (PAD1, PAD1))).astype(jnp.bfloat16)
    cols = jnp.stack([x_pad[:, :, m:m + T2] for m in range(KEFF)], axis=2)   # (B,2,45,736)
    xcol = cols.reshape(bsz, CIN_EFF, T2)
    xcol = jnp.pad(xcol, ((0, 0), (0, 0), (0, T2B - T2)))                    # (B,90,768)
    xcol = jnp.swapaxes(xcol, 0, 1).reshape(CIN_EFF, bsz * T2B)              # (90, B*768)

    args = (xcol, params["weff"], params["biases"], params["p4"],
            params["w3k"], params["m_cls"], params["bl"])

    flops = (2 * F2 * CIN_EFF * bsz * T2B          # fused conv1+2
             + bsz * 2 * F2 * T2B * T3B            # avg-pool-4 matmul
             + bsz * K3 * 2 * F3 * F2 * T3         # separable-conv taps
             + bsz * 2 * NCLS * F3 * T3)           # pool8 + linear fold
    transcendentals = bsz * F2 * (T2B + T3)        # exp count of the two ELUs
    bytes_accessed = (sum(int(np.prod(a.shape)) * a.dtype.itemsize for a in args)
                      + bsz * NCLS * 4)

    out = pl.pallas_call(
        eegnet_kernel,
        out_shape=jax.ShapeDtypeStruct((bsz, NCLS), jnp.float32),
        in_specs=[pl.BlockSpec(memory_space=pltpu.MemorySpace.VMEM)] * len(args),
        out_specs=pl.BlockSpec(memory_space=pltpu.MemorySpace.VMEM),
        cost_estimate=pl.CostEstimate(flops=flops,
                                      transcendentals=transcendentals,
                                      bytes_accessed=bytes_accessed),
    )(*args)
    return out


# --------------------------- parameter construction --------------------------
def _bn_fold(gamma, beta, mean, var, eps=1e-5):
    scale = gamma / np.sqrt(var + eps)
    shift = beta - mean * scale
    return scale.astype(np.float32), shift.astype(np.float32)


def fold_params(raw):
    """Fold BN (inference stats) + layer compositions into the kernel constants."""
    w1, w2, w3 = raw["w1"], raw["w2"], raw["w3"]
    wl, bl = raw["wl"], raw["bl"]
    s1, t1 = _bn_fold(*raw["bn1"])
    s2, t2 = _bn_fold(*raw["bn2"])
    s3, t3 = _bn_fold(*raw["bn3"])

    # firstconv+BN1 composed with depthwise+BN2 -> conv kernel (C_EEG, 45) + bias
    weff = np.zeros((F2, C_EEG, KEFF), np.float32)
    for oc in range(F2):
        g = oc // (F2 // F1)                       # grouped-conv input channel
        for h in range(C_EEG):
            weff[oc, h] = s2[oc] * s1[g] * np.convolve(w1[g], w2[oc, h])
    beff = s2 * t1[np.arange(F2) // (F2 // F1)] * w2.sum(axis=(1, 2)) + t2

    # separableConv + BN3 weights per tap: w3k[k, o, c] = s3[o] * w3[o, c, k]
    w3k = np.ascontiguousarray(np.transpose(w3 * s3[:, None, None], (2, 0, 1)))

    # AvgPool(1,4) + left zero-pad(5), lane-padded to 256 output columns.
    # Rows 736..767 stay zero so the padded stage-1 columns are masked out.
    p4 = np.zeros((T2B, T3B), np.float32)
    p4[np.arange(T2), np.arange(T2) // POOL1 + PAD3] = 1.0 / POOL1   # exact in bf16

    # AvgPool(1,8) + flatten + Linear weight fold: M[n,c,t] = WL[n, c*23 + t//8]/8
    m_cls = np.repeat(wl.reshape(NCLS, F3, T3P), POOL2, axis=2) / POOL2

    biases = np.stack([beff, t3], axis=0).reshape(2, F2, 1)

    return dict(
        weff=jnp.asarray(weff.reshape(F2, CIN_EFF), dtype=jnp.bfloat16),
        biases=jnp.asarray(biases, dtype=jnp.float32),
        p4=jnp.asarray(p4, dtype=jnp.bfloat16),
        w3k=jnp.asarray(w3k, dtype=jnp.bfloat16),
        m_cls=jnp.asarray(m_cls, dtype=jnp.bfloat16),
        bl=jnp.asarray(bl.reshape(1, NCLS), dtype=jnp.float32),
    )


def make_params(key):
    ks = jax.random.split(key, 17)
    it = iter(range(17))

    def nrm(shape, s):
        return np.asarray(s * jax.random.normal(ks[next(it)], shape), np.float32)

    def bn(n):
        g = np.asarray(1.0 + 0.1 * jax.random.normal(ks[next(it)], (n,)), np.float32)
        b = np.asarray(0.1 * jax.random.normal(ks[next(it)], (n,)), np.float32)
        m = np.asarray(0.1 * jax.random.normal(ks[next(it)], (n,)), np.float32)
        v = np.asarray(0.5 + 0.5 * jax.random.uniform(ks[next(it)], (n,)), np.float32)
        return g, b, m, v

    raw = dict(
        w1=nrm((F1, K1), 0.2),         bn1=bn(F1),      # Conv2d(1,16,(1,31))
        w2=nrm((F2, C_EEG, K2), 0.2),  bn2=bn(F2),      # Conv2d(16,32,(2,15),groups=16)
        w3=nrm((F3, F2, K3), 0.1),     bn3=bn(F3),      # Conv2d(32,32,(1,11))
        wl=nrm((NCLS, FLAT), 0.05),    bl=nrm((NCLS,), 0.1),   # Linear(736,2)
    )
    return raw, fold_params(raw)


# ------------------------- layer-by-layer reference --------------------------
def eegnet_reference(x, raw):
    """Pure NumPy (f64) reference following the original module structure."""
    def elu(z):
        return np.where(z > 0, z, ELU_ALPHA * (np.exp(np.minimum(z, 0.0)) - 1.0))

    w1 = raw["w1"].astype(np.float64)
    w2 = raw["w2"].astype(np.float64)
    w3 = raw["w3"].astype(np.float64)
    wl = raw["wl"].astype(np.float64)
    bl = raw["bl"].astype(np.float64)
    s1, t1 = _bn_fold(*raw["bn1"])
    s2, t2 = _bn_fold(*raw["bn2"])
    s3, t3 = _bn_fold(*raw["bn3"])

    bsz = x.shape[0]
    xpad = np.pad(x[:, 0].astype(np.float64), ((0, 0), (0, 0), (PAD1, PAD1)))

    y1 = np.zeros((bsz, F1, C_EEG, T))
    for k in range(K1):
        y1 += w1[:, k][None, :, None, None] * xpad[:, None, :, k:k + T]
    z1 = s1[None, :, None, None] * y1 + t1[None, :, None, None]

    y2 = np.zeros((bsz, F2, T2))
    for oc in range(F2):
        g = oc // (F2 // F1)
        for h in range(C_EEG):
            for k in range(K2):
                y2[:, oc] += w2[oc, h, k] * z1[:, g, h, k:k + T2]
    h2 = elu(s2[None, :, None] * y2 + t2[None, :, None])
    h2p = h2.reshape(bsz, F2, T3, POOL1).mean(-1)
    h2pp = np.pad(h2p, ((0, 0), (0, 0), (PAD3, PAD3)))

    y3 = np.zeros((bsz, F3, T3))
    for k in range(K3):
        y3 += np.einsum("oc,bct->bot", w3[:, :, k], h2pp[:, :, k:k + T3])
    h3 = elu(s3[None, :, None] * y3 + t3[None, :, None])
    h3p = h3.reshape(bsz, F3, T3P, POOL2).mean(-1)

    return h3p.reshape(bsz, FLAT) @ wl.T + bl[None, :]


# ----------------------------------- main ------------------------------------
if __name__ == "__main__":
    key = jax.random.PRNGKey(0)
    pkey, xkey = jax.random.split(key)
    raw, params = make_params(pkey)

    # PyTorch-style NCHW input: (batch, 1, num_eeg_channels, time)
    x = jax.random.normal(xkey, (B, 1, C_EEG, T), dtype=jnp.float32)

    fwd = jax.jit(eegnet_forward)
    out = jax.block_until_ready(fwd(x, params))

    assert out.shape == (B, NCLS)
    assert bool(jnp.all(jnp.isfinite(out)))

    # bf16-matmul kernel vs f64 layer-by-layer reference (loose tolerance).
    ref = eegnet_reference(np.asarray(x), raw)
    err = float(np.max(np.abs(np.asarray(out, np.float64) - ref)))
    assert err < 0.1, f"kernel/reference mismatch: max abs err {err}"

    print("KERNEL_OK")
</pallas_src>

<mosaic_0001>
module attributes {stable_mosaic.version = 11 : i64} {
  func.func @eegnet_kernel(%arg0: memref<90x1536xbf16, #tpu.memory_space<vmem>>, %arg1: memref<32x90xbf16, #tpu.memory_space<vmem>>, %arg2: memref<2x32x1xf32, #tpu.memory_space<vmem>>, %arg3: memref<768x256xbf16, #tpu.memory_space<vmem>>, %arg4: memref<11x32x32xbf16, #tpu.memory_space<vmem>>, %arg5: memref<2x32x184xbf16, #tpu.memory_space<vmem>>, %arg6: memref<1x2xf32, #tpu.memory_space<vmem>>, %arg7: memref<2x2xf32, #tpu.memory_space<vmem>>) attributes {dimension_semantics = [], scalar_prefetch = 0 : i64, scratch_operands = 0 : i64, tpu.core_type = #tpu.core_type<tc>} {
    %c0 = arith.constant 0 : index
    %c0_0 = arith.constant 0 : index
    %0 = vector.load %arg1[%c0, %c0_0] : memref<32x90xbf16, #tpu.memory_space<vmem>>, vector<32x90xbf16>
    %c0_1 = arith.constant 0 : index
    %c0_2 = arith.constant 0 : index
    %1 = vector.load %arg0[%c0_1, %c0_2] : memref<90x1536xbf16, #tpu.memory_space<vmem>>, vector<90x1536xbf16>
    %cst = arith.constant dense<0.000000e+00> : vector<32x1536xf32>
    %2 = tpu.matmul %0, %1, %cst {dimension_numbers = #tpu.dot_dimension_numbers<[1], [0], [0], [1], [0, 0, 1, 1], [], []>} : vector<32x90xbf16>, vector<90x1536xbf16>, vector<32x1536xf32> -> vector<32x1536xf32>
    %c0_3 = arith.constant 0 : index
    %c0_4 = arith.constant 0 : index
    %c0_5 = arith.constant 0 : index
    %3 = vector.load %arg2[%c0_3, %c0_4, %c0_5] : memref<2x32x1xf32, #tpu.memory_space<vmem>>, vector<1x32x1xf32>
    %4 = vector.shape_cast %3 : vector<1x32x1xf32> to vector<32x1xf32>
    %5 = vector.broadcast %4 : vector<32x1xf32> to vector<32x1536xf32>
    %6 = arith.addf %2, %5 : vector<32x1536xf32>
    %cst_6 = arith.constant 0.000000e+00 : f32
    %7 = vector.broadcast %cst_6 : f32 to vector<32x1536xf32>
    %8 = arith.cmpf ogt, %6, %7 : vector<32x1536xf32>
    %cst_7 = arith.constant 0.000000e+00 : f32
    %9 = vector.broadcast %cst_7 : f32 to vector<32x1536xf32>
    %10 = arith.minimumf %6, %9 : vector<32x1536xf32>
    %11 = math.exp %10 : vector<32x1536xf32>
    %cst_8 = arith.constant 1.000000e+00 : f32
    %12 = vector.broadcast %cst_8 : f32 to vector<32x1536xf32>
    %13 = arith.subf %11, %12 : vector<32x1536xf32>
    %cst_9 = arith.constant 1.000000e-03 : f32
    %14 = vector.broadcast %cst_9 : f32 to vector<32x1536xf32>
    %15 = arith.mulf %14, %13 : vector<32x1536xf32>
    %16 = arith.select %8, %6, %15 : vector<32x1536xi1>, vector<32x1536xf32>
    %17 = arith.truncf %16 : vector<32x1536xf32> to vector<32x1536xbf16>
    %18 = vector.extract_strided_slice %17 {offsets = [0, 0], sizes = [32, 768], strides = [1, 1]} : vector<32x1536xbf16> to vector<32x768xbf16>
    %c0_10 = arith.constant 0 : index
    %c0_11 = arith.constant 0 : index
    %19 = vector.load %arg3[%c0_10, %c0_11] : memref<768x256xbf16, #tpu.memory_space<vmem>>, vector<768x256xbf16>
    %cst_12 = arith.constant dense<0.000000e+00> : vector<32x256xf32>
    %20 = tpu.matmul %18, %19, %cst_12 {dimension_numbers = #tpu.dot_dimension_numbers<[1], [0], [0], [1], [0, 0, 1, 1], [], []>} : vector<32x768xbf16>, vector<768x256xbf16>, vector<32x256xf32> -> vector<32x256xf32>
    %21 = arith.truncf %20 : vector<32x256xf32> to vector<32x256xbf16>
    %c0_13 = arith.constant 0 : index
    %c0_14 = arith.constant 0 : index
    %c0_15 = arith.constant 0 : index
    %22 = vector.load %arg4[%c0_13, %c0_14, %c0_15] : memref<11x32x32xbf16, #tpu.memory_space<vmem>>, vector<1x32x32xbf16>
    %23 = vector.shape_cast %22 : vector<1x32x32xbf16> to vector<32x32xbf16>
    %24 = vector.extract_strided_slice %21 {offsets = [0, 0], sizes = [32, 184], strides = [1, 1]} : vector<32x256xbf16> to vector<32x184xbf16>
    %cst_16 = arith.constant dense<0.000000e+00> : vector<32x184xf32>
    %25 = tpu.matmul %23, %24, %cst_16 {dimension_numbers = #tpu.dot_dimension_numbers<[1], [0], [0], [1], [0, 0, 1, 1], [], []>} : vector<32x32xbf16>, vector<32x184xbf16>, vector<32x184xf32> -> vector<32x184xf32>
    %c1 = arith.constant 1 : index
    %c0_17 = arith.constant 0 : index
    %c0_18 = arith.constant 0 : index
    %26 = vector.load %arg4[%c1, %c0_17, %c0_18] : memref<11x32x32xbf16, #tpu.memory_space<vmem>>, vector<1x32x32xbf16>
    %27 = vector.shape_cast %26 : vector<1x32x32xbf16> to vector<32x32xbf16>
    %28 = vector.extract_strided_slice %21 {offsets = [0, 1], sizes = [32, 184], strides = [1, 1]} : vector<32x256xbf16> to vector<32x184xbf16>
    %cst_19 = arith.constant dense<0.000000e+00> : vector<32x184xf32>
    %29 = tpu.matmul %27, %28, %cst_19 {dimension_numbers = #tpu.dot_dimension_numbers<[1], [0], [0], [1], [0, 0, 1, 1], [], []>} : vector<32x32xbf16>, vector<32x184xbf16>, vector<32x184xf32> -> vector<32x184xf32>
    %30 = arith.addf %25, %29 : vector<32x184xf32>
    %c2 = arith.constant 2 : index
    %c0_20 = arith.constant 0 : index
    %c0_21 = arith.constant 0 : index
    %31 = vector.load %arg4[%c2, %c0_20, %c0_21] : memref<11x32x32xbf16, #tpu.memory_space<vmem>>, vector<1x32x32xbf16>
    %32 = vector.shape_cast %31 : vector<1x32x32xbf16> to vector<32x32xbf16>
    %33 = vector.extract_strided_slice %21 {offsets = [0, 2], sizes = [32, 184], strides = [1, 1]} : vector<32x256xbf16> to vector<32x184xbf16>
    %cst_22 = arith.constant dense<0.000000e+00> : vector<32x184xf32>
    %34 = tpu.matmul %32, %33, %cst_22 {dimension_numbers = #tpu.dot_dimension_numbers<[1], [0], [0], [1], [0, 0, 1, 1], [], []>} : vector<32x32xbf16>, vector<32x184xbf16>, vector<32x184xf32> -> vector<32x184xf32>
    %35 = arith.addf %30, %34 : vector<32x184xf32>
    %c3 = arith.constant 3 : index
    %c0_23 = arith.constant 0 : index
    %c0_24 = arith.constant 0 : index
    %36 = vector.load %arg4[%c3, %c0_23, %c0_24] : memref<11x32x32xbf16, #tpu.memory_space<vmem>>, vector<1x32x32xbf16>
    %37 = vector.shape_cast %36 : vector<1x32x32xbf16> to vector<32x32xbf16>
    %38 = vector.extract_strided_slice %21 {offsets = [0, 3], sizes = [32, 184], strides = [1, 1]} : vector<32x256xbf16> to vector<32x184xbf16>
    %cst_25 = arith.constant dense<0.000000e+00> : vector<32x184xf32>
    %39 = tpu.matmul %37, %38, %cst_25 {dimension_numbers = #tpu.dot_dimension_numbers<[1], [0], [0], [1], [0, 0, 1, 1], [], []>} : vector<32x32xbf16>, vector<32x184xbf16>, vector<32x184xf32> -> vector<32x184xf32>
    %40 = arith.addf %35, %39 : vector<32x184xf32>
    %c4 = arith.constant 4 : index
    %c0_26 = arith.constant 0 : index
    %c0_27 = arith.constant 0 : index
    %41 = vector.load %arg4[%c4, %c0_26, %c0_27] : memref<11x32x32xbf16, #tpu.memory_space<vmem>>, vector<1x32x32xbf16>
    %42 = vector.shape_cast %41 : vector<1x32x32xbf16> to vector<32x32xbf16>
    %43 = vector.extract_strided_slice %21 {offsets = [0, 4], sizes = [32, 184], strides = [1, 1]} : vector<32x256xbf16> to vector<32x184xbf16>
    %cst_28 = arith.constant dense<0.000000e+00> : vector<32x184xf32>
    %44 = tpu.matmul %42, %43, %cst_28 {dimension_numbers = #tpu.dot_dimension_numbers<[1], [0], [0], [1], [0, 0, 1, 1], [], []>} : vector<32x32xbf16>, vector<32x184xbf16>, vector<32x184xf32> -> vector<32x184xf32>
    %45 = arith.addf %40, %44 : vector<32x184xf32>
    %c5 = arith.constant 5 : index
    %c0_29 = arith.constant 0 : index
    %c0_30 = arith.constant 0 : index
    %46 = vector.load %arg4[%c5, %c0_29, %c0_30] : memref<11x32x32xbf16, #tpu.memory_space<vmem>>, vector<1x32x32xbf16>
    %47 = vector.shape_cast %46 : vector<1x32x32xbf16> to vector<32x32xbf16>
    %48 = vector.extract_strided_slice %21 {offsets = [0, 5], sizes = [32, 184], strides = [1, 1]} : vector<32x256xbf16> to vector<32x184xbf16>
    %cst_31 = arith.constant dense<0.000000e+00> : vector<32x184xf32>
    %49 = tpu.matmul %47, %48, %cst_31 {dimension_numbers = #tpu.dot_dimension_numbers<[1], [0], [0], [1], [0, 0, 1, 1], [], []>} : vector<32x32xbf16>, vector<32x184xbf16>, vector<32x184xf32> -> vector<32x184xf32>
    %50 = arith.addf %45, %49 : vector<32x184xf32>
    %c6 = arith.constant 6 : index
    %c0_32 = arith.constant 0 : index
    %c0_33 = arith.constant 0 : index
    %51 = vector.load %arg4[%c6, %c0_32, %c0_33] : memref<11x32x32xbf16, #tpu.memory_space<vmem>>, vector<1x32x32xbf16>
    %52 = vector.shape_cast %51 : vector<1x32x32xbf16> to vector<32x32xbf16>
    %53 = vector.extract_strided_slice %21 {offsets = [0, 6], sizes = [32, 184], strides = [1, 1]} : vector<32x256xbf16> to vector<32x184xbf16>
    %cst_34 = arith.constant dense<0.000000e+00> : vector<32x184xf32>
    %54 = tpu.matmul %52, %53, %cst_34 {dimension_numbers = #tpu.dot_dimension_numbers<[1], [0], [0], [1], [0, 0, 1, 1], [], []>} : vector<32x32xbf16>, vector<32x184xbf16>, vector<32x184xf32> -> vector<32x184xf32>
    %55 = arith.addf %50, %54 : vector<32x184xf32>
    %c7 = arith.constant 7 : index
    %c0_35 = arith.constant 0 : index
    %c0_36 = arith.constant 0 : index
    %56 = vector.load %arg4[%c7, %c0_35, %c0_36] : memref<11x32x32xbf16, #tpu.memory_space<vmem>>, vector<1x32x32xbf16>
    %57 = vector.shape_cast %56 : vector<1x32x32xbf16> to vector<32x32xbf16>
    %58 = vector.extract_strided_slice %21 {offsets = [0, 7], sizes = [32, 184], strides = [1, 1]} : vector<32x256xbf16> to vector<32x184xbf16>
    %cst_37 = arith.constant dense<0.000000e+00> : vector<32x184xf32>
    %59 = tpu.matmul %57, %58, %cst_37 {dimension_numbers = #tpu.dot_dimension_numbers<[1], [0], [0], [1], [0, 0, 1, 1], [], []>} : vector<32x32xbf16>, vector<32x184xbf16>, vector<32x184xf32> -> vector<32x184xf32>
    %60 = arith.addf %55, %59 : vector<32x184xf32>
    %c8 = arith.constant 8 : index
    %c0_38 = arith.constant 0 : index
    %c0_39 = arith.constant 0 : index
    %61 = vector.load %arg4[%c8, %c0_38, %c0_39] : memref<11x32x32xbf16, #tpu.memory_space<vmem>>, vector<1x32x32xbf16>
    %62 = vector.shape_cast %61 : vector<1x32x32xbf16> to vector<32x32xbf16>
    %63 = vector.extract_strided_slice %21 {offsets = [0, 8], sizes = [32, 184], strides = [1, 1]} : vector<32x256xbf16> to vector<32x184xbf16>
    %cst_40 = arith.constant dense<0.000000e+00> : vector<32x184xf32>
    %64 = tpu.matmul %62, %63, %cst_40 {dimension_numbers = #tpu.dot_dimension_numbers<[1], [0], [0], [1], [0, 0, 1, 1], [], []>} : vector<32x32xbf16>, vector<32x184xbf16>, vector<32x184xf32> -> vector<32x184xf32>
    %65 = arith.addf %60, %64 : vector<32x184xf32>
    %c9 = arith.constant 9 : index
    %c0_41 = arith.constant 0 : index
    %c0_42 = arith.constant 0 : index
    %66 = vector.load %arg4[%c9, %c0_41, %c0_42] : memref<11x32x32xbf16, #tpu.memory_space<vmem>>, vector<1x32x32xbf16>
    %67 = vector.shape_cast %66 : vector<1x32x32xbf16> to vector<32x32xbf16>
    %68 = vector.extract_strided_slice %21 {offsets = [0, 9], sizes = [32, 184], strides = [1, 1]} : vector<32x256xbf16> to vector<32x184xbf16>
    %cst_43 = arith.constant dense<0.000000e+00> : vector<32x184xf32>
    %69 = tpu.matmul %67, %68, %cst_43 {dimension_numbers = #tpu.dot_dimension_numbers<[1], [0], [0], [1], [0, 0, 1, 1], [], []>} : vector<32x32xbf16>, vector<32x184xbf16>, vector<32x184xf32> -> vector<32x184xf32>
    %70 = arith.addf %65, %69 : vector<32x184xf32>
    %c10 = arith.constant 10 : index
    %c0_44 = arith.constant 0 : index
    %c0_45 = arith.constant 0 : index
    %71 = vector.load %arg4[%c10, %c0_44, %c0_45] : memref<11x32x32xbf16, #tpu.memory_space<vmem>>, vector<1x32x32xbf16>
    %72 = vector.shape_cast %71 : vector<1x32x32xbf16> to vector<32x32xbf16>
    %73 = vector.extract_strided_slice %21 {offsets = [0, 10], sizes = [32, 184], strides = [1, 1]} : vector<32x256xbf16> to vector<32x184xbf16>
    %cst_46 = arith.constant dense<0.000000e+00> : vector<32x184xf32>
    %74 = tpu.matmul %72, %73, %cst_46 {dimension_numbers = #tpu.dot_dimension_numbers<[1], [0], [0], [1], [0, 0, 1, 1], [], []>} : vector<32x32xbf16>, vector<32x184xbf16>, vector<32x184xf32> -> vector<32x184xf32>
    %75 = arith.addf %70, %74 : vector<32x184xf32>
    %c1_47 = arith.constant 1 : index
    %c0_48 = arith.constant 0 : index
    %c0_49 = arith.constant 0 : index
    %76 = vector.load %arg2[%c1_47, %c0_48, %c0_49] : memref<2x32x1xf32, #tpu.memory_space<vmem>>, vector<1x32x1xf32>
    %77 = vector.shape_cast %76 : vector<1x32x1xf32> to vector<32x1xf32>
    %78 = vector.broadcast %77 : vector<32x1xf32> to vector<32x184xf32>
    %79 = arith.addf %75, %78 : vector<32x184xf32>
    %cst_50 = arith.constant 0.000000e+00 : f32
    %80 = vector.broadcast %cst_50 : f32 to vector<32x184xf32>
    %81 = arith.cmpf ogt, %79, %80 : vector<32x184xf32>
    %cst_51 = arith.constant 0.000000e+00 : f32
    %82 = vector.broadcast %cst_51 : f32 to vector<32x184xf32>
    %83 = arith.minimumf %79, %82 : vector<32x184xf32>
    %84 = math.exp %83 : vector<32x184xf32>
    %cst_52 = arith.constant 1.000000e+00 : f32
    %85 = vector.broadcast %cst_52 : f32 to vector<32x184xf32>
    %86 = arith.subf %84, %85 : vector<32x184xf32>
    %cst_53 = arith.constant 1.000000e-03 : f32
    %87 = vector.broadcast %cst_53 : f32 to vector<32x184xf32>
    %88 = arith.mulf %87, %86 : vector<32x184xf32>
    %89 = arith.select %81, %79, %88 : vector<32x184xi1>, vector<32x184xf32>
    %90 = vector.shape_cast %89 : vector<32x184xf32> to vector<1x32x184xf32>
    %c0_54 = arith.constant 0 : index
    %c0_55 = arith.constant 0 : index
    %c0_56 = arith.constant 0 : index
    %91 = vector.load %arg5[%c0_54, %c0_55, %c0_56] : memref<2x32x184xbf16, #tpu.memory_space<vmem>>, vector<2x32x184xbf16>
    %92 = arith.extf %91 : vector<2x32x184xbf16> to vector<2x32x184xf32>
    %93 = vector.broadcast %90 : vector<1x32x184xf32> to vector<2x32x184xf32>
    %94 = arith.mulf %93, %92 : vector<2x32x184xf32>
    %cst_57 = arith.constant dense<0.000000e+00> : vector<2x32xf32>
    %95 = vector.multi_reduction <add>, %94, %cst_57 [2] : vector<2x32x184xf32> to vector<2x32xf32>
    %cst_58 = arith.constant dense<0.000000e+00> : vector<2xf32>
    %96 = vector.multi_reduction <add>, %95, %cst_58 [1] : vector<2x32xf32> to vector<2xf32>
    %97 = vector.shape_cast %96 : vector<2xf32> to vector<1x2xf32>
    %98 = vector.extract_strided_slice %17 {offsets = [0, 768], sizes = [32, 768], strides = [1, 1]} : vector<32x1536xbf16> to vector<32x768xbf16>
    %c0_59 = arith.constant 0 : index
    %c0_60 = arith.constant 0 : index
    %99 = vector.load %arg3[%c0_59, %c0_60] : memref<768x256xbf16, #tpu.memory_space<vmem>>, vector<768x256xbf16>
    %cst_61 = arith.constant dense<0.000000e+00> : vector<32x256xf32>
    %100 = tpu.matmul %98, %99, %cst_61 {dimension_numbers = #tpu.dot_dimension_numbers<[1], [0], [0], [1], [0, 0, 1, 1], [], []>} : vector<32x768xbf16>, vector<768x256xbf16>, vector<32x256xf32> -> vector<32x256xf32>
    %101 = arith.truncf %100 : vector<32x256xf32> to vector<32x256xbf16>
    %c0_62 = arith.constant 0 : index
    %c0_63 = arith.constant 0 : index
    %c0_64 = arith.constant 0 : index
    %102 = vector.load %arg4[%c0_62, %c0_63, %c0_64] : memref<11x32x32xbf16, #tpu.memory_space<vmem>>, vector<1x32x32xbf16>
    %103 = vector.shape_cast %102 : vector<1x32x32xbf16> to vector<32x32xbf16>
    %104 = vector.extract_strided_slice %101 {offsets = [0, 0], sizes = [32, 184], strides = [1, 1]} : vector<32x256xbf16> to vector<32x184xbf16>
    %cst_65 = arith.constant dense<0.000000e+00> : vector<32x184xf32>
    %105 = tpu.matmul %103, %104, %cst_65 {dimension_numbers = #tpu.dot_dimension_numbers<[1], [0], [0], [1], [0, 0, 1, 1], [], []>} : vector<32x32xbf16>, vector<32x184xbf16>, vector<32x184xf32> -> vector<32x184xf32>
    %c1_66 = arith.constant 1 : index
    %c0_67 = arith.constant 0 : index
    %c0_68 = arith.constant 0 : index
    %106 = vector.load %arg4[%c1_66, %c0_67, %c0_68] : memref<11x32x32xbf16, #tpu.memory_space<vmem>>, vector<1x32x32xbf16>
    %107 = vector.shape_cast %106 : vector<1x32x32xbf16> to vector<32x32xbf16>
    %108 = vector.extract_strided_slice %101 {offsets = [0, 1], sizes = [32, 184], strides = [1, 1]} : vector<32x256xbf16> to vector<32x184xbf16>
    %cst_69 = arith.constant dense<0.000000e+00> : vector<32x184xf32>
    %109 = tpu.matmul %107, %108, %cst_69 {dimension_numbers = #tpu.dot_dimension_numbers<[1], [0], [0], [1], [0, 0, 1, 1], [], []>} : vector<32x32xbf16>, vector<32x184xbf16>, vector<32x184xf32> -> vector<32x184xf32>
    %110 = arith.addf %105, %109 : vector<32x184xf32>
    %c2_70 = arith.constant 2 : index
    %c0_71 = arith.constant 0 : index
    %c0_72 = arith.constant 0 : index
    %111 = vector.load %arg4[%c2_70, %c0_71, %c0_72] : memref<11x32x32xbf16, #tpu.memory_space<vmem>>, vector<1x32x32xbf16>
    %112 = vector.shape_cast %111 : vector<1x32x32xbf16> to vector<32x32xbf16>
    %113 = vector.extract_strided_slice %101 {offsets = [0, 2], sizes = [32, 184], strides = [1, 1]} : vector<32x256xbf16> to vector<32x184xbf16>
    %cst_73 = arith.constant dense<0.000000e+00> : vector<32x184xf32>
    %114 = tpu.matmul %112, %113, %cst_73 {dimension_numbers = #tpu.dot_dimension_numbers<[1], [0], [0], [1], [0, 0, 1, 1], [], []>} : vector<32x32xbf16>, vector<32x184xbf16>, vector<32x184xf32> -> vector<32x184xf32>
    %115 = arith.addf %110, %114 : vector<32x184xf32>
    %c3_74 = arith.constant 3 : index
    %c0_75 = arith.constant 0 : index
    %c0_76 = arith.constant 0 : index
    %116 = vector.load %arg4[%c3_74, %c0_75, %c0_76] : memref<11x32x32xbf16, #tpu.memory_space<vmem>>, vector<1x32x32xbf16>
    %117 = vector.shape_cast %116 : vector<1x32x32xbf16> to vector<32x32xbf16>
    %118 = vector.extract_strided_slice %101 {offsets = [0, 3], sizes = [32, 184], strides = [1, 1]} : vector<32x256xbf16> to vector<32x184xbf16>
    %cst_77 = arith.constant dense<0.000000e+00> : vector<32x184xf32>
    %119 = tpu.matmul %117, %118, %cst_77 {dimension_numbers = #tpu.dot_dimension_numbers<[1], [0], [0], [1], [0, 0, 1, 1], [], []>} : vector<32x32xbf16>, vector<32x184xbf16>, vector<32x184xf32> -> vector<32x184xf32>
    %120 = arith.addf %115, %119 : vector<32x184xf32>
    %c4_78 = arith.constant 4 : index
    %c0_79 = arith.constant 0 : index
    %c0_80 = arith.constant 0 : index
    %121 = vector.load %arg4[%c4_78, %c0_79, %c0_80] : memref<11x32x32xbf16, #tpu.memory_space<vmem>>, vector<1x32x32xbf16>
    %122 = vector.shape_cast %121 : vector<1x32x32xbf16> to vector<32x32xbf16>
    %123 = vector.extract_strided_slice %101 {offsets = [0, 4], sizes = [32, 184], strides = [1, 1]} : vector<32x256xbf16> to vector<32x184xbf16>
    %cst_81 = arith.constant dense<0.000000e+00> : vector<32x184xf32>
    %124 = tpu.matmul %122, %123, %cst_81 {dimension_numbers = #tpu.dot_dimension_numbers<[1], [0], [0], [1], [0, 0, 1, 1], [], []>} : vector<32x32xbf16>, vector<32x184xbf16>, vector<32x184xf32> -> vector<32x184xf32>
    %125 = arith.addf %120, %124 : vector<32x184xf32>
    %c5_82 = arith.constant 5 : index
    %c0_83 = arith.constant 0 : index
    %c0_84 = arith.constant 0 : index
    %126 = vector.load %arg4[%c5_82, %c0_83, %c0_84] : memref<11x32x32xbf16, #tpu.memory_space<vmem>>, vector<1x32x32xbf16>
    %127 = vector.shape_cast %126 : vector<1x32x32xbf16> to vector<32x32xbf16>
    %128 = vector.extract_strided_slice %101 {offsets = [0, 5], sizes = [32, 184], strides = [1, 1]} : vector<32x256xbf16> to vector<32x184xbf16>
    %cst_85 = arith.constant dense<0.000000e+00> : vector<32x184xf32>
    %129 = tpu.matmul %127, %128, %cst_85 {dimension_numbers = #tpu.dot_dimension_numbers<[1], [0], [0], [1], [0, 0, 1, 1], [], []>} : vector<32x32xbf16>, vector<32x184xbf16>, vector<32x184xf32> -> vector<32x184xf32>
    %130 = arith.addf %125, %129 : vector<32x184xf32>
    %c6_86 = arith.constant 6 : index
    %c0_87 = arith.constant 0 : index
    %c0_88 = arith.constant 0 : index
    %131 = vector.load %arg4[%c6_86, %c0_87, %c0_88] : memref<11x32x32xbf16, #tpu.memory_space<vmem>>, vector<1x32x32xbf16>
    %132 = vector.shape_cast %131 : vector<1x32x32xbf16> to vector<32x32xbf16>
    %133 = vector.extract_strided_slice %101 {offsets = [0, 6], sizes = [32, 184], strides = [1, 1]} : vector<32x256xbf16> to vector<32x184xbf16>
    %cst_89 = arith.constant dense<0.000000e+00> : vector<32x184xf32>
    %134 = tpu.matmul %132, %133, %cst_89 {dimension_numbers = #tpu.dot_dimension_numbers<[1], [0], [0], [1], [0, 0, 1, 1], [], []>} : vector<32x32xbf16>, vector<32x184xbf16>, vector<32x184xf32> -> vector<32x184xf32>
    %135 = arith.addf %130, %134 : vector<32x184xf32>
    %c7_90 = arith.constant 7 : index
    %c0_91 = arith.constant 0 : index
    %c0_92 = arith.constant 0 : index
    %136 = vector.load %arg4[%c7_90, %c0_91, %c0_92] : memref<11x32x32xbf16, #tpu.memory_space<vmem>>, vector<1x32x32xbf16>
    %137 = vector.shape_cast %136 : vector<1x32x32xbf16> to vector<32x32xbf16>
    %138 = vector.extract_strided_slice %101 {offsets = [0, 7], sizes = [32, 184], strides = [1, 1]} : vector<32x256xbf16> to vector<32x184xbf16>
    %cst_93 = arith.constant dense<0.000000e+00> : vector<32x184xf32>
    %139 = tpu.matmul %137, %138, %cst_93 {dimension_numbers = #tpu.dot_dimension_numbers<[1], [0], [0], [1], [0, 0, 1, 1], [], []>} : vector<32x32xbf16>, vector<32x184xbf16>, vector<32x184xf32> -> vector<32x184xf32>
    %140 = arith.addf %135, %139 : vector<32x184xf32>
    %c8_94 = arith.constant 8 : index
    %c0_95 = arith.constant 0 : index
    %c0_96 = arith.constant 0 : index
    %141 = vector.load %arg4[%c8_94, %c0_95, %c0_96] : memref<11x32x32xbf16, #tpu.memory_space<vmem>>, vector<1x32x32xbf16>
    %142 = vector.shape_cast %141 : vector<1x32x32xbf16> to vector<32x32xbf16>
    %143 = vector.extract_strided_slice %101 {offsets = [0, 8], sizes = [32, 184], strides = [1, 1]} : vector<32x256xbf16> to vector<32x184xbf16>
    %cst_97 = arith.constant dense<0.000000e+00> : vector<32x184xf32>
    %144 = tpu.matmul %142, %143, %cst_97 {dimension_numbers = #tpu.dot_dimension_numbers<[1], [0], [0], [1], [0, 0, 1, 1], [], []>} : vector<32x32xbf16>, vector<32x184xbf16>, vector<32x184xf32> -> vector<32x184xf32>
    %145 = arith.addf %140, %144 : vector<32x184xf32>
    %c9_98 = arith.constant 9 : index
    %c0_99 = arith.constant 0 : index
    %c0_100 = arith.constant 0 : index
    %146 = vector.load %arg4[%c9_98, %c0_99, %c0_100] : memref<11x32x32xbf16, #tpu.memory_space<vmem>>, vector<1x32x32xbf16>
    %147 = vector.shape_cast %146 : vector<1x32x32xbf16> to vector<32x32xbf16>
    %148 = vector.extract_strided_slice %101 {offsets = [0, 9], sizes = [32, 184], strides = [1, 1]} : vector<32x256xbf16> to vector<32x184xbf16>
    %cst_101 = arith.constant dense<0.000000e+00> : vector<32x184xf32>
    %149 = tpu.matmul %147, %148, %cst_101 {dimension_numbers = #tpu.dot_dimension_numbers<[1], [0], [0], [1], [0, 0, 1, 1], [], []>} : vector<32x32xbf16>, vector<32x184xbf16>, vector<32x184xf32> -> vector<32x184xf32>
    %150 = arith.addf %145, %149 : vector<32x184xf32>
    %c10_102 = arith.constant 10 : index
    %c0_103 = arith.constant 0 : index
    %c0_104 = arith.constant 0 : index
    %151 = vector.load %arg4[%c10_102, %c0_103, %c0_104] : memref<11x32x32xbf16, #tpu.memory_space<vmem>>, vector<1x32x32xbf16>
    %152 = vector.shape_cast %151 : vector<1x32x32xbf16> to vector<32x32xbf16>
    %153 = vector.extract_strided_slice %101 {offsets = [0, 10], sizes = [32, 184], strides = [1, 1]} : vector<32x256xbf16> to vector<32x184xbf16>
    %cst_105 = arith.constant dense<0.000000e+00> : vector<32x184xf32>
    %154 = tpu.matmul %152, %153, %cst_105 {dimension_numbers = #tpu.dot_dimension_numbers<[1], [0], [0], [1], [0, 0, 1, 1], [], []>} : vector<32x32xbf16>, vector<32x184xbf16>, vector<32x184xf32> -> vector<32x184xf32>
    %155 = arith.addf %150, %154 : vector<32x184xf32>
    %c1_106 = arith.constant 1 : index
    %c0_107 = arith.constant 0 : index
    %c0_108 = arith.constant 0 : index
    %156 = vector.load %arg2[%c1_106, %c0_107, %c0_108] : memref<2x32x1xf32, #tpu.memory_space<vmem>>, vector<1x32x1xf32>
    %157 = vector.shape_cast %156 : vector<1x32x1xf32> to vector<32x1xf32>
    %158 = vector.broadcast %157 : vector<32x1xf32> to vector<32x184xf32>
    %159 = arith.addf %155, %158 : vector<32x184xf32>
    %cst_109 = arith.constant 0.000000e+00 : f32
    %160 = vector.broadcast %cst_109 : f32 to vector<32x184xf32>
    %161 = arith.cmpf ogt, %159, %160 : vector<32x184xf32>
    %cst_110 = arith.constant 0.000000e+00 : f32
    %162 = vector.broadcast %cst_110 : f32 to vector<32x184xf32>
    %163 = arith.minimumf %159, %162 : vector<32x184xf32>
    %164 = math.exp %163 : vector<32x184xf32>
    %cst_111 = arith.constant 1.000000e+00 : f32
    %165 = vector.broadcast %cst_111 : f32 to vector<32x184xf32>
    %166 = arith.subf %164, %165 : vector<32x184xf32>
    %cst_112 = arith.constant 1.000000e-03 : f32
    %167 = vector.broadcast %cst_112 : f32 to vector<32x184xf32>
    %168 = arith.mulf %167, %166 : vector<32x184xf32>
    %169 = arith.select %161, %159, %168 : vector<32x184xi1>, vector<32x184xf32>
    %170 = vector.shape_cast %169 : vector<32x184xf32> to vector<1x32x184xf32>
    %c0_113 = arith.constant 0 : index
    %c0_114 = arith.constant 0 : index
    %c0_115 = arith.constant 0 : index
    %171 = vector.load %arg5[%c0_113, %c0_114, %c0_115] : memref<2x32x184xbf16, #tpu.memory_space<vmem>>, vector<2x32x184xbf16>
    %172 = arith.extf %171 : vector<2x32x184xbf16> to vector<2x32x184xf32>
    %173 = vector.broadcast %170 : vector<1x32x184xf32> to vector<2x32x184xf32>
    %174 = arith.mulf %173, %172 : vector<2x32x184xf32>
    %cst_116 = arith.constant dense<0.000000e+00> : vector<2x32xf32>
    %175 = vector.multi_reduction <add>, %174, %cst_116 [2] : vector<2x32x184xf32> to vector<2x32xf32>
    %cst_117 = arith.constant dense<0.000000e+00> : vector<2xf32>
    %176 = vector.multi_reduction <add>, %175, %cst_117 [1] : vector<2x32xf32> to vector<2xf32>
    %177 = vector.shape_cast %176 : vector<2xf32> to vector<1x2xf32>
    %178 = tpu.concatenate %97, %177 in 0 : vector<1x2xf32>, vector<1x2xf32> -> vector<2x2xf32>
    %c0_118 = arith.constant 0 : index
    %c0_119 = arith.constant 0 : index
    %179 = vector.load %arg6[%c0_118, %c0_119] : memref<1x2xf32, #tpu.memory_space<vmem>>, vector<1x2xf32>
    %180 = vector.broadcast %179 : vector<1x2xf32> to vector<2x2xf32>
    %181 = arith.addf %178, %180 : vector<2x2xf32>
    %c0_120 = arith.constant 0 : index
    %c0_121 = arith.constant 0 : index
    %182 = vector.load %arg7[%c0_120, %c0_121] : memref<2x2xf32, #tpu.memory_space<vmem>>, vector<2x2xf32>
    tpu.vector_store %arg7[%c0_120, %c0_121], %181 {strides = array<i32>} : memref<2x2xf32, #tpu.memory_space<vmem>>, vector<2x2xf32>,
    return
  }
}

</mosaic_0001>

<bundles_post_ra>
// kernel: eegnet_forward.1
= control target key start
LH: loop header
LB: loop body
LE: loop exit
PB: predicated region body
PF: predicated region fallthrough
CT: control target
= control target key end

     0   :  { %vm493_vm0 = vcmask 1044480   ;;  %v5560_v24 = vmov 0   ;;  %vm486_vm1 = vcmask 736256   ;;  %s8435_s0 = inlined_call_operand.vmem [shape: bf16[90,1536], index: 0, kind: input, shape index: {}]   ;;  %s8436_s1 = inlined_call_operand.vmem [shape: bf16[32,90], index: 1, kind: input, shape index: {}]   ;;  %s8437_s2 = inlined_call_operand.vmem [shape: f32[2,32,1], index: 2, kind: input, shape index: {}]   ;;  %s8438_s3 = inlined_call_operand.vmem [shape: bf16[768,256], index: 3, kind: input, shape index: {}]   ;;  %s8439_s4 = inlined_call_operand.vmem [shape: bf16[11,32,32], index: 4, kind: input, shape index: {}]   ;;  %s8440_s5 = inlined_call_operand.vmem [shape: bf16[2,32,184], index: 5, kind: input, shape index: {}]   ;;  %s8441_s6 = inlined_call_operand.vmem [shape: f32[1,2], index: 6, kind: input, shape index: {}]   ;;  %s8442_s7 = inlined_call_operand.hbm [shape: f32[2,2], index: 7, kind: output, shape index: {}]  }
   0x1   :  { %v4438_v0 = vld [vmem:[%s8435_s0 + $0x1e0] sm:$0xf]  ;;  %v5244_v1 = vld [vmem:[%s8435_s0 + $0x20c] sm:$0x10]  ;;  %v5238_v3 = vld [vmem:[%s8435_s0 + $0x1e4] sm:$0xf]  ;;  %5380 = vset.pattern.permute.xlu0 %v5560_v24  ;;  %5381 = vset.pattern.permute.xlu1 %v5560_v24 }
   0x2   :  { %v4439_v2 = vor.u32 %v5244_v1, %v4438_v0  ;;  %v4440_v4 = vld [vmem:[%s8435_s0 + $0x210] sm:$0x10]  ;;  %v4446_v5 = vld [vmem:[%s8435_s0 + $0x1e8] sm:$0xf]  ;;  %v5245_v7 = vld [vmem:[%s8435_s0 + $0x214] sm:$0x10]  ;;  %5382 = vset.pattern.permute.xlu2 %v5560_v24 }
   0x3   :  { %v4443_v6 = vor.u32 %v5238_v3, %v4440_v4  ;;  %v5239_v8 = vld [vmem:[%s8435_s0 + $0x1ec] sm:$0xf]  ;;  %v4448_v9 = vld [vmem:[%s8435_s0 + $0x218] sm:$0x10]  ;;  %v4447_v11 = vor.u32 %v5245_v7, %v4446_v5  ;;  %v4390_v13 = vld [vmem:[%s8435_s0 + $0x180] sm:$0xf] }
   0x4   :  { %v495_v10 = vsel %vm493_vm0, %v4439_v2, 0  ;;  %v4451_v12 = vor.u32 %v5239_v8, %v4448_v9  ;;  %v5232_v14 = vld [vmem:[%s8435_s0 + $0x1ac] sm:$0xf0]  ;;  %v5226_v17 = vld [vmem:[%s8435_s0 + $0x184] sm:$0xf] }
   0x5   :  { %532 = vmatpush.bf16.msra.mxu0 %v495_v10  ;;  %v498_v15 = vsel %vm493_vm0, %v4443_v6, 0  ;;  %v4391_v16 = vor.u32 %v5232_v14, %v4390_v13  ;;  %v4392_v18 = vld [vmem:[%s8435_s0 + $0x1b0] sm:$0xf0]  ;;  %v501_v19 = vsel %vm493_vm0, %v4447_v11, 0  ;;  %v4398_v22 = vld [vmem:[%s8435_s0 + $0x188] sm:$0xf] }
   0x6   :  { %551 = vmatpush.bf16.msra.mxu1 %v498_v15  ;;  %v504_v20 = vsel %vm493_vm0, %v4451_v12, 0  ;;  %v4395_v21 = vor.u32 %v5226_v17, %v4392_v18  ;;  %v5233_v23 = vld [vmem:[%s8435_s0 + $0x1b4] sm:$0xf0]  ;;  %570 = vmatpush.bf16.msra.mxu2 %v501_v19  ;;  %v5227_v26 = vld [vmem:[%s8435_s0 + $0x18c] sm:$0xf]  ;;  %v104_v7 = vld [vmem:[%s8437_s2] sm:$0xff] }
   0x7   :  { %589 = vmatpush.bf16.msra.mxu3 %v504_v20  ;;  %v4399_v25 = vor.u32 %v5233_v23, %v4398_v22  ;;  %v4400_v27 = vld [vmem:[%s8435_s0 + $0x1b8] sm:$0xf0]  ;;  %v4342_v28 = vld [vmem:[%s8435_s0 + $0x120] sm:$0xf]  ;;  %v5220_v30 = vld [vmem:[%s8435_s0 + $0x14c] sm:$0xf0]  ;;  %110 = vperm.xlu0 %5380, %v104_v7  }
   0x8   :  { %v4403_v29 = vor.u32 %v5227_v26, %v4400_v27  ;;  %v5214_v31 = vld [vmem:[%s8435_s0 + $0x124] sm:$0xf]  ;;  %v4344_v32 = vld [vmem:[%s8435_s0 + $0x150] sm:$0xf0]  ;;  %v4343_v33 = vor.u32 %v5220_v30, %v4342_v28  ;;  %v4350_v34 = vld [vmem:[%s8435_s0 + $0x128] sm:$0xf] }
   0x9   :  { %533 = vmatpush.bf16.msra.mxu0 %v4391_v16  ;;  %v5221_v35 = vld [vmem:[%s8435_s0 + $0x154] sm:$0xf0]  ;;  %v5215_v36 = vld [vmem:[%s8435_s0 + $0x12c] sm:$0xf]  ;;  %v4347_v37 = vor.u32 %v5214_v31, %v4344_v32  ;;  %v4352_v38 = vld [vmem:[%s8435_s0 + $0x158] sm:$0xf0] }
   0xa   :  { %552 = vmatpush.bf16.msra.mxu1 %v4395_v21  ;;  %v4294_v39 = vld [vmem:[%s8435_s0 + $0xc0] sm:$0xf]  ;;  %v5208_v40 = vld [vmem:[%s8435_s0 + $0xec] sm:$0xf0]  ;;  %571 = vmatpush.bf16.msra.mxu2 %v4399_v25  ;;  %v4351_v41 = vor.u32 %v5221_v35, %v4350_v34  ;;  %v4355_v42 = vor.u32 %v5215_v36, %v4352_v38  ;;  %v5202_v43 = vld [vmem:[%s8435_s0 + $0xc4] sm:$0xf] }
   0xb   :  { %590 = vmatpush.bf16.msra.mxu3 %v4403_v29  ;;  %v4296_v44 = vld [vmem:[%s8435_s0 + $0xf0] sm:$0xf0]  ;;  %v4302_v45 = vld [vmem:[%s8435_s0 + $0xc8] sm:$0xf]  ;;  %v5209_v46 = vld [vmem:[%s8435_s0 + $0xf4] sm:$0xf0]  ;;  %v4295_v49 = vor.u32 %v5208_v40, %v4294_v39 }
   0xc   :  { %v5203_v47 = vld [vmem:[%s8435_s0 + $0xcc] sm:$0xf]  ;;  %v4304_v48 = vld [vmem:[%s8435_s0 + $0xf8] sm:$0xf0]  ;;  %v4299_v50 = vor.u32 %v5202_v43, %v4296_v44  ;;  %v4246_v51 = vld [vmem:[%s8435_s0 + $0x60] sm:$0xf]  ;;  %v4303_v54 = vor.u32 %v5209_v46, %v4302_v45 }
   0xd   :  { %534 = vmatpush.bf16.msra.mxu0 %v4343_v33  ;;  %v5196_v52 = vld [vmem:[%s8435_s0 + $0x8c] sm:$0xf0]  ;;  %v5190_v53 = vld [vmem:[%s8435_s0 + $0x64] sm:$0xf]  ;;  %v4307_v55 = vor.u32 %v5203_v47, %v4304_v48  ;;  %v4248_v56 = vld [vmem:[%s8435_s0 + $0x90] sm:$0xf0] }
   0xe   :  { %553 = vmatpush.bf16.msra.mxu1 %v4347_v37  ;;  %572 = vmatpush.bf16.msra.mxu2 %v4351_v41  ;;  %v4254_v57 = vld [vmem:[%s8435_s0 + $0x68] sm:$0xf]  ;;  %v5197_v58 = vld [vmem:[%s8435_s0 + $0x94] sm:$0xf0]  ;;  %v5191_v59 = vld [vmem:[%s8435_s0 + $0x6c] sm:$0xf]  ;;  %v4247_v62 = vor.u32 %v5196_v52, %v4246_v51  ;;  %v4251_v2 = vor.u32 %v5190_v53, %v4248_v56 }
   0xf   :  { %591 = vmatpush.bf16.msra.mxu3 %v4355_v42  ;;  %v4256_v60 = vld [vmem:[%s8435_s0 + $0x98] sm:$0xf0]  ;;  %v4198_v61 = vld [vmem:[%s8435_s0] sm:$0xf]  ;;  %v5184_v63 = vld [vmem:[%s8435_s0 + $0x2c] sm:$0xf0]  ;;  %v4255_v9 = vor.u32 %v5197_v58, %v4254_v57 }
  0x10   :  { %v5178_v0 = vld [vmem:[%s8435_s0 + $0x4] sm:$0xf]  ;;  %v4200_v1 = vld [vmem:[%s8435_s0 + $0x30] sm:$0xf0]  ;;  %v4206_v3 = vld [vmem:[%s8435_s0 + $0x8] sm:$0xf]  ;;  %v4259_v10 = vor.u32 %v5191_v59, %v4256_v60  ;;  %v4199_v18 = vor.u32 %v5184_v63, %v4198_v61 }
  0x11   :  { %535 = vmatpush.bf16.msra.mxu0 %v4295_v49  ;;  %v5185_v4 = vld [vmem:[%s8435_s0 + $0x34] sm:$0xf0]  ;;  %v5179_v5 = vld [vmem:[%s8435_s0 + $0xc] sm:$0xf]  ;;  %v4208_v6 = vld [vmem:[%s8435_s0 + $0x38] sm:$0xf0]  ;;  %v4203_v21 = vor.u32 %v5178_v0, %v4200_v1 }
  0x12   :  { %554 = vmatpush.bf16.msra.mxu1 %v4299_v50  ;;  %v4454_v8 = vld [vmem:[%s8435_s0 + $0x1f0] sm:$0xf]  ;;  %573 = vmatpush.bf16.msra.mxu2 %v4303_v54  ;;  %v5246_v11 = vld [vmem:[%s8435_s0 + $0x21c] sm:$0x10]  ;;  %v5240_v12 = vld [vmem:[%s8435_s0 + $0x1f4] sm:$0xf]  ;;  %v4207_v23 = vor.u32 %v5185_v4, %v4206_v3  ;;  %v4211_v24 = vor.u32 %v5179_v5, %v4208_v6 }
  0x13   :  { %592 = vmatpush.bf16.msra.mxu3 %v4307_v55  ;;  %v4456_v13 = vld [vmem:[%s8435_s0 + $0x220] sm:$0x10]  ;;  %v4455_v14 = vor.u32 %v5246_v11, %v4454_v8  ;;  %v4462_v15 = vld [vmem:[%s8435_s0 + $0x1f8] sm:$0xf]  ;;  %v5247_v16 = vld [vmem:[%s8435_s0 + $0x224] sm:$0x10] }
  0x14   :  { %v5241_v17 = vld [vmem:[%s8435_s0 + $0x1fc] sm:$0xf]  ;;  %v4459_v19 = vor.u32 %v5240_v12, %v4456_v13  ;;  %v4464_v20 = vld [vmem:[%s8435_s0 + $0x228] sm:$0x10]  ;;  %v4463_v22 = vor.u32 %v5247_v16, %v4462_v15  ;;  %v5791_v27 = vld [vmem:[%s8436_s1] sm:$0xff] }
  0x15   :  { %536 = vmatpush.bf16.msra.mxu0 %v4247_v62  ;;  %v507_v25 = vsel %vm493_vm0, %v4455_v14, 0  ;;  %v4467_v26 = vor.u32 %v5241_v17, %v4464_v20  ;;  %v4406_v28 = vld [vmem:[%s8435_s0 + $0x190] sm:$0xf]  ;;  %v5234_v29 = vld [vmem:[%s8435_s0 + $0x1bc] sm:$0xf0]  ;;  %v105_v44 = vld [vmem:[%s8437_s2 + $0x8] sm:$0xff] }
  0x16   :  { %555 = vmatpush.bf16.msra.mxu1 %v4251_v2  ;;  %574 = vmatpush.bf16.msra.mxu2 %v4255_v9  ;;  %v510_v30 = vsel %vm493_vm0, %v4459_v19, 0  ;;  %v5228_v31 = vld [vmem:[%s8435_s0 + $0x194] sm:$0xf]  ;;  %v4408_v32 = vld [vmem:[%s8435_s0 + $0x1c0] sm:$0xf0]  ;;  %v513_v33 = vsel %vm493_vm0, %v4463_v22, 0  ;;  %v4407_v37 = vor.u32 %v5234_v29, %v4406_v28 }
  0x17   :  { %593 = vmatpush.bf16.msra.mxu3 %v4259_v10  ;;  %v4414_v34 = vld [vmem:[%s8435_s0 + $0x198] sm:$0xf]  ;;  %v5235_v35 = vld [vmem:[%s8435_s0 + $0x1c4] sm:$0xf0]  ;;  %v516_v36 = vsel %vm493_vm0, %v4467_v26, 0  ;;  %v4411_v39 = vor.u32 %v5228_v31, %v4408_v32  ;;  %v106_v49 = vld [vmem:[%s8437_s2 + $0x10] sm:$0xff]  ;;  %115 = vperm.xlu0 %5380, %v105_v44  }
  0x18   :  { %v5229_v38 = vld [vmem:[%s8435_s0 + $0x19c] sm:$0xf]  ;;  %v4416_v40 = vld [vmem:[%s8435_s0 + $0x1c8] sm:$0xf0]  ;;  %v4358_v41 = vld [vmem:[%s8435_s0 + $0x130] sm:$0xf]  ;;  %v4415_v43 = vor.u32 %v5235_v35, %v4414_v34  ;;  %120 = vperm.xlu1 %5381, %v106_v49  }
  0x19   :  { %537 = vmatpush.bf16.msra.mxu0 %v4199_v18  ;;  %v5222_v42 = vld [vmem:[%s8435_s0 + $0x15c] sm:$0xf0]  ;;  %v5216_v45 = vld [vmem:[%s8435_s0 + $0x134] sm:$0xf]  ;;  %v4360_v46 = vld [vmem:[%s8435_s0 + $0x160] sm:$0xf0]  ;;  %v4419_v50 = vor.u32 %v5229_v38, %v4416_v40 }
  0x1a   :  { %556 = vmatpush.bf16.msra.mxu1 %v4203_v21  ;;  %575 = vmatpush.bf16.msra.mxu2 %v4207_v23  ;;  %v4366_v47 = vld [vmem:[%s8435_s0 + $0x138] sm:$0xf]  ;;  %v5223_v48 = vld [vmem:[%s8435_s0 + $0x164] sm:$0xf0]  ;;  %v4359_v51 = vor.u32 %v5222_v42, %v4358_v41  ;;  %v5217_v52 = vld [vmem:[%s8435_s0 + $0x13c] sm:$0xf]  ;;  %v4363_v53 = vor.u32 %v5216_v45, %v4360_v46 }
  0x1b   :  { %594 = vmatpush.bf16.msra.mxu3 %v4211_v24  ;;  %v4368_v54 = vld [vmem:[%s8435_s0 + $0x168] sm:$0xf0]  ;;  %v4310_v55 = vld [vmem:[%s8435_s0 + $0xd0] sm:$0xf]  ;;  %v5210_v56 = vld [vmem:[%s8435_s0 + $0xfc] sm:$0xf0]  ;;  %v4367_v57 = vor.u32 %v5223_v48, %v4366_v47 }
  0x1c   :  { %4484 = vmatmul.msk.bf16.vlgmr.msra.gmra.mxu0 %vm486_vm1, %v5791_v27  ;;  %v5204_v58 = vld [vmem:[%s8435_s0 + $0xd4] sm:$0xf]  ;;  %v4312_v59 = vld [vmem:[%s8435_s0 + $0x100] sm:$0xf0]  ;;  %v4318_v60 = vld [vmem:[%s8435_s0 + $0xd8] sm:$0xf]  ;;  %v4371_v62 = vor.u32 %v5217_v52, %v4368_v54  ;;  %v4311_v63 = vor.u32 %v5210_v56, %v4310_v55 }
  0x1d   :  { %608 = vmatpush.bf16.msrb.mxu0 %v507_v25  ;;  %4486 = vmatmul.msk.bf16.vlgmr.msra.gmra.mxu1 %vm486_vm1, %v5791_v27  ;;  %v5211_v61 = vld [vmem:[%s8435_s0 + $0x104] sm:$0xf0]  ;;  %v5205_v0 = vld [vmem:[%s8435_s0 + $0xdc] sm:$0xf]  ;;  %v4320_v1 = vld [vmem:[%s8435_s0 + $0x108] sm:$0xf0]  ;;  %v4315_v2 = vor.u32 %v5204_v58, %v4312_v59 }
  0x1e   :  { %627 = vmatpush.bf16.msrb.mxu1 %v510_v30  ;;  %646 = vmatpush.bf16.msrb.mxu2 %v513_v33  ;;  %v4262_v3 = vld [vmem:[%s8435_s0 + $0x70] sm:$0xf]  ;;  %v5198_v4 = vld [vmem:[%s8435_s0 + $0x9c] sm:$0xf0]  ;;  %v5192_v5 = vld [vmem:[%s8435_s0 + $0x74] sm:$0xf]  ;;  %v4319_v6 = vor.u32 %v5211_v61, %v4318_v60  ;;  %v4323_v17 = vor.u32 %v5205_v0, %v4320_v1 }
  0x1f   :  { %4488 = vmatmul.msk.bf16.vlgmr.msra.gmra.mxu2 %vm486_vm1, %v5791_v27  ;;  %4490 = vmatmul.msk.bf16.vlgmr.msra.gmra.mxu3 %vm486_vm1, %v5791_v27  ;;  %v4264_v7 = vld [vmem:[%s8435_s0 + $0xa0] sm:$0xf0]  ;;  %v4270_v8 = vld [vmem:[%s8435_s0 + $0x78] sm:$0xf]  ;;  %v5199_v9 = vld [vmem:[%s8435_s0 + $0xa4] sm:$0xf0]  ;;  %v4263_v18 = vor.u32 %v5198_v4, %v4262_v3 }
  0x20   :  { %665 = vmatpush.bf16.msrb.mxu3 %v516_v36  ;;  %v5903_v10 = vld [vmem:[%s8436_s1 + $0x8] sm:$0xff]  ;;  %v5193_v11 = vld [vmem:[%s8435_s0 + $0x7c] sm:$0xf]  ;;  %v4214_v13 = vld [vmem:[%s8435_s0 + $0x10] sm:$0xf]  ;;  %v4267_v22 = vor.u32 %v5192_v5, %v4264_v7  ;;  %v4271_v26 = vor.u32 %v5199_v9, %v4270_v8 }
  0x21   :  { %609 = vmatpush.bf16.msrb.mxu0 %v4407_v37  ;;  %v4272_v12 = vld [vmem:[%s8435_s0 + $0xa8] sm:$0xf0]  ;;  %v107_v14 = vld [vmem:[%s8437_s2 + $0x18] sm:$0xff]  ;;  %v4470_v15 = vld [vmem:[%s8435_s0 + $0x200] sm:$0xf] }
  0x22   :  { %628 = vmatpush.bf16.msrb.mxu1 %v4411_v39  ;;  %647 = vmatpush.bf16.msrb.mxu2 %v4415_v43  ;;  %v5248_v16 = vld [vmem:[%s8435_s0 + $0x22c] sm:$0x10]  ;;  %v5186_v19 = vld [vmem:[%s8435_s0 + $0x3c] sm:$0xf0]  ;;  %v5242_v20 = vld [vmem:[%s8435_s0 + $0x204] sm:$0xf] }
  0x23   :  { %v4472_v21 = vld [vmem:[%s8435_s0 + $0x230] sm:$0x10]  ;;  %v4478_v24 = vld [vmem:[%s8435_s0 + $0x208] sm:$0xf]  ;;  %v5249_v25 = vld [vmem:[%s8435_s0 + $0x234] sm:$0x10]  ;;  %125 = vperm.xlu1 %5381, %v107_v14   ;;  %v4471_v29 = vor.u32 %v5248_v16, %v4470_v15 }
  0x24   :  { %666 = vmatpush.bf16.msrb.mxu3 %v4419_v50  ;;  %v5180_v23 = vld [vmem:[%s8435_s0 + $0x14] sm:$0xf]  ;;  %v4216_v28 = vld [vmem:[%s8435_s0 + $0x40] sm:$0xf0]  ;;  %v5243_v30 = vld [vmem:[%s8435_s0 + $0x20c] sm:$0xf]  ;;  %v4475_v34 = vor.u32 %v5242_v20, %v4472_v21 }
  0x25   :  { %610 = vmatpush.bf16.msrb.mxu0 %v4359_v51  ;;  %v4480_v31 = vld [vmem:[%s8435_s0 + $0x238] sm:$0x10]  ;;  %v4222_v32 = vld [vmem:[%s8435_s0 + $0x18] sm:$0xf]  ;;  %v5187_v33 = vld [vmem:[%s8435_s0 + $0x44] sm:$0xf0] }
  0x26   :  { %629 = vmatpush.bf16.msrb.mxu1 %v4363_v53  ;;  %648 = vmatpush.bf16.msrb.mxu2 %v4367_v57 }
  0x28   :  { %667 = vmatpush.bf16.msrb.mxu3 %v4371_v62 }
  0x29   :  { %611 = vmatpush.bf16.msrb.mxu0 %v4311_v63 }
  0x2a   :  { %630 = vmatpush.bf16.msrb.mxu1 %v4315_v2  ;;  %649 = vmatpush.bf16.msrb.mxu2 %v4319_v6 }
  0x2b   :  { %12 = vsyncpa [#allocation3], 0  ;;  %v4275_v35 = vor.u32 %v5193_v11, %v4272_v12  ;;  %v4215_v36 = vor.u32 %v5186_v19, %v4214_v13  ;;  %v4479_v37 = vor.u32 %v5249_v25, %v4478_v24  ;;  %v4219_v38 = vor.u32 %v5180_v23, %v4216_v28  ;;  %v5181_v39 = vld [vmem:[%s8435_s0 + $0x1c] sm:$0xf]  ;;  %v4224_v40 = vld [vmem:[%s8435_s0 + $0x48] sm:$0xf0] }
  0x2c   :  { %668 = vmatpush.bf16.msrb.mxu3 %v4323_v17  ;;  %4485 = vmatmul.msk.bf16.gmra.mxu0 %vm486_vm1, %v5903_v10  ;;  %v4483_v41 = vor.u32 %v5243_v30, %v4480_v31  ;;  %v4223_v42 = vor.u32 %v5187_v33, %v4222_v32  ;;  %v519_v43 = vsel %vm493_vm0, %v4471_v29, 0  ;;  %v4422_v44 = vld [vmem:[%s8435_s0 + $0x1a0] sm:$0xf]  ;;  %v5236_v45 = vld [vmem:[%s8435_s0 + $0x1cc] sm:$0xf0]  ;;  %v522_v46 = vsel %vm493_vm0, %v4475_v34, 0 }
  0x2d   :  { %612 = vmatpush.bf16.msrb.mxu0 %v4263_v18  ;;  %4487 = vmatmul.msk.bf16.gmra.mxu1 %vm486_vm1, %v5903_v10  ;;  %v5230_v47 = vld [vmem:[%s8435_s0 + $0x1a4] sm:$0xf]  ;;  %v4424_v48 = vld [vmem:[%s8435_s0 + $0x1d0] sm:$0xf0]  ;;  %v4227_v49 = vor.u32 %v5181_v39, %v4224_v40  ;;  %v525_v50 = vsel %vm493_vm0, %v4479_v37, 0  ;;  %v4423_v54 = vor.u32 %v5236_v45, %v4422_v44  ;;  %s5562_s28 = smov 126  }
  0x2e   :  { %631 = vmatpush.bf16.msrb.mxu1 %v4267_v22  ;;  %650 = vmatpush.bf16.msrb.mxu2 %v4271_v26  ;;  %v4430_v51 = vld [vmem:[%s8435_s0 + $0x1a8] sm:$0xf]  ;;  %v5237_v52 = vld [vmem:[%s8435_s0 + $0x1d4] sm:$0xf0]  ;;  %v528_v53 = vsel %vm493_vm0, %v4483_v41, 0  ;;  %v4427_v56 = vor.u32 %v5230_v47, %v4424_v48  ;;  %s5563_s29 = smov 125  }
  0x2f   :  { %4489 = vmatmul.msk.bf16.gmra.mxu2 %vm486_vm1, %v5903_v10  ;;  %4491 = vmatmul.msk.bf16.gmra.mxu3 %vm486_vm1, %v5903_v10  ;;  %v5231_v55 = vld [vmem:[%s8435_s0 + $0x1ac] sm:$0xf]  ;;  %v4432_v57 = vld [vmem:[%s8435_s0 + $0x1d8] sm:$0xf0]  ;;  %v4374_v58 = vld [vmem:[%s8435_s0 + $0x140] sm:$0xf]  ;;  %v4431_v60 = vor.u32 %v5237_v52, %v4430_v51 }
  0x30   :  { %669 = vmatpush.bf16.msrb.mxu3 %v4275_v35  ;;  %v5224_v59 = vld [vmem:[%s8435_s0 + $0x16c] sm:$0xf0]  ;;  %v5218_v61 = vld [vmem:[%s8435_s0 + $0x144] sm:$0xf]  ;;  %v4376_v62 = vld [vmem:[%s8435_s0 + $0x170] sm:$0xf0]  ;;  %v4435_v1 = vor.u32 %v5231_v55, %v4432_v57 }
  0x31   :  { %613 = vmatpush.bf16.msrb.mxu0 %v4215_v36  ;;  %v4382_v63 = vld [vmem:[%s8435_s0 + $0x148] sm:$0xf]  ;;  %v5225_v0 = vld [vmem:[%s8435_s0 + $0x174] sm:$0xf0]  ;;  %v4375_v2 = vor.u32 %v5224_v59, %v4374_v58  ;;  %v4379_v3 = vor.u32 %v5218_v61, %v4376_v62  ;;  %v5219_v4 = vld [vmem:[%s8435_s0 + $0x14c] sm:$0xf] }
  0x32   :  { %632 = vmatpush.bf16.msrb.mxu1 %v4219_v38  ;;  %651 = vmatpush.bf16.msrb.mxu2 %v4223_v42  ;;  %v4384_v5 = vld [vmem:[%s8435_s0 + $0x178] sm:$0xf0]  ;;  %v4383_v6 = vor.u32 %v5225_v0, %v4382_v63  ;;  %v4326_v7 = vld [vmem:[%s8435_s0 + $0xe0] sm:$0xf]  ;;  %v5212_v8 = vld [vmem:[%s8435_s0 + $0x10c] sm:$0xf0] }
  0x33   :  { %v5206_v9 = vld [vmem:[%s8435_s0 + $0xe4] sm:$0xf]  ;;  %v4387_v11 = vor.u32 %v5219_v4, %v4384_v5  ;;  %v4328_v12 = vld [vmem:[%s8435_s0 + $0x110] sm:$0xf0]  ;;  %v4334_v13 = vld [vmem:[%s8435_s0 + $0xe8] sm:$0xf]  ;;  %v4327_v15 = vor.u32 %v5212_v8, %v4326_v7 }
  0x34   :  { %670 = vmatpush.bf16.msrb.mxu3 %v4227_v49  ;;  %v5213_v14 = vld [vmem:[%s8435_s0 + $0x114] sm:$0xf0]  ;;  %v5207_v16 = vld [vmem:[%s8435_s0 + $0xec] sm:$0xf]  ;;  %v4336_v17 = vld [vmem:[%s8435_s0 + $0x118] sm:$0xf0]  ;;  %v4331_v20 = vor.u32 %v5206_v9, %v4328_v12 }
  0x35   :  { %684 = vmatpush.bf16.msra.mxu0 %v519_v43  ;;  %v4278_v18 = vld [vmem:[%s8435_s0 + $0x80] sm:$0xf]  ;;  %v5200_v19 = vld [vmem:[%s8435_s0 + $0xac] sm:$0xf0]  ;;  %v4335_v21 = vor.u32 %v5213_v14, %v4334_v13  ;;  %v5194_v22 = vld [vmem:[%s8435_s0 + $0x84] sm:$0xf]  ;;  %v4339_v23 = vor.u32 %v5207_v16, %v4336_v17 }
  0x36   :  { %703 = vmatpush.bf16.msra.mxu1 %v522_v46  ;;  %722 = vmatpush.bf16.msra.mxu2 %v525_v50  ;;  %v4280_v24 = vld [vmem:[%s8435_s0 + $0xb0] sm:$0xf0]  ;;  %v4286_v25 = vld [vmem:[%s8435_s0 + $0x88] sm:$0xf]  ;;  %v5201_v26 = vld [vmem:[%s8435_s0 + $0xb4] sm:$0xf0]  ;;  %v4279_v28 = vor.u32 %v5200_v19, %v4278_v18 }
  0x37   :  { %v5195_v29 = vld [vmem:[%s8435_s0 + $0x8c] sm:$0xf]  ;;  %v4288_v30 = vld [vmem:[%s8435_s0 + $0xb8] sm:$0xf0]  ;;  %v4230_v31 = vld [vmem:[%s8435_s0 + $0x20] sm:$0xf]  ;;  %v4283_v33 = vor.u32 %v5194_v22, %v4280_v24  ;;  %v4287_v34 = vor.u32 %v5201_v26, %v4286_v25 }
  0x38   :  { %741 = vmatpush.bf16.msra.mxu3 %v528_v53  ;;  %v5188_v32 = vld [vmem:[%s8435_s0 + $0x4c] sm:$0xf0]  ;;  %v5182_v35 = vld [vmem:[%s8435_s0 + $0x24] sm:$0xf]  ;;  %v4291_v36 = vor.u32 %v5195_v29, %v4288_v30  ;;  %v4232_v37 = vld [vmem:[%s8435_s0 + $0x50] sm:$0xf0] }
  0x39   :  { %685 = vmatpush.bf16.msra.mxu0 %v4423_v54  ;;  %v4238_v38 = vld [vmem:[%s8435_s0 + $0x28] sm:$0xf]  ;;  %v5189_v39 = vld [vmem:[%s8435_s0 + $0x54] sm:$0xf0]  ;;  %v4231_v40 = vor.u32 %v5188_v32, %v4230_v31  ;;  %v5183_v41 = vld [vmem:[%s8435_s0 + $0x2c] sm:$0xf]  ;;  %v4235_v43 = vor.u32 %v5182_v35, %v4232_v37 }
  0x3a   :  { %704 = vmatpush.bf16.msra.mxu1 %v4427_v56  ;;  %723 = vmatpush.bf16.msra.mxu2 %v4431_v60  ;;  %v4240_v42 = vld [vmem:[%s8435_s0 + $0x58] sm:$0xf0]  ;;  %v4239_v44 = vor.u32 %v5189_v39, %v4238_v38  ;;  %v4614_v46 = vld [vmem:[%s8438_s3 + $0x70] sm:$0xf]  ;;  %v5281_v49 = vld [vmem:[%s8438_s3 + $0xf4] sm:$0xf0] }
  0x3b   :  { %v4243_v45 = vor.u32 %v5183_v41, %v4240_v42  ;;  %v4678_v47 = vld [vmem:[%s8438_s3 + $0xf0] sm:$0xf]  ;;  %v5263_v51 = vld [vmem:[%s8438_s3 + $0x64] sm:$0xf0]  ;;  %v4670_v52 = vld [vmem:[%s8438_s3 + $0xe0] sm:$0xf] }
  0x3c   :  { %742 = vmatpush.bf16.msra.mxu3 %v4435_v1  ;;  %4492 = vmatmul.msk.bf16.vlgmr.msrb.gmra.mxu0 %vm486_vm1, %v5791_v27  ;;  %v6140_v50 = vor.u32 %v5281_v49, %v4678_v47  ;;  %v5279_v54 = vld [vmem:[%s8438_s3 + $0xe4] sm:$0xf0]  ;;  %v4742_v56 = vld [vmem:[%s8438_s3 + $0x170] sm:$0xf]  ;;  %v5297_v57 = vld [vmem:[%s8438_s3 + $0x174] sm:$0xf0] }
  0x3d   :  { %686 = vmatpush.bf16.msra.mxu0 %v4375_v2  ;;  %4494 = vmatmul.msk.bf16.vlgmr.msrb.gmra.mxu1 %vm486_vm1, %v5791_v27  ;;  %v6158_v55 = vor.u32 %v5279_v54, %v4670_v52  ;;  %v4806_v58 = vld [vmem:[%s8438_s3 + $0x1f0] sm:$0xf]  ;;  %v6170_v59 = vor.u32 %v5297_v57, %v4742_v56  ;;  %v5313_v60 = vld [vmem:[%s8438_s3 + $0x1f4] sm:$0xf0]  ;;  %v4734_v4 = vld [vmem:[%s8438_s3 + $0x160] sm:$0xf] }
  0x3e   :  { %705 = vmatpush.bf16.msra.mxu1 %v4379_v3  ;;  %724 = vmatpush.bf16.msra.mxu2 %v4383_v6  ;;  %v6176_v61 = vor.u32 %v5313_v60, %v4806_v58  ;;  %v4598_v62 = vld [vmem:[%s8438_s3 + $0x50] sm:$0xf]  ;;  %v5261_v63 = vld [vmem:[%s8438_s3 + $0x54] sm:$0xf0]  ;;  %v5295_v5 = vld [vmem:[%s8438_s3 + $0x164] sm:$0xf0] }
  0x3f   :  { %4496 = vmatmul.msk.bf16.vlgmr.msrb.gmra.mxu2 %vm486_vm1, %v5791_v27  ;;  %4498 = vmatmul.msk.bf16.vlgmr.msrb.gmra.mxu3 %vm486_vm1, %v5791_v27  ;;  %8558 = vst [vmem:[#allocation5_spill] sm:$0xff] %v6170_v59  ;;  %v4662_v0 = vld [vmem:[%s8438_s3 + $0xd0] sm:$0xf]  ;;  %v6188_v1 = vor.u32 %v5261_v63, %v4598_v62  ;;  %v5277_v2 = vld [vmem:[%s8438_s3 + $0xd4] sm:$0xf0]  ;;  %v6206_v7 = vor.u32 %v5295_v5, %v4734_v4  ;;  %s5564_s30 = smov 124  }
  0x40   :  { %743 = vmatpush.bf16.msra.mxu3 %v4387_v11  ;;  %8559 = vst [vmem:[#allocation6_spill] sm:$0xff] %v6176_v61  ;;  %v6194_v3 = vor.u32 %v5277_v2, %v4662_v0  ;;  %v4798_v6 = vld [vmem:[%s8438_s3 + $0x1e0] sm:$0xf]  ;;  %v5311_v8 = vld [vmem:[%s8438_s3 + $0x1e4] sm:$0xf0]  ;;  %s5565_s8 = smov 123  }
  0x41   :  { %687 = vmatpush.bf16.msra.mxu0 %v4327_v15  ;;  %8560 = vst [vmem:[#allocation7_spill] sm:$0xff] %v6206_v7  ;;  %v6212_v9 = vor.u32 %v5311_v8, %v4798_v6  ;;  %v4590_v11 = vld [vmem:[%s8438_s3 + $0x40] sm:$0xf]  ;;  %v5259_v12 = vld [vmem:[%s8438_s3 + $0x44] sm:$0xf0]  ;;  %s5566_s1 = smov 122  }
  0x42   :  { %706 = vmatpush.bf16.msra.mxu1 %v4331_v20  ;;  %725 = vmatpush.bf16.msra.mxu2 %v4335_v21  ;;  %v4654_v13 = vld [vmem:[%s8438_s3 + $0xc0] sm:$0xf]  ;;  %v6224_v14 = vor.u32 %v5259_v12, %v4590_v11  ;;  %v5275_v15 = vld [vmem:[%s8438_s3 + $0xc4] sm:$0xf0]  ;;  %v4726_v17 = vld [vmem:[%s8438_s3 + $0x150] sm:$0xf] }
  0x43   :  { %8561 = vst [vmem:[#allocation8_spill] sm:$0xff] %v6212_v9  ;;  %v6230_v16 = vor.u32 %v5275_v15, %v4654_v13  ;;  %v5293_v18 = vld [vmem:[%s8438_s3 + $0x154] sm:$0xf0]  ;;  %v4790_v19 = vld [vmem:[%s8438_s3 + $0x1d0] sm:$0xf]  ;;  %s5567_s9 = smov 121  }
  0x44   :  { %744 = vmatpush.bf16.msra.mxu3 %v4339_v23  ;;  %v6242_v20 = vor.u32 %v5293_v18, %v4726_v17  ;;  %v5309_v21 = vld [vmem:[%s8438_s3 + $0x1d4] sm:$0xf0]  ;;  %v4582_v23 = vld [vmem:[%s8438_s3 + $0x30] sm:$0xf]  ;;  %v4718_v30 = vld [vmem:[%s8438_s3 + $0x140] sm:$0xf] }
  0x45   :  { %688 = vmatpush.bf16.msra.mxu0 %v4279_v28  ;;  %v6248_v22 = vor.u32 %v5309_v21, %v4790_v19  ;;  %v5257_v24 = vld [vmem:[%s8438_s3 + $0x34] sm:$0xf0]  ;;  %v4646_v25 = vld [vmem:[%s8438_s3 + $0xb0] sm:$0xf]  ;;  %v5291_v31 = vld [vmem:[%s8438_s3 + $0x144] sm:$0xf0] }
  0x46   :  { %707 = vmatpush.bf16.msra.mxu1 %v4283_v33  ;;  %726 = vmatpush.bf16.msra.mxu2 %v4287_v34  ;;  %8562 = vst [vmem:[#allocation9_spill] sm:$0xff] %v6242_v20  ;;  %v6260_v26 = vor.u32 %v5257_v24, %v4582_v23  ;;  %v5273_v28 = vld [vmem:[%s8438_s3 + $0xb4] sm:$0xf0]  ;;  %v4782_v32 = vld [vmem:[%s8438_s3 + $0x1c0] sm:$0xf]  ;;  %v6278_v33 = vor.u32 %v5291_v31, %v4718_v30  ;;  %s5568_s10 = smov 120  }
  0x47   :  { %8563 = vst [vmem:[#allocation10_spill] sm:$0xff] %v6248_v22  ;;  %v6266_v29 = vor.u32 %v5273_v28, %v4646_v25  ;;  %v5307_v34 = vld [vmem:[%s8438_s3 + $0x1c4] sm:$0xf0]  ;;  %v4638_v38 = vld [vmem:[%s8438_s3 + $0xa0] sm:$0xf]  ;;  %s5569_s11 = smov 119  }
  0x48   :  { %745 = vmatpush.bf16.msra.mxu3 %v4291_v36  ;;  %8564 = vst [vmem:[#allocation11_spill] sm:$0xff] %v6278_v33  ;;  %v6284_v35 = vor.u32 %v5307_v34, %v4782_v32  ;;  %v4574_v36 = vld [vmem:[%s8438_s3 + $0x20] sm:$0xf]  ;;  %v5255_v37 = vld [vmem:[%s8438_s3 + $0x24] sm:$0xf0]  ;;  %s5570_s14 = smov 118  }
  0x49   :  { %689 = vmatpush.bf16.msra.mxu0 %v4231_v40  ;;  %v6297_v39 = vor.u32 %v5255_v37, %v4574_v36  ;;  %v5271_v40 = vld [vmem:[%s8438_s3 + $0xa4] sm:$0xf0]  ;;  %v4710_v42 = vld [vmem:[%s8438_s3 + $0x130] sm:$0xf]  ;;  %v5269_v54 = vld [vmem:[%s8438_s3 + $0x94] sm:$0xf0] }
  0x4a   :  { %708 = vmatpush.bf16.msra.mxu1 %v4235_v43  ;;  %727 = vmatpush.bf16.msra.mxu2 %v4239_v44  ;;  %8565 = vst [vmem:[#allocation12_spill] sm:$0xff] %v6284_v35  ;;  %v6302_v41 = vor.u32 %v5271_v40, %v4638_v38  ;;  %v5289_v43 = vld [vmem:[%s8438_s3 + $0x134] sm:$0xf0]  ;;  %v4774_v44 = vld [vmem:[%s8438_s3 + $0x1b0] sm:$0xf]  ;;  %s4179_s16 = sshll.u32 %s8442_s7, 4  ;;  %s4180_s16 = int_to_ptr.hbm [resolvable:$true] %s4179_s16 }
  0x4b   :  { %v4566_v49 = vld [vmem:[%s8438_s3 + $0x10] sm:$0xf]  ;;  %v4702_v58 = vld [vmem:[%s8438_s3 + $0x120] sm:$0xf]  ;;  %v5287_v60 = vld [vmem:[%s8438_s3 + $0x124] sm:$0xf0] }
  0x4c   :  { %746 = vmatpush.bf16.msra.mxu3 %v4243_v45  ;;  %4493 = vmatmul.msk.bf16.gmra.mxu0 %vm486_vm1, %v5903_v10  ;;  %v4766_v62 = vld [vmem:[%s8438_s3 + $0x1a0] sm:$0xf]  ;;  %v6355_v2 = vor.u32 %v5287_v60, %v4702_v58  ;;  %v5303_v4 = vld [vmem:[%s8438_s3 + $0x1a4] sm:$0xf0]  ;;  %v4694_v18 = vld [vmem:[%s8438_s3 + $0x110] sm:$0xf] }
  0x4d   :  { %4495 = vmatmul.msk.bf16.gmra.mxu1 %vm486_vm1, %v5903_v10  ;;  %v6364_v6 = vor.u32 %v5303_v4, %v4766_v62  ;;  %v4558_v8 = vld [vmem:[%s8438_s3] sm:$0xf]  ;;  %v5251_v11 = vld [vmem:[%s8438_s3 + $0x4] sm:$0xf0]  ;;  %v5285_v19 = vld [vmem:[%s8438_s3 + $0x114] sm:$0xf0] }
  0x4e   :  { %1773 = vmatpush.bf16.msrb.mxu1 %v6140_v50  ;;  %1792 = vmatpush.bf16.msrb.mxu2 %v6170_v59  ;;  %8569 = vst [vmem:[#allocation16_spill] sm:$0xff] %v6355_v2  ;;  %v4622_v12 = vld [vmem:[%s8438_s3 + $0x80] sm:$0xf]  ;;  %v6376_v13 = vor.u32 %v5251_v11, %v4558_v8  ;;  %v5267_v15 = vld [vmem:[%s8438_s3 + $0x84] sm:$0xf0]  ;;  %v6392_v23 = vor.u32 %v5285_v19, %v4694_v18 }
  0x4f   :  { %4497 = vmatmul.msk.bf16.gmra.mxu2 %vm486_vm1, %v5903_v10  ;;  %4499 = vmatmul.msk.bf16.gmra.mxu3 %vm486_vm1, %v5903_v10  ;;  %8570 = vst [vmem:[#allocation17_spill] sm:$0xff] %v6364_v6  ;;  %v6382_v17 = vor.u32 %v5267_v15, %v4622_v12  ;;  %v4758_v24 = vld [vmem:[%s8438_s3 + $0x190] sm:$0xf]  ;;  %v5301_v25 = vld [vmem:[%s8438_s3 + $0x194] sm:$0xf0] }
  0x50   :  { %1811 = vmatpush.bf16.msrb.mxu3 %v6176_v61  ;;  %8571 = vst [vmem:[#allocation18_spill] sm:$0xff] %v6376_v13  ;;  %v6402_v30 = vor.u32 %v5301_v25, %v4758_v24  ;;  %v5329_v58 = vld [vmem:[%s8438_s3 + $0x274] sm:$0xf0] }
  0x51   :  { %8572 = vst [vmem:[#allocation19_spill] sm:$0xff] %v6382_v17  ;;  %v5345_v12 = vld [vmem:[%s8438_s3 + $0x2f4] sm:$0xf0] }
  0x52   :  { %1774 = vmatpush.bf16.msrb.mxu1 %v6158_v55  ;;  %1793 = vmatpush.bf16.msrb.mxu2 %v6206_v7  ;;  %8573 = vst [vmem:[#allocation20_spill] sm:$0xff] %v6392_v23  ;;  %v4680_v7 = vld [vmem:[%s8438_s3 + $0xf8] sm:$0xf0] }
  0x53   :  { %8574 = vst [vmem:[#allocation21_spill] sm:$0xff] %v6402_v30 }
  0x54   :  { %1812 = vmatpush.bf16.msrb.mxu3 %v6212_v9 }
  0x56   :  { %1775 = vmatpush.bf16.msrb.mxu1 %v6194_v3  ;;  %1794 = vmatpush.bf16.msrb.mxu2 %v6242_v20 }
  0x58   :  { %1813 = vmatpush.bf16.msrb.mxu3 %v6248_v22 }
  0x5a   :  { %1776 = vmatpush.bf16.msrb.mxu1 %v6230_v16  ;;  %1795 = vmatpush.bf16.msrb.mxu2 %v6278_v33 }
  0x5c   :  { %4500 = vmatmul.msk.bf16.vlgmr.msra.gmra.mxu0 %vm486_vm1, %v5791_v27  ;;  %1814 = vmatpush.bf16.msrb.mxu3 %v6284_v35 }
  0x5d   :  { %4502 = vmatmul.msk.bf16.vlgmr.msra.gmra.mxu1 %vm486_vm1, %v5791_v27 }
  0x5e   :  { %1777 = vmatpush.bf16.msrb.mxu1 %v6266_v29 }
  0x5f   :  { %4504 = vmatmul.msk.bf16.vlgmr.msra.gmra.mxu2 %vm486_vm1, %v5791_v27  ;;  %4506 = vmatmul.msk.bf16.vlgmr.msra.gmra.mxu3 %vm486_vm1, %v5791_v27  ;;  %v5265_v27 = vld [vmem:[%s8438_s3 + $0x74] sm:$0xf0] }
  0x60   :  { %v6135_v48 = vor.u32 %v5265_v27, %v4614_v46  ;;  %v6317_v46 = vor.u32 %v5289_v43, %v4710_v42  ;;  %v5305_v27 = vld [vmem:[%s8438_s3 + $0x1b4] sm:$0xf0] }
  0x61   :  { %v6322_v47 = vor.u32 %v5305_v27, %v4774_v44 }
  0x62   :  { %1754 = vmatpush.bf16.msrb.mxu0 %v6135_v48  ;;  %1778 = vmatpush.bf16.msrb.mxu1 %v6302_v41  ;;  %8566 = vst [vmem:[#allocation13_spill] sm:$0xff] %v6317_v46 }
  0x63   :  { %8567 = vst [vmem:[#allocation14_spill] sm:$0xff] %v6322_v47  ;;  %1796 = vmatpush.bf16.msrb.mxu2 %v6317_v46  ;;  %1815 = vmatpush.bf16.msrb.mxu3 %v6322_v47 }
  0x67   :  { %1797 = vmatpush.bf16.msrb.mxu2 %v6355_v2  ;;  %1816 = vmatpush.bf16.msrb.mxu3 %v6364_v6 }
  0x6b   :  { %1798 = vmatpush.bf16.msrb.mxu2 %v6392_v23  ;;  %1817 = vmatpush.bf16.msrb.mxu3 %v6402_v30 }
  0x6c   :  { %4501 = vmatmul.msk.bf16.gmra.mxu0 %vm486_vm1, %v5903_v10 }
  0x6d   :  { %4503 = vmatmul.msk.bf16.gmra.mxu1 %vm486_vm1, %v5903_v10 }
  0x6f   :  { %4505 = vmatmul.msk.bf16.gmra.mxu2 %vm486_vm1, %v5903_v10  ;;  %4507 = vmatmul.msk.bf16.gmra.mxu3 %vm486_vm1, %v5903_v10  ;;  %v4606_v10 = vld [vmem:[%s8438_s3 + $0x60] sm:$0xf] }
  0x70   :  { %v6153_v53 = vor.u32 %v5263_v51, %v4606_v10  ;;  %v5253_v10 = vld [vmem:[%s8438_s3 + $0x14] sm:$0xf0]  ;;  %v4630_v51 = vld [vmem:[%s8438_s3 + $0x90] sm:$0xf] }
  0x71   :  { %v6334_v52 = vor.u32 %v5253_v10, %v4566_v49  ;;  %v6340_v57 = vor.u32 %v5269_v54, %v4630_v51  ;;  %v4870_v51 = vld [vmem:[%s8438_s3 + $0x270] sm:$0xf] }
  0x72   :  { %1755 = vmatpush.bf16.msrb.mxu0 %v6153_v53  ;;  %v6430_v62 = vor.u32 %v5329_v58, %v4870_v51 }
  0x73   :  { %8568 = vst [vmem:[#allocation15_spill] sm:$0xff] %v6334_v52  ;;  %1779 = vmatpush.bf16.msrb.mxu1 %v6340_v57 }
  0x74   :  { %8575 = vst [vmem:[#allocation22_spill] sm:$0xff] %v6430_v62 }
  0x76   :  { %1756 = vmatpush.bf16.msrb.mxu0 %v6188_v1 }
  0x77   :  { %1780 = vmatpush.bf16.msrb.mxu1 %v6382_v17 }
  0x79   :  { %v6315_v45 = vpop.permute.xlu0 %110 }
  0x7a   :  { %1757 = vmatpush.bf16.msrb.mxu0 %v6224_v14 }
  0x7e   :  { %1758 = vmatpush.bf16.msrb.mxu0 %v6260_v26 }
  0x82   :  { %1759 = vmatpush.bf16.msrb.mxu0 %v6297_v39 }
  0x86   :  { %1760 = vmatpush.bf16.msrb.mxu0 %v6334_v52 }
  0x89   :  { %v6404_v31 = vpop.permute.xlu0 %115 }
  0x8a   :  { %1761 = vmatpush.bf16.msrb.mxu0 %v6376_v13 }
  0x8e   :  { %1830 = vmatpush.bf16.msra.mxu0 %v6430_v62 }
  0x99   :  { %v539_v56 = vpop.f32.mrf.mxu0 }
  0x9a   :  { %v6352_v63 = vadd.f32 %v539_v56, %v6315_v45  ;;  %v558_v0 = vpop.f32.mrf.mxu1 }
  0x9b   :  { %v6361_v5 = vadd.f32 %v558_v0, %v6315_v45  ;;  %v4934_v0 = vld [vmem:[%s8438_s3 + $0x2f0] sm:$0xf] }
  0x9c   :  { %v806_v21 = vmin.f32 %v6352_v63, 0.0  ;;  %v6439_v19 = vor.u32 %v5345_v12, %v4934_v0  ;;  %vm758_vm4 = vcmp.gt.f32.partialorder %v6352_v63, 0.0 }
  0x9d   :  { %v807_v28 = vmin.f32 %v6361_v5, 0.0  ;;  %vm759_vm5 = vcmp.gt.f32.partialorder %v6361_v5, 0.0 }
  0x9e   :  { %v854_v36 = vmul.f32 1.442695, %v806_v21  ;;  %8576 = vst [vmem:[#allocation23_spill] sm:$0xff] %v6439_v19  ;;  %1849 = vmatpush.bf16.msra.mxu1 %v6439_v19 }
  0x9f   :  { %v856_v43 = vmul.f32 1.442695, %v807_v28 }
  0xa0   :  { %5384 = vpow2.f32 %v854_v36 }
  0xa1   :  { %v541_v40 = vpop.f32.mrf.mxu0  ;;  %5386 = vpow2.f32 %v856_v43 }
  0xa2   :  { %v577_v32 = vpop.f32.mrf.mxu2  ;;  %v596_v34 = vpop.f32.mrf.mxu3  ;;  %v6415_v44 = vadd.f32 %v541_v40, %v6404_v31 }
  0xa3   :  { %v6409_v37 = vadd.f32 %v577_v32, %v6315_v45  ;;  %v6412_v38 = vadd.f32 %v596_v34, %v6315_v45  ;;  %v560_v42 = vpop.f32.mrf.mxu1  ;;  %v4686_v32 = vld [vmem:[%s8438_s3 + $0x100] sm:$0xf]  ;;  %v5283_v34 = vld [vmem:[%s8438_s3 + $0x104] sm:$0xf0] }
  0xa4   :  { %v6418_v27 = vadd.f32 %v560_v42, %v6404_v31  ;;  %v818_v54 = vmin.f32 %v6415_v44, 0.0  ;;  %v6458_v51 = vor.u32 %v5283_v34, %v4686_v32  ;;  %vm770_vm2 = vcmp.gt.f32.partialorder %v6415_v44, 0.0 }
  0xa5   :  { %v808_v49 = vmin.f32 %v6409_v37, 0.0  ;;  %v809_v10 = vmin.f32 %v6412_v38, 0.0  ;;  %vm760_vm6 = vcmp.gt.f32.partialorder %v6409_v37, 0.0  ;;  %vm761_vm7 = vcmp.gt.f32.partialorder %v6412_v38, 0.0 }
  0xa6   :  { %v819_v56 = vmin.f32 %v6418_v27, 0.0  ;;  %v878_v4 = vmul.f32 1.442695, %v818_v54  ;;  %v5385_v36 = vpop.eup %5384  ;;  %8577 = vst [vmem:[#allocation24_spill] sm:$0xff] %v6458_v51  ;;  %v4750_v54 = vld [vmem:[%s8438_s3 + $0x180] sm:$0xf]  ;;  %1799 = vmatpush.bf16.msrb.mxu2 %v6458_v51 }
  0xa7   :  { %v858_v60 = vmul.f32 1.442695, %v808_v49  ;;  %v860_v11 = vmul.f32 1.442695, %v809_v10  ;;  %v5387_v42 = vpop.eup %5386  ;;  %v6456_v49 = vpop.permute.xlu1 %120  ;;  %vm771_vm3 = vcmp.gt.f32.partialorder %v6418_v27, 0.0 }
  0xa8   :  { %v880_v8 = vmul.f32 1.442695, %v819_v56  ;;  %v5299_v56 = vld [vmem:[%s8438_s3 + $0x184] sm:$0xf0] }
  0xa9   :  { %5388 = vpow2.f32 %v858_v60  ;;  %v544_v25 = vpop.f32.mrf.mxu0  ;;  %v6467_v32 = vor.u32 %v5299_v56, %v4750_v54 }
  0xaa   :  { %v579_v15 = vpop.f32.mrf.mxu2  ;;  %v598_v18 = vpop.f32.mrf.mxu3  ;;  %5390 = vpow2.f32 %v878_v4  ;;  %v4508_v4 = vadd.f32 -1.0, %v5385_v36 }
  0xab   :  { %v6442_v21 = vadd.f32 %v579_v15, %v6404_v31  ;;  %v6445_v24 = vadd.f32 %v598_v18, %v6404_v31  ;;  %v563_v28 = vpop.f32.mrf.mxu1  ;;  %5392 = vpow2.f32 %v880_v8  ;;  %v4509_v8 = vadd.f32 -1.0, %v5387_v42  ;;  %8578 = vst [vmem:[#allocation25_spill] sm:$0xff] %v6467_v32  ;;  %1818 = vmatpush.bf16.msrb.mxu3 %v6467_v32 }
  0xac   :  { %5394 = vpow2.f32 %v860_v11 }
  0xad   :  { %v820_v40 = vmin.f32 %v6442_v21, 0.0  ;;  %v821_v43 = vmin.f32 %v6445_v24, 0.0  ;;  %v999_v2 = vmul.f32 0.001, %v4509_v8  ;;  %vm772_vm8 = vcmp.gt.f32.partialorder %v6442_v21, 0.0 }
  0xae   :  { %vm773_vm9 = vcmp.gt.f32.partialorder %v6445_v24, 0.0 }
  0xaf   :  { %v882_v10 = vmul.f32 1.442695, %v820_v40  ;;  %v5389_v58 = vpop.eup %5388  ;;  %v884_v60 = vmul.f32 1.442695, %v821_v43  ;;  %v998_v43 = vmul.f32 0.001, %v4508_v4 }
  0xb0   :  { %v5391_v0 = vpop.eup %5390 }
  0xb1   :  { %5396 = vpow2.f32 %v882_v10  ;;  %v5393_v11 = vpop.eup %5392  ;;  %v4520_v12 = vadd.f32 -1.0, %v5391_v0  ;;  %v546_v30 = vpop.f32.mrf.mxu0  ;;  %v4510_v10 = vadd.f32 -1.0, %v5389_v58  ;;  %v6475_v0 = vadd.f32 %v544_v25, %v6456_v49 }
  0xb2   :  { %5398 = vpow2.f32 %v884_v60  ;;  %v582_v15 = vpop.f32.mrf.mxu2  ;;  %v601_v18 = vpop.f32.mrf.mxu3  ;;  %v4521_v40 = vadd.f32 -1.0, %v5393_v11  ;;  %v6480_v58 = vadd.f32 %v563_v28, %v6456_v49  ;;  %v1046_v8 = vsel %vm758_vm4, %v6352_v63, %v998_v43 }
  0xb3   :  { %v5395_v34 = vpop.eup %5394  ;;  %v1010_v23 = vmul.f32 0.001, %v4520_v12  ;;  %v565_v42 = vpop.f32.mrf.mxu1  ;;  %v1047_v12 = vsel %vm759_vm5, %v6361_v5, %v999_v2  ;;  %v830_v46 = vmin.f32 %v6475_v0, 0.0  ;;  %v6498_v5 = vadd.f32 %v582_v15, %v6456_v49 }
  0xb4   :  { %v1011_v36 = vmul.f32 0.001, %v4521_v40  ;;  %v4511_v6 = vadd.f32 -1.0, %v5395_v34  ;;  %v1094_v28 = vpack.c.bf16 %v1047_v12, %v1046_v8  ;;  %v831_v63 = vmin.f32 %v6480_v58, 0.0 }
  0xb5   :  { %v1058_v54 = vsel %vm770_vm2, %v6415_v44, %v1010_v23  ;;  %v6484_v23 = vpop.permute.xlu1 %125  ;;  %v1000_v44 = vmul.f32 0.001, %v4510_v10  ;;  %v6507_v15 = vadd.f32 %v601_v18, %v6456_v49  ;;  %vm782_vm10 = vcmp.gt.f32.partialorder %v6475_v0, 0.0 }
  0xb6   :  { %v1059_v56 = vsel %vm771_vm3, %v6418_v27, %v1011_v36  ;;  %8579 = vst [vmem:[#allocation26_spill] sm:$0xff] %v6484_v23  ;;  %v1001_v27 = vmul.f32 0.001, %v4511_v6  ;;  %v6492_v2 = vadd.f32 %v565_v42, %v6484_v23  ;;  %v1226_v8 = vunpack.c.l.b16 %v1094_v28 }
  0xb7   :  { %v5397_v60 = vpop.eup %5396  ;;  %v1100_v25 = vpack.c.bf16 %v1059_v56, %v1058_v54  ;;  %v1048_v6 = vsel %vm760_vm6, %v6409_v37, %v1000_v44  ;;  %v902_v56 = vmul.f32 1.442695, %v830_v46  ;;  %v904_v12 = vmul.f32 1.442695, %v831_v63 }
  0xb8   :  { %v5399_v11 = vpop.eup %5398  ;;  %v4522_v4 = vadd.f32 -1.0, %v5397_v60  ;;  %v6488_v60 = vadd.f32 %v546_v30, %v6484_v23  ;;  %v1049_v30 = vsel %vm761_vm7, %v6412_v38, %v1001_v27  ;;  %v843_v37 = vmin.f32 %v6492_v2, 0.0 }
  0xb9   :  { %v4523_v34 = vadd.f32 -1.0, %v5399_v11  ;;  %v1232_v43 = vunpack.c.l.b16 %v1100_v25  ;;  %v615_v10 = vpop.f32.mrf.mxu0  ;;  %v1095_v38 = vpack.c.bf16 %v1049_v30, %v1048_v6  ;;  %v832_v44 = vmin.f32 %v6498_v5, 0.0 }
  0xba   :  { %v584_v40 = vpop.f32.mrf.mxu2  ;;  %v603_v36 = vpop.f32.mrf.mxu3  ;;  %v1012_v51 = vmul.f32 0.001, %v4522_v4  ;;  %v842_v11 = vmin.f32 %v6488_v60, 0.0  ;;  %5400 = vpow2.f32 %v902_v56  ;;  %v833_v18 = vmin.f32 %v6507_v15, 0.0 }
  0xbb   :  { %v1013_v32 = vmul.f32 0.001, %v4523_v34  ;;  %v634_v4 = vpop.f32.mrf.mxu1  ;;  %v1233_v34 = vunpack.c.h.b16 %v1100_v25  ;;  %5402 = vpow2.f32 %v904_v12  ;;  %v928_v47 = vmul.f32 1.442695, %v843_v37  ;;  %v5343_v12 = vld [vmem:[%s8438_s3 + $0x2e4] sm:$0xf0] }
  0xbc   :  { %v1060_v42 = vsel %vm772_vm8, %v6442_v21, %v1012_v51  ;;  %v6512_v21 = vadd.f32 %v584_v40, %v6484_v23  ;;  %v1227_v51 = vunpack.c.h.b16 %v1094_v28  ;;  %v6518_v6 = vadd.f32 %v603_v36, %v6484_v23  ;;  %v4862_v28 = vld [vmem:[%s8438_s3 + $0x260] sm:$0xf] }
  0xbd   :  { %v1061_v54 = vsel %vm773_vm9, %v6445_v24, %v1013_v32  ;;  %v6514_v24 = vpack.c.b16 %v1232_v43, %v1226_v8  ;;  %v926_v32 = vmul.f32 1.442695, %v842_v11  ;;  %v1228_v25 = vunpack.c.l.b16 %v1095_v38  ;;  %v4926_v8 = vld [vmem:[%s8438_s3 + $0x2e0] sm:$0xf] }
  0xbe   :  { %v1101_v27 = vpack.c.bf16 %v1061_v54, %v1060_v42  ;;  %v906_v30 = vmul.f32 1.442695, %v832_v44  ;;  %v6521_v40 = vpack.c.b16 %v1233_v34, %v1227_v51  ;;  %v5327_v42 = vld [vmem:[%s8438_s3 + $0x264] sm:$0xf0]  ;;  %v1229_v54 = vunpack.c.h.b16 %v1095_v38 }
  0xbf   :  { %1762 = vmatmul.bf16.vlgmr.msrb.gmra.mxu0 %v6514_v24  ;;  %v844_v56 = vmin.f32 %v6512_v21, 0.0  ;;  %5404 = vpow2.f32 %v926_v32  ;;  %v6543_v34 = vadd.f32 %v615_v10, %v6315_v45  ;;  %v845_v44 = vmin.f32 %v6518_v6, 0.0  ;;  %v4616_v10 = vld [vmem:[%s8438_s3 + $0x78] sm:$0xf0] }
  0xc0   :  { %v1234_v36 = vunpack.c.l.b16 %v1101_v27  ;;  %v1235_v37 = vunpack.c.h.b16 %v1101_v27  ;;  %1781 = vmatmul.bf16.vlgmr.msrb.gmra.mxu1 %v6521_v40  ;;  %5406 = vpow2.f32 %v928_v47  ;;  %v5264_v27 = vld [vmem:[%s8438_s3 + $0x74] sm:$0xf]  ;;  %v5401_v32 = vpop.eup %5400  ;;  %v908_v33 = vmul.f32 1.442695, %v833_v18  ;;  %v4854_v18 = vld [vmem:[%s8438_s3 + $0x250] sm:$0xf] }
  0xc1   :  { %v5280_v47 = vld [vmem:[%s8438_s3 + $0xf4] sm:$0xf]  ;;  %v6563_v20 = vor.u32 %v5343_v12, %v4926_v8  ;;  %v5403_v9 = vpop.eup %5402  ;;  %5408 = vpow2.f32 %v906_v30  ;;  %v930_v59 = vmul.f32 1.442695, %v844_v56  ;;  %v4918_v30 = vld [vmem:[%s8438_s3 + $0x2d0] sm:$0xf] }
  0xc2   :  { %v653_v46 = vpop.f32.mrf.mxu2  ;;  %v672_v63 = vpop.f32.mrf.mxu3  ;;  %v6568_v62 = vpack.c.b16 %v1234_v36, %v1228_v25  ;;  %v5325_v25 = vld [vmem:[%s8438_s3 + $0x254] sm:$0xf0]  ;;  %v932_v36 = vmul.f32 1.442695, %v845_v44  ;;  %v6598_v44 = vor.u32 %v5280_v47, %v4680_v7  ;;  %v4672_v7 = vld [vmem:[%s8438_s3 + $0xe8] sm:$0xf0] }
  0xc3   :  { %v6524_v43 = vadd.f32 %v653_v46, %v6315_v45  ;;  %v6534_v11 = vadd.f32 %v672_v63, %v6315_v45  ;;  %v6549_v46 = vadd.f32 %v634_v4, %v6315_v45  ;;  %v617_v63 = vpop.f32.mrf.mxu0  ;;  %v6561_v4 = vor.u32 %v5327_v42, %v4862_v28  ;;  %8581 = vst [vmem:[#allocation28_spill] sm:$0xff] %v6563_v20  ;;  %v636_v22 = vpop.f32.mrf.mxu1  ;;  %v5341_v56 = vld [vmem:[%s8438_s3 + $0x2d4] sm:$0xf0] }
  0xc4   :  { %v810_v28 = vmin.f32 %v6543_v34, 0.0  ;;  %1850 = vmatpush.bf16.msra.mxu1 %v6563_v20  ;;  %v6576_v42 = vpack.c.b16 %v1235_v37, %v1229_v54  ;;  %v6579_v8 = vadd.f32 %v617_v63, %v6404_v31  ;;  %1800 = vmatmul.bf16.vlgmr.msrb.gmra.mxu2 %v6568_v62  ;;  %v6590_v54 = vadd.f32 %v636_v22, %v6404_v31  ;;  %v4608_v22 = vld [vmem:[%s8438_s3 + $0x68] sm:$0xf0] }
  0xc5   :  { %v812_v38 = vmin.f32 %v6524_v43, 0.0  ;;  %v813_v51 = vmin.f32 %v6534_v11, 0.0  ;;  %8580 = vst [vmem:[#allocation27_spill] sm:$0xff] %v6561_v4  ;;  %1831 = vmatpush.bf16.msra.mxu0 %v6561_v4  ;;  %v5405_v12 = vpop.eup %5404  ;;  %v4532_v37 = vadd.f32 -1.0, %v5401_v32  ;;  %v4533_v63 = vadd.f32 -1.0, %v5403_v9  ;;  %1887 = vmatpush.bf16.msra.mxu3 %v6598_v44 }
  0xc6   :  { %1819 = vmatmul.bf16.vlgmr.msrb.gmra.mxu3 %v6576_v42  ;;  %8583 = vst [vmem:[#allocation30_spill] sm:$0xff] %v6598_v44  ;;  %vm783_vm11 = vcmp.gt.f32.partialorder %v6480_v58, 0.0  ;;  %v823_v47 = vmin.f32 %v6590_v54, 0.0  ;;  %v6618_v9 = vor.u32 %v5325_v25, %v4854_v18  ;;  %v4846_v32 = vld [vmem:[%s8438_s3 + $0x240] sm:$0xf]  ;;  %v6623_v19 = vor.u32 %v5341_v56, %v4918_v30 }
  0xc7   :  { %v866_v35 = vmul.f32 1.442695, %v812_v38  ;;  %v868_v61 = vmul.f32 1.442695, %v813_v51  ;;  %v6596_v38 = vor.u32 %v5264_v27, %v4616_v10  ;;  %v5407_v51 = vpop.eup %5406  ;;  %v5278_v27 = vld [vmem:[%s8438_s3 + $0xe4] sm:$0xf] }
  0xc8   :  { %v862_v10 = vmul.f32 1.442695, %v810_v28  ;;  %8584 = vst [vmem:[#allocation31_spill] sm:$0xff] %v6618_v9  ;;  %v5409_v4 = vpop.eup %5408  ;;  %v4910_v18 = vld [vmem:[%s8438_s3 + $0x2c0] sm:$0xf]  ;;  %v4545_v44 = vadd.f32 -1.0, %v5407_v51  ;;  %1851 = vmatpush.bf16.msra.mxu1 %v6623_v19 }
  0xc9   :  { %5410 = vpow2.f32 %v866_v35  ;;  %v811_v35 = vmin.f32 %v6549_v46, 0.0  ;;  %8582 = vst [vmem:[#allocation29_spill] sm:$0xff] %v6596_v38  ;;  %1868 = vmatpush.bf16.msra.mxu2 %v6596_v38  ;;  %v1022_v25 = vmul.f32 0.001, %v4532_v37  ;;  %v4544_v38 = vadd.f32 -1.0, %v5405_v12  ;;  %1832 = vmatpush.bf16.msra.mxu0 %v6618_v9 }
  0xca   :  { %5412 = vpow2.f32 %v868_v61  ;;  %v5262_v61 = vld [vmem:[%s8438_s3 + $0x64] sm:$0xf]  ;;  %8585 = vst [vmem:[#allocation32_spill] sm:$0xff] %v6623_v19  ;;  %v5339_v30 = vld [vmem:[%s8438_s3 + $0x2c4] sm:$0xf0]  ;;  %vm794_vm12 = vcmp.gt.f32.partialorder %v6488_v60, 0.0 }
  0xcb   :  { %5414 = vpow2.f32 %v908_v33  ;;  %v822_v33 = vmin.f32 %v6579_v8, 0.0  ;;  %v864_v20 = vmul.f32 1.442695, %v811_v35  ;;  %v6625_v13 = vor.u32 %v5262_v61, %v4608_v22 }
  0xcc   :  { %5416 = vpow2.f32 %v930_v59  ;;  %v5323_v59 = vld [vmem:[%s8438_s3 + $0x244] sm:$0xf0]  ;;  %v1023_v56 = vmul.f32 0.001, %v4533_v63  ;;  %v888_v37 = vmul.f32 1.442695, %v823_v47 }
  0xcd   :  { %5418 = vpow2.f32 %v932_v36  ;;  %8586 = vst [vmem:[#allocation33_spill] sm:$0xff] %v6625_v13  ;;  %v6634_v36 = vor.u32 %v5278_v27, %v4672_v7  ;;  %v886_v22 = vmul.f32 1.442695, %v822_v33  ;;  %1869 = vmatpush.bf16.msra.mxu2 %v6625_v13  ;;  %v6643_v51 = vor.u32 %v5323_v59, %v4846_v32  ;;  %v5260_v63 = vld [vmem:[%s8438_s3 + $0x54] sm:$0xf]  ;;  %v6649_v7 = vpop.f32.mrf.mxu2  ;;  %v6654_v59 = vpop.f32.mrf.mxu3 }
  0xce   :  { %5420 = vpow2.f32 %v862_v10  ;;  %v4534_v27 = vadd.f32 -1.0, %v5409_v4  ;;  %vm764_vm13 = vcmp.gt.f32.partialorder %v6524_v43, 0.0  ;;  %v4600_v10 = vld [vmem:[%s8438_s3 + $0x58] sm:$0xf0]  ;;  %v6657_v13 = vor.u32 %v5339_v30, %v4910_v18 }
  0xcf   :  { %v5411_v28 = vpop.eup %5410  ;;  %8587 = vst [vmem:[#allocation34_spill] sm:$0xff] %v6634_v36  ;;  %1888 = vmatpush.bf16.msra.mxu3 %v6634_v36  ;;  %5422 = vpow2.f32 %v864_v20  ;;  %1833 = vmatpush.bf16.msra.mxu0 %v6643_v51  ;;  %vm784_vm14 = vcmp.gt.f32.partialorder %v6498_v5, 0.0  ;;  %vm765_vm15 = vcmp.gt.f32.partialorder %v6534_v11, 0.0  ;;  %vm795_vm0 = vcmp.gt.f32.partialorder %v6492_v2, 0.0 }
  0xd0   :  { %v5413_v35 = vpop.eup %5412  ;;  %v4514_v61 = vadd.f32 -1.0, %v5411_v28  ;;  %8588 = vst [vmem:[#allocation35_spill] sm:$0xff] %v6643_v51  ;;  %v1034_v28 = vmul.f32 0.001, %v4544_v38  ;;  %5424 = vpow2.f32 %v886_v22  ;;  %v1070_v38 = vsel %vm782_vm10, %v6475_v0, %v1022_v25  ;;  %1852 = vmatpush.bf16.msra.mxu1 %v6657_v13  ;;  %v5276_v0 = vld [vmem:[%s8438_s3 + $0xd4] sm:$0xf] }
  0xd1   :  { %v5415_v17 = vpop.eup %5414  ;;  %v4515_v12 = vadd.f32 -1.0, %v5413_v35  ;;  %v1035_v35 = vmul.f32 0.001, %v4545_v44  ;;  %8589 = vst [vmem:[#allocation36_spill] sm:$0xff] %v6657_v13  ;;  %5426 = vpow2.f32 %v888_v37  ;;  %v6673_v30 = vor.u32 %v5260_v63, %v4600_v10  ;;  %v5321_v37 = vld [vmem:[%s8438_s3 + $0x234] sm:$0xf0] }
  0xd2   :  { %v1004_v33 = vmul.f32 0.001, %v4514_v61  ;;  %v5417_v47 = vpop.eup %5416  ;;  %v4535_v4 = vadd.f32 -1.0, %v5415_v17  ;;  %v1071_v17 = vsel %vm783_vm11, %v6480_v58, %v1023_v56  ;;  %vm785_vm1 = vcmp.gt.f32.partialorder %v6507_v15, 0.0 }
  0xd3   :  { %v1005_v32 = vmul.f32 0.001, %v4515_v12  ;;  %v5419_v20 = vpop.eup %5418  ;;  %v4546_v18 = vadd.f32 -1.0, %v5417_v47  ;;  %8591 = vst [vmem:[#allocation38_spill] sm:$0xff] %v6673_v30  ;;  %v1082_v58 = vsel %vm794_vm12, %v6488_v60, %v1034_v28  ;;  %v1083_v56 = vsel %vm795_vm0, %v6492_v2, %v1035_v35  ;;  %v4838_v12 = vld [vmem:[%s8438_s3 + $0x230] sm:$0xf]  ;;  %v6694_v47 = vpop.f32.mrf.mxu0  ;;  %1870 = vmatpush.bf16.msra.mxu2 %v6673_v30 }
  0xd4   :  { %v1052_v61 = vsel %vm764_vm13, %v6524_v43, %v1004_v33  ;;  %v5421_v25 = vpop.eup %5420  ;;  %v4547_v22 = vadd.f32 -1.0, %v5419_v20  ;;  %v1024_v33 = vmul.f32 0.001, %v4534_v27  ;;  %v1025_v10 = vmul.f32 0.001, %v4535_v4  ;;  %v6696_v60 = vpop.f32.mrf.mxu1 }
  0xd5   :  { %v1053_v44 = vsel %vm765_vm15, %v6534_v11, %v1005_v32  ;;  %v4664_v11 = vld [vmem:[%s8438_s3 + $0xd8] sm:$0xf0]  ;;  %v5423_v63 = vpop.eup %5422  ;;  %vm796_vm2 = vcmp.gt.f32.partialorder %v6512_v21, 0.0  ;;  %vm797_vm3 = vcmp.gt.f32.partialorder %v6518_v6, 0.0  ;;  %v1106_v28 = vpack.c.bf16 %v1071_v17, %v1070_v38  ;;  %v4902_v35 = vld [vmem:[%s8438_s3 + $0x2b0] sm:$0xf]  ;;  %v658_v51 = vpop.f32.mrf.mxu2 }
  0xd6   :  { %v6671_v43 = vpack.c.bf16 %v1053_v44, %v1052_v61  ;;  %v6699_v2 = vor.u32 %v5276_v0, %v4664_v11  ;;  %v5337_v27 = vld [vmem:[%s8438_s3 + $0x2b4] sm:$0xf0]  ;;  %v5258_v32 = vld [vmem:[%s8438_s3 + $0x44] sm:$0xf]  ;;  %v5425_v20 = vpop.eup %5424  ;;  %v1036_v4 = vmul.f32 0.001, %v4546_v18  ;;  %v1112_v61 = vpack.c.bf16 %v1083_v56, %v1082_v58 }
  0xd7   :  { %v6710_v44 = vor.u32 %v5321_v37, %v4838_v12  ;;  %v4592_v38 = vld [vmem:[%s8438_s3 + $0x48] sm:$0xf0]  ;;  %v5274_v17 = vld [vmem:[%s8438_s3 + $0xc4] sm:$0xf]  ;;  %v5427_v0 = vpop.eup %5426  ;;  %v1037_v11 = vmul.f32 0.001, %v4547_v22  ;;  %v1239_v56 = vunpack.c.h.b16 %v1106_v28  ;;  %v6723_v37 = vor.u32 %v5337_v27, %v4902_v35  ;;  %v677_v27 = vpop.f32.mrf.mxu3 }
  0xd8   :  { %8590 = vst [vmem:[#allocation37_spill] sm:$0xff] %v6671_v43  ;;  %v4512_v30 = vadd.f32 -1.0, %v5421_v25  ;;  %v4513_v36 = vadd.f32 -1.0, %v5423_v63  ;;  %1889 = vmatpush.bf16.msra.mxu3 %v6699_v2  ;;  %v1238_v43 = vunpack.c.l.b16 %v1106_v28  ;;  %v4656_v18 = vld [vmem:[%s8438_s3 + $0xc8] sm:$0xf0]  ;;  %v1244_v58 = vunpack.c.l.b16 %v1112_v61 }
  0xd9   :  { %8592 = vst [vmem:[#allocation39_spill] sm:$0xff] %v6699_v2  ;;  %v1245_v12 = vunpack.c.h.b16 %v1112_v61  ;;  %1834 = vmatpush.bf16.msra.mxu0 %v6710_v44  ;;  %v4830_v25 = vld [vmem:[%s8438_s3 + $0x220] sm:$0xf]  ;;  %v5319_v22 = vld [vmem:[%s8438_s3 + $0x224] sm:$0xf0]  ;;  %v1072_v63 = vsel %vm784_vm14, %v6498_v5, %v1024_v33  ;;  %v1073_v28 = vsel %vm785_vm1, %v6507_v15, %v1025_v10  ;;  %v4524_v61 = vadd.f32 -1.0, %v5425_v20  ;;  %1853 = vmatpush.bf16.msra.mxu1 %v6723_v37 }
  0xda   :  { %8593 = vst [vmem:[#allocation40_spill] sm:$0xff] %v6710_v44  ;;  %v6737_v35 = vor.u32 %v5258_v32, %v4592_v38  ;;  %v4894_v2 = vld [vmem:[%s8438_s3 + $0x2a0] sm:$0xf]  ;;  %v5335_v44 = vld [vmem:[%s8438_s3 + $0x2a4] sm:$0xf0]  ;;  %v4525_v13 = vadd.f32 -1.0, %v5427_v0  ;;  %v6745_v9 = vpack.c.b16 %v1244_v58, %v1238_v43  ;;  %v6750_v15 = vor.u32 %v5274_v17, %v4656_v18 }
  0xdb   :  { %8594 = vst [vmem:[#allocation41_spill] sm:$0xff] %v6723_v37  ;;  %v6747_v5 = vpack.c.b16 %v1245_v12, %v1239_v56  ;;  %v1084_v33 = vsel %vm796_vm2, %v6512_v21, %v1036_v4  ;;  %v1085_v10 = vsel %vm797_vm3, %v6518_v6, %v1037_v11  ;;  %v1002_v32 = vmul.f32 0.001, %v4512_v30 }
  0xdc   :  { %8595 = vst [vmem:[#allocation42_spill] sm:$0xff] %v6737_v35  ;;  %1871 = vmatpush.bf16.msra.mxu2 %v6737_v35  ;;  %v6760_v43 = vadd.f32 %v658_v51, %v6456_v49  ;;  %v1003_v20 = vmul.f32 0.001, %v4513_v36  ;;  %1767 = vmatmul.bf16.gmra.mxu0 %v6745_v9  ;;  %v6765_v38 = vadd.f32 %v677_v27, %v6456_v49  ;;  %vm762_vm4 = vcmp.gt.f32.partialorder %v6543_v34, 0.0  ;;  %v5331_v35 = vld [vmem:[%s8438_s3 + $0x284] sm:$0xf0] }
  0xdd   :  { %8596 = vst [vmem:[#allocation43_spill] sm:$0xff] %v6750_v15  ;;  %1786 = vmatmul.bf16.gmra.mxu1 %v6747_v5  ;;  %v6767_v17 = vor.u32 %v5319_v22, %v4830_v25  ;;  %v6769_v21 = vor.u32 %v5335_v44, %v4894_v2  ;;  %v1014_v6 = vmul.f32 0.001, %v4524_v61  ;;  %1890 = vmatpush.bf16.msra.mxu3 %v6750_v15  ;;  %vm763_vm5 = vcmp.gt.f32.partialorder %v6549_v46, 0.0  ;;  %v622_v2 = vpop.f32.mrf.mxu0  ;;  %v641_v44 = vpop.f32.mrf.mxu1  ;;  %v5272_v22 = vld [vmem:[%s8438_s3 + $0xb4] sm:$0xf] }
  0xde   :  { %v836_v51 = vmin.f32 %v6760_v43, 0.0  ;;  %v1107_v30 = vpack.c.bf16 %v1073_v28, %v1072_v63  ;;  %vm774_vm6 = vcmp.gt.f32.partialorder %v6579_v8, 0.0  ;;  %v1015_v36 = vmul.f32 0.001, %v4525_v13  ;;  %v5256_v13 = vld [vmem:[%s8438_s3 + $0x34] sm:$0xf] }
  0xdf   :  { %8597 = vst [vmem:[#allocation44_spill] sm:$0xff] %v6767_v17  ;;  %v837_v4 = vmin.f32 %v6765_v38, 0.0  ;;  %1835 = vmatpush.bf16.msra.mxu0 %v6767_v17  ;;  %1854 = vmatpush.bf16.msra.mxu1 %v6769_v21  ;;  %vm775_vm7 = vcmp.gt.f32.partialorder %v6590_v54, 0.0  ;;  %v6782_v0 = vadd.f32 %v6694_v47, %v6456_v49  ;;  %v1113_v18 = vpack.c.bf16 %v1085_v10, %v1084_v33  ;;  %v4584_v47 = vld [vmem:[%s8438_s3 + $0x38] sm:$0xf0] }
  0xe0   :  { %8598 = vst [vmem:[#allocation45_spill] sm:$0xff] %v6769_v21  ;;  %v914_v11 = vmul.f32 1.442695, %v836_v51  ;;  %v1050_v58 = vsel %vm762_vm4, %v6543_v34, %v1002_v32  ;;  %v1051_v56 = vsel %vm763_vm5, %v6549_v46, %v1003_v20  ;;  %v6793_v12 = vadd.f32 %v6696_v60, %v6456_v49  ;;  %v4648_v60 = vld [vmem:[%s8438_s3 + $0xb8] sm:$0xf0] }
  0xe1   :  { %v916_v25 = vmul.f32 1.442695, %v837_v4  ;;  %v1062_v63 = vsel %vm774_vm6, %v6579_v8, %v1014_v6  ;;  %v1240_v34 = vunpack.c.l.b16 %v1107_v30  ;;  %v1246_v46 = vunpack.c.l.b16 %v1113_v18  ;;  %v4822_v28 = vld [vmem:[%s8438_s3 + $0x210] sm:$0xf]  ;;  %v5317_v61 = vld [vmem:[%s8438_s3 + $0x214] sm:$0xf0] }
  0xe2   :  { %5428 = vpow2.f32 %v914_v11  ;;  %v1063_v27 = vsel %vm775_vm7, %v6590_v54, %v1015_v36  ;;  %v1241_v8 = vunpack.c.h.b16 %v1107_v30  ;;  %v1247_v33 = vunpack.c.h.b16 %v1113_v18  ;;  %v4886_v10 = vld [vmem:[%s8438_s3 + $0x290] sm:$0xf]  ;;  %v5333_v32 = vld [vmem:[%s8438_s3 + $0x294] sm:$0xf0]  ;;  %v5254_v20 = vld [vmem:[%s8438_s3 + $0x24] sm:$0xf] }
  0xe3   :  { %5430 = vpow2.f32 %v916_v25  ;;  %v834_v6 = vmin.f32 %v6782_v0, 0.0  ;;  %v6826_v51 = vpack.c.b16 %v1246_v46, %v1240_v34  ;;  %v4576_v54 = vld [vmem:[%s8438_s3 + $0x28] sm:$0xf0]  ;;  %v5270_v30 = vld [vmem:[%s8438_s3 + $0xa4] sm:$0xf]  ;;  %v6834_v36 = vpack.c.bf16 %v1051_v56, %v1050_v58  ;;  %v6846_v34 = vpop.f32.mrf.mxu2 }
  0xe4   :  { %v6836_v4 = vpack.c.b16 %v1247_v33, %v1241_v8  ;;  %v6839_v11 = vadd.f32 %v622_v2, %v6484_v23  ;;  %v6841_v18 = vor.u32 %v5256_v13, %v4584_v47  ;;  %v4640_v25 = vld [vmem:[%s8438_s3 + $0xa8] sm:$0xf0]  ;;  %8600 = vst [vmem:[#allocation47_spill] sm:$0xff] %v6846_v34  ;;  %v4814_v46 = vld [vmem:[%s8438_s3 + $0x200] sm:$0xf]  ;;  %v6854_v56 = vpack.c.bf16 %v1063_v27, %v1062_v63  ;;  %v6862_v8 = vpop.f32.mrf.mxu3 }
  0xe5   :  { %v5315_v58 = vld [vmem:[%s8438_s3 + $0x204] sm:$0xf0]  ;;  %v835_v2 = vmin.f32 %v6793_v12, 0.0  ;;  %1805 = vmatmul.bf16.gmra.mxu2 %v6826_v51  ;;  %v6858_v13 = vor.u32 %v5272_v22, %v4648_v60  ;;  %v6860_v47 = vor.u32 %v5317_v61, %v4822_v28  ;;  %8603 = vst [vmem:[#allocation50_spill] sm:$0xff] %v6862_v8  ;;  %v4878_v33 = vld [vmem:[%s8438_s3 + $0x280] sm:$0xf]  ;;  %v6872_v63 = vadd.f32 %v641_v44, %v6484_v23 }
  0xe6   :  { %8599 = vst [vmem:[#allocation46_spill] sm:$0xff] %v6841_v18  ;;  %1824 = vmatmul.bf16.gmra.mxu3 %v6836_v4  ;;  %1872 = vmatpush.bf16.msra.mxu2 %v6841_v18  ;;  %v6875_v22 = vor.u32 %v5333_v32, %v4886_v10  ;;  %v6877_v60 = vor.u32 %v5254_v20, %v4576_v54  ;;  %v910_v61 = vmul.f32 1.442695, %v834_v6  ;;  %v5252_v15 = vld [vmem:[%s8438_s3 + $0x14] sm:$0xf]  ;;  %v846_v18 = vmin.f32 %v6839_v11, 0.0  ;;  %v691_v20 = vpop.f32.mrf.mxu0  ;;  %v710_v6 = vpop.f32.mrf.mxu1 }
  0xe7   :  { %8601 = vst [vmem:[#allocation48_spill] sm:$0xff] %v6858_v13  ;;  %1891 = vmatpush.bf16.msra.mxu3 %v6858_v13  ;;  %1836 = vmatpush.bf16.msra.mxu0 %v6860_v47  ;;  %v6881_v27 = vor.u32 %v5270_v30, %v4640_v25  ;;  %v6888_v10 = vor.u32 %v5315_v58, %v4814_v46  ;;  %v4568_v54 = vld [vmem:[%s8438_s3 + $0x18] sm:$0xf0]  ;;  %v5268_v30 = vld [vmem:[%s8438_s3 + $0x94] sm:$0xf]  ;;  %v1230_v25 = vunpack.c.l.b16 %v6834_v36  ;;  %v1237_v46 = vunpack.c.h.b16 %v6854_v56 }
  0xe8   :  { %8602 = vst [vmem:[#allocation49_spill] sm:$0xff] %v6860_v47  ;;  %v5429_v28 = vpop.eup %5428  ;;  %1855 = vmatpush.bf16.msra.mxu1 %v6875_v22  ;;  %v6890_v32 = vor.u32 %v5331_v35, %v4878_v33  ;;  %v912_v13 = vmul.f32 1.442695, %v835_v2  ;;  %v4632_v35 = vld [vmem:[%s8438_s3 + $0x98] sm:$0xf0]  ;;  %vm788_vm8 = vcmp.gt.f32.partialorder %v6760_v43, 0.0  ;;  %5432 = vpow2.f32 %v910_v61 }
  0xe9   :  { %8604 = vst [vmem:[#allocation51_spill] sm:$0xff] %v6875_v22  ;;  %v5431_v44 = vpop.eup %5430  ;;  %v4538_v17 = vadd.f32 -1.0, %v5429_v28  ;;  %v1236_v28 = vunpack.c.l.b16 %v6854_v56  ;;  %v847_v33 = vmin.f32 %v6872_v63, 0.0  ;;  %v5296_v22 = vld [vmem:[%s8438_s3 + $0x174] sm:$0xf]  ;;  %vm789_vm9 = vcmp.gt.f32.partialorder %v6765_v38, 0.0 }
  0xea   :  { %8605 = vst [vmem:[#allocation52_spill] sm:$0xff] %v6877_v60  ;;  %v4539_v47 = vadd.f32 -1.0, %v5431_v44  ;;  %1873 = vmatpush.bf16.msra.mxu2 %v6877_v60  ;;  %v4744_v2 = vld [vmem:[%s8438_s3 + $0x178] sm:$0xf0]  ;;  %v6920_v56 = vadd.f32 %v710_v6, %v6315_v45  ;;  %v5312_v60 = vld [vmem:[%s8438_s3 + $0x1f4] sm:$0xf]  ;;  %5434 = vpow2.f32 %v912_v13 }
  0xeb   :  { %8606 = vst [vmem:[#allocation53_spill] sm:$0xff] %v6881_v27  ;;  %v1028_v58 = vmul.f32 0.001, %v4538_v17  ;;  %1892 = vmatpush.bf16.msra.mxu3 %v6881_v27  ;;  %1837 = vmatpush.bf16.msra.mxu0 %v6888_v10  ;;  %v6917_v17 = vadd.f32 %v691_v20, %v6315_v45  ;;  %v934_v37 = vmul.f32 1.442695, %v846_v18  ;;  %v6929_v27 = vor.u32 %v5268_v30, %v4632_v35  ;;  %v729_v61 = vpop.f32.mrf.mxu2 }
  0xec   :  { %8607 = vst [vmem:[#allocation54_spill] sm:$0xff] %v6888_v10  ;;  %v1029_v44 = vmul.f32 0.001, %v4539_v47  ;;  %1856 = vmatpush.bf16.msra.mxu1 %v6890_v32  ;;  %v6927_v47 = vor.u32 %v5252_v15, %v4568_v54  ;;  %v4808_v20 = vld [vmem:[%s8438_s3 + $0x1f8] sm:$0xf0]  ;;  %v1231_v10 = vunpack.c.h.b16 %v6834_v36  ;;  %v815_v36 = vmin.f32 %v6920_v56, 0.0 }
  0xed   :  { %8608 = vst [vmem:[#allocation55_spill] sm:$0xff] %v6890_v32  ;;  %v1076_v21 = vsel %vm788_vm8, %v6760_v43, %v1028_v58  ;;  %v5250_v6 = vld [vmem:[%s8438_s3 + $0x4] sm:$0xf]  ;;  %v814_v15 = vmin.f32 %v6917_v17, 0.0  ;;  %v4560_v18 = vld [vmem:[%s8438_s3 + $0x8] sm:$0xf0]  ;;  %v6960_v13 = vor.u32 %v5296_v22, %v4744_v2  ;;  %5436 = vpow2.f32 %v934_v37 }
  0xee   :  { %8609 = vst [vmem:[#allocation56_spill] sm:$0xff] %v6927_v47  ;;  %v1077_v43 = vsel %vm789_vm9, %v6765_v38, %v1029_v44  ;;  %v5266_v54 = vld [vmem:[%s8438_s3 + $0x84] sm:$0xf]  ;;  %v936_v35 = vmul.f32 1.442695, %v847_v33  ;;  %1874 = vmatpush.bf16.msra.mxu2 %v6927_v47  ;;  %v6956_v44 = vpack.c.b16 %v1236_v28, %v1230_v25  ;;  %v6958_v32 = vpack.c.b16 %v1237_v46, %v1231_v10  ;;  %v5433_v46 = vpop.eup %5432 }
  0xef   :  { %8610 = vst [vmem:[#allocation57_spill] sm:$0xff] %v6929_v27  ;;  %v6948_v30 = vpack.c.bf16 %v1077_v43, %v1076_v21  ;;  %v4624_v38 = vld [vmem:[%s8438_s3 + $0x88] sm:$0xf0]  ;;  %v870_v58 = vmul.f32 1.442695, %v814_v15  ;;  %1893 = vmatpush.bf16.msra.mxu3 %v6929_v27  ;;  %v748_v21 = vpop.f32.mrf.mxu3  ;;  %v6968_v15 = vor.u32 %v5312_v60, %v4808_v20  ;;  %v6970_v27 = vor.u32 %v5250_v6, %v4560_v18 }
  0xf0   :  { %8612 = vst [vmem:[#allocation59_spill] sm:$0xff] %v6960_v13  ;;  %v5294_v33 = vld [vmem:[%s8438_s3 + $0x164] sm:$0xf]  ;;  %v4736_v43 = vld [vmem:[%s8438_s3 + $0x168] sm:$0xf0]  ;;  %1838 = vmatmul.bf16.vlgmr.msra.gmra.mxu0 %v6956_v44  ;;  %1857 = vmatmul.bf16.vlgmr.msra.gmra.mxu1 %v6958_v32  ;;  %v6980_v25 = vor.u32 %v5266_v54, %v4624_v38  ;;  %v6983_v37 = vadd.f32 %v729_v61, %v6315_v45  ;;  %v5435_v6 = vpop.eup %5434  ;;  %v7004_v54 = vpop.f32.mrf.mxu0  ;;  %vm766_vm10 = vcmp.gt.f32.partialorder %v6917_v17, 0.0 }
  0xf1   :  { %8611 = vst [vmem:[#allocation58_spill] sm:$0xff] %v6948_v30  ;;  %v872_v47 = vmul.f32 1.442695, %v815_v36  ;;  %v5310_v22 = vld [vmem:[%s8438_s3 + $0x1e4] sm:$0xf]  ;;  %5438 = vpow2.f32 %v870_v58  ;;  %1906 = vmatpush.bf16.msrb.mxu0 %v6960_v13  ;;  %1925 = vmatpush.bf16.msrb.mxu1 %v6968_v15  ;;  %v6988_v60 = vadd.f32 %v748_v21, %v6315_v45  ;;  %v6990_v28 = vor.u32 %v5294_v33, %v4736_v43 }
  0xf2   :  { %8613 = vst [vmem:[#allocation60_spill] sm:$0xff] %v6968_v15  ;;  %v4800_v10 = vld [vmem:[%s8438_s3 + $0x1e8] sm:$0xf0]  ;;  %1875 = vmatpush.bf16.msra.mxu2 %v6970_v27  ;;  %v816_v2 = vmin.f32 %v6983_v37, 0.0  ;;  %v4872_v45 = vld [vmem:[%s8438_s3 + $0x278] sm:$0xf0] }
  0xf3   :  { %8614 = vst [vmem:[#allocation61_spill] sm:$0xff] %v6970_v27  ;;  %5440 = vpow2.f32 %v872_v47  ;;  %1894 = vmatpush.bf16.msra.mxu3 %v6980_v25  ;;  %v6995_v20 = vor.u32 %v5310_v22, %v4800_v10  ;;  %v5328_v47 = vld [vmem:[%s8438_s3 + $0x274] sm:$0xf]  ;;  %v817_v18 = vmin.f32 %v6988_v60, 0.0  ;;  %v4936_v61 = vld [vmem:[%s8438_s3 + $0x2f8] sm:$0xf0]  ;;  %v5437_v21 = vpop.eup %5436 }
  0xf4   :  { %8615 = vst [vmem:[#allocation62_spill] sm:$0xff] %v6980_v25  ;;  %5442 = vpow2.f32 %v936_v35  ;;  %v7006_v35 = vpop.f32.mrf.mxu1  ;;  %v874_v36 = vmul.f32 1.442695, %v816_v2  ;;  %v5344_v38 = vld [vmem:[%s8438_s3 + $0x2f4] sm:$0xf]  ;;  %v7019_v43 = vor.u32 %v5328_v47, %v4872_v45  ;;  %v4536_v25 = vadd.f32 -1.0, %v5433_v46 }
  0xf5   :  { %8616 = vst [vmem:[#allocation63_spill] sm:$0xff] %v6990_v28  ;;  %v5292_v58 = vld [vmem:[%s8438_s3 + $0x154] sm:$0xf]  ;;  %v876_v33 = vmul.f32 1.442695, %v817_v18  ;;  %1907 = vmatpush.bf16.msrb.mxu0 %v6990_v28  ;;  %1926 = vmatpush.bf16.msrb.mxu1 %v6995_v20  ;;  %v4537_v28 = vadd.f32 -1.0, %v5435_v6 }
  0xf6   :  { %8617 = vst [vmem:[#allocation64_spill] sm:$0xff] %v6995_v20  ;;  %v4728_v22 = vld [vmem:[%s8438_s3 + $0x158] sm:$0xf0]  ;;  %v5308_v10 = vld [vmem:[%s8438_s3 + $0x1d4] sm:$0xf]  ;;  %5444 = vpow2.f32 %v874_v36  ;;  %1876 = vmatmul.bf16.vlgmr.msra.gmra.mxu2 %v6514_v24  ;;  %1895 = vmatmul.bf16.vlgmr.msra.gmra.mxu3 %v6521_v40  ;;  %vm767_vm11 = vcmp.gt.f32.partialorder %v6920_v56, 0.0 }
  0xf7   :  { %8618 = vst [vmem:[#allocation65_spill] sm:$0xff] %v7004_v54  ;;  %v5439_v2 = vpop.eup %5438  ;;  %v4792_v18 = vld [vmem:[%s8438_s3 + $0x1d8] sm:$0xf0]  ;;  %v5326_v47 = vld [vmem:[%s8438_s3 + $0x264] sm:$0xf]  ;;  %5446 = vpow2.f32 %v876_v33  ;;  %1944 = vmatpush.bf16.msrb.mxu2 %v7019_v43  ;;  %vm786_vm12 = vcmp.gt.f32.partialorder %v6782_v0, 0.0 }
  0xf8   :  { %8619 = vst [vmem:[#allocation66_spill] sm:$0xff] %v7006_v35  ;;  %v4864_v45 = vld [vmem:[%s8438_s3 + $0x268] sm:$0xf0]  ;;  %v4516_v30 = vadd.f32 -1.0, %v5439_v2  ;;  %v5342_v24 = vld [vmem:[%s8438_s3 + $0x2e4] sm:$0xf]  ;;  %v7052_v2 = vor.u32 %v5344_v38, %v4936_v61  ;;  %v7060_v35 = vor.u32 %v5308_v10, %v4792_v18 }
  0xf9   :  { %8620 = vst [vmem:[#allocation67_spill] sm:$0xff] %v7019_v43  ;;  %v5441_v27 = vpop.eup %5440  ;;  %v4928_v40 = vld [vmem:[%s8438_s3 + $0x2e8] sm:$0xf0]  ;;  %v5290_v13 = vld [vmem:[%s8438_s3 + $0x144] sm:$0xf]  ;;  %v7054_v43 = vor.u32 %v5292_v58, %v4728_v22  ;;  %v7068_v38 = vor.u32 %v5326_v47, %v4864_v45  ;;  %v696_v45 = vpop.f32.mrf.mxu0  ;;  %vm787_vm13 = vcmp.gt.f32.partialorder %v6793_v12, 0.0 }
  0xfa   :  { %v5443_v36 = vpop.eup %5442  ;;  %v4517_v20 = vadd.f32 -1.0, %v5441_v27  ;;  %v4720_v46 = vld [vmem:[%s8438_s3 + $0x148] sm:$0xf0]  ;;  %v1006_v33 = vmul.f32 0.001, %v4516_v30  ;;  %8621 = vst [vmem:[#allocation68_spill] sm:$0xff] %v7052_v2  ;;  %1963 = vmatpush.bf16.msrb.mxu3 %v7052_v2  ;;  %v7070_v61 = vor.u32 %v5342_v24, %v4928_v40  ;;  %1927 = vmatpush.bf16.msrb.mxu1 %v7060_v35 }
  0xfb   :  { %8622 = vst [vmem:[#allocation69_spill] sm:$0xff] %v7054_v43  ;;  %v5306_v6 = vld [vmem:[%s8438_s3 + $0x1c4] sm:$0xf]  ;;  %v4548_v27 = vadd.f32 -1.0, %v5437_v21  ;;  %v4784_v54 = vld [vmem:[%s8438_s3 + $0x1c8] sm:$0xf0]  ;;  %1908 = vmatpush.bf16.msrb.mxu0 %v7054_v43  ;;  %1945 = vmatpush.bf16.msrb.mxu2 %v7068_v38 }
  0xfc   :  { %v1007_v15 = vmul.f32 0.001, %v4517_v20  ;;  %8623 = vst [vmem:[#allocation70_spill] sm:$0xff] %v7060_v35  ;;  %v4549_v19 = vadd.f32 -1.0, %v5443_v36  ;;  %v1054_v30 = vsel %vm766_vm10, %v6917_v17, %v1006_v33  ;;  %v5445_v58 = vpop.eup %5444  ;;  %v1026_v20 = vmul.f32 0.001, %v4536_v25  ;;  %v715_v24 = vpop.f32.mrf.mxu1 }
  0xfd   :  { %8624 = vst [vmem:[#allocation71_spill] sm:$0xff] %v7068_v38  ;;  %v1027_v21 = vmul.f32 0.001, %v4537_v28  ;;  %v5447_v10 = vpop.eup %5446  ;;  %v4518_v17 = vadd.f32 -1.0, %v5445_v58  ;;  %v7078_v36 = vor.u32 %v5290_v13, %v4720_v46  ;;  %v7080_v47 = vor.u32 %v5306_v6, %v4784_v54  ;;  %v7083_v28 = vpop.f32.mrf.mxu2  ;;  %v4856_v13 = vld [vmem:[%s8438_s3 + $0x258] sm:$0xf0] }
  0xfe   :  { %8625 = vst [vmem:[#allocation72_spill] sm:$0xff] %v7070_v61  ;;  %v1055_v22 = vsel %vm767_vm11, %v6920_v56, %v1007_v15  ;;  %v4519_v25 = vadd.f32 -1.0, %v5447_v10  ;;  %v7085_v56 = vpop.f32.mrf.mxu3  ;;  %v5324_v15 = vld [vmem:[%s8438_s3 + $0x254] sm:$0xf]  ;;  %v1038_v40 = vmul.f32 0.001, %v4548_v27  ;;  %1964 = vmatpush.bf16.msrb.mxu3 %v7070_v61  ;;  %v7098_v6 = vadd.f32 %v696_v45, %v6456_v49 }
  0xff   :  { %v7075_v18 = vpack.c.bf16 %v1055_v22, %v1054_v30  ;;  %8627 = vst [vmem:[#allocation74_spill] sm:$0xff] %v7078_v36  ;;  %v1039_v54 = vmul.f32 0.001, %v4549_v19  ;;  %v1008_v46 = vmul.f32 0.001, %v4518_v17  ;;  %1909 = vmatpush.bf16.msrb.mxu0 %v7078_v36  ;;  %vm768_vm14 = vcmp.gt.f32.partialorder %v6983_v37, 0.0  ;;  %1928 = vmatpush.bf16.msrb.mxu1 %v7080_v47 }
 0x100   :  { %8628 = vst [vmem:[#allocation75_spill] sm:$0xff] %v7080_v47  ;;  %v1009_v33 = vmul.f32 0.001, %v4519_v25  ;;  %v7101_v30 = vadd.f32 %v715_v24, %v6456_v49  ;;  %vm798_vm15 = vcmp.gt.f32.partialorder %v6839_v11, 0.0  ;;  %vm769_vm0 = vcmp.gt.f32.partialorder %v6988_v60, 0.0 }
 0x101   :  { %8626 = vst [vmem:[#allocation73_spill] sm:$0xff] %v7075_v18  ;;  %v1056_v19 = vsel %vm768_vm14, %v6983_v37, %v1008_v46  ;;  %v7106_v27 = vor.u32 %v5324_v15, %v4856_v13  ;;  %v5340_v58 = vld [vmem:[%s8438_s3 + $0x2d4] sm:$0xf]  ;;  %v4920_v22 = vld [vmem:[%s8438_s3 + $0x2d8] sm:$0xf0]  ;;  %v1074_v10 = vsel %vm786_vm12, %v6782_v0, %v1026_v20  ;;  %vm799_vm1 = vcmp.gt.f32.partialorder %v6872_v63, 0.0 }
 0x102   :  { %8629 = vst [vmem:[#allocation76_spill] sm:$0xff] %v7083_v28  ;;  %v1057_v37 = vsel %vm769_vm0, %v6988_v60, %v1009_v33  ;;  %v838_v17 = vmin.f32 %v7098_v6, 0.0  ;;  %v5288_v45 = vld [vmem:[%s8438_s3 + $0x134] sm:$0xf]  ;;  %v4712_v24 = vld [vmem:[%s8438_s3 + $0x138] sm:$0xf0]  ;;  %v1075_v25 = vsel %vm787_vm13, %v6793_v12, %v1027_v21  ;;  %v1086_v0 = vsel %vm798_vm15, %v6839_v11, %v1038_v40 }
 0x103   :  { %8630 = vst [vmem:[#allocation77_spill] sm:$0xff] %v7085_v56  ;;  %v1087_v20 = vsel %vm799_vm1, %v6872_v63, %v1039_v54  ;;  %v7131_v15 = vpack.c.bf16 %v1057_v37, %v1056_v19  ;;  %1946 = vmatpush.bf16.msrb.mxu2 %v7106_v27  ;;  %v5304_v60 = vld [vmem:[%s8438_s3 + $0x1b4] sm:$0xf]  ;;  %v4776_v13 = vld [vmem:[%s8438_s3 + $0x1b8] sm:$0xf0]  ;;  %v839_v11 = vmin.f32 %v7101_v30, 0.0  ;;  %v7144_v63 = vor.u32 %v5340_v58, %v4920_v22 }
 0x104   :  { %8631 = vst [vmem:[#allocation78_spill] sm:$0xff] %v7106_v27  ;;  %v5322_v12 = vld [vmem:[%s8438_s3 + $0x244] sm:$0xf]  ;;  %v918_v21 = vmul.f32 1.442695, %v838_v17  ;;  %v1108_v46 = vpack.c.bf16 %v1075_v25, %v1074_v10  ;;  %v1114_v33 = vpack.c.bf16 %v1087_v20, %v1086_v0  ;;  %v7157_v58 = vor.u32 %v5288_v45, %v4712_v24 }
 0x105   :  { %8632 = vst [vmem:[#allocation79_spill] sm:$0xff] %v7131_v15  ;;  %v4848_v40 = vld [vmem:[%s8438_s3 + $0x248] sm:$0xf0]  ;;  %v920_v54 = vmul.f32 1.442695, %v839_v11  ;;  %1965 = vmatpush.bf16.msrb.mxu3 %v7144_v63  ;;  %v7159_v22 = vor.u32 %v5304_v60, %v4776_v13  ;;  %v734_v0 = vpop.f32.mrf.mxu2  ;;  %vm790_vm2 = vcmp.gt.f32.partialorder %v7098_v6, 0.0 }
 0x106   :  { %8633 = vst [vmem:[#allocation80_spill] sm:$0xff] %v7144_v63  ;;  %5448 = vpow2.f32 %v918_v21  ;;  %v5338_v19 = vld [vmem:[%s8438_s3 + $0x2c4] sm:$0xf]  ;;  %v4912_v37 = vld [vmem:[%s8438_s3 + $0x2c8] sm:$0xf0]  ;;  %1881 = vmatmul.bf16.gmra.mxu2 %v6745_v9  ;;  %v7161_v17 = vor.u32 %v5322_v12, %v4848_v40  ;;  %1900 = vmatmul.bf16.gmra.mxu3 %v6747_v5  ;;  %v1242_v10 = vunpack.c.l.b16 %v1108_v46  ;;  %v1248_v25 = vunpack.c.l.b16 %v1114_v33  ;;  %v753_v20 = vpop.f32.mrf.mxu3 }
 0x107   :  { %8634 = vst [vmem:[#allocation81_spill] sm:$0xff] %v7157_v58  ;;  %5450 = vpow2.f32 %v920_v54  ;;  %v1243_v21 = vunpack.c.h.b16 %v1108_v46  ;;  %v1249_v11 = vunpack.c.h.b16 %v1114_v33  ;;  %1910 = vmatpush.bf16.msrb.mxu0 %v7157_v58  ;;  %1929 = vmatpush.bf16.msrb.mxu1 %v7159_v22  ;;  %v7166_v9 = vor.u32 %v5338_v19, %v4912_v37  ;;  %v5286_v45 = vld [vmem:[%s8438_s3 + $0x124] sm:$0xf]  ;;  %v4704_v5 = vld [vmem:[%s8438_s3 + $0x128] sm:$0xf0] }
 0x108   :  { %8635 = vst [vmem:[#allocation82_spill] sm:$0xff] %v7159_v22  ;;  %v7174_v24 = vpack.c.b16 %v1248_v25, %v1242_v10  ;;  %1947 = vmatpush.bf16.msrb.mxu2 %v7161_v17  ;;  %v7181_v13 = vadd.f32 %v734_v0, %v6456_v49  ;;  %v7184_v12 = vadd.f32 %v753_v20, %v6456_v49  ;;  %v5302_v40 = vld [vmem:[%s8438_s3 + $0x1a4] sm:$0xf]  ;;  %v4768_v54 = vld [vmem:[%s8438_s3 + $0x1a8] sm:$0xf0]  ;;  %vm791_vm3 = vcmp.gt.f32.partialorder %v7101_v30, 0.0 }
 0x109   :  { %8636 = vst [vmem:[#allocation83_spill] sm:$0xff] %v7161_v17  ;;  %v7177_v60 = vpack.c.b16 %v1249_v11, %v1243_v21  ;;  %1966 = vmatpush.bf16.msrb.mxu3 %v7166_v9  ;;  %v7193_v33 = vor.u32 %v5286_v45, %v4704_v5  ;;  %v5320_v49 = vld [vmem:[%s8438_s3 + $0x234] sm:$0xf]  ;;  %v4840_v10 = vld [vmem:[%s8438_s3 + $0x238] sm:$0xf0]  ;;  %v7205_v20 = vor.u32 %v5302_v40, %v4768_v54  ;;  %vm2036_vm6 = vcmask 261120  }
 0x10a   :  { %8637 = vst [vmem:[#allocation84_spill] sm:$0xff] %v7166_v9  ;;  %1843 = vmatmul.bf16.gmra.mxu0 %v7174_v24  ;;  %v840_v37 = vmin.f32 %v7181_v13, 0.0  ;;  %v841_v0 = vmin.f32 %v7184_v12, 0.0  ;;  %v5336_v5 = vld [vmem:[%s8438_s3 + $0x2b4] sm:$0xf]  ;;  %v7215_v9 = vor.u32 %v5320_v49, %v4840_v10  ;;  %vm792_vm4 = vcmp.gt.f32.partialorder %v7181_v13, 0.0 }
 0x10b   :  { %8638 = vst [vmem:[#allocation85_spill] sm:$0xff] %v7193_v33  ;;  %1862 = vmatmul.bf16.gmra.mxu1 %v7177_v60  ;;  %1911 = vmatpush.bf16.msrb.mxu0 %v7193_v33  ;;  %v5284_v40 = vld [vmem:[%s8438_s3 + $0x114] sm:$0xf]  ;;  %v4696_v54 = vld [vmem:[%s8438_s3 + $0x118] sm:$0xf0]  ;;  %vm793_vm5 = vcmp.gt.f32.partialorder %v7184_v12, 0.0 }
 0x10c   :  { %v5449_v46 = vpop.eup %5448  ;;  %8639 = vst [vmem:[#allocation86_spill] sm:$0xff] %v7205_v20  ;;  %v922_v45 = vmul.f32 1.442695, %v840_v37  ;;  %v924_v17 = vmul.f32 1.442695, %v841_v0  ;;  %1930 = vmatpush.bf16.msrb.mxu1 %v7205_v20  ;;  %1948 = vmatpush.bf16.msrb.mxu2 %v7215_v9  ;;  %v7261_v63 = vor.u32 %v5284_v40, %v4696_v54  ;;  %vm2029_vm7 = vcmask 1039360  }
 0x10d   :  { %v4540_v19 = vadd.f32 -1.0, %v5449_v46  ;;  %v5451_v25 = vpop.eup %5450  ;;  %v4904_v46 = vld [vmem:[%s8438_s3 + $0x2b8] sm:$0xf0]  ;;  %8640 = vst [vmem:[#allocation87_spill] sm:$0xff] %v7215_v9  ;;  %v5318_v10 = vld [vmem:[%s8438_s3 + $0x224] sm:$0xf] }
 0x10e   :  { %v4541_v11 = vadd.f32 -1.0, %v5451_v25  ;;  %v5300_v25 = vld [vmem:[%s8438_s3 + $0x194] sm:$0xf]  ;;  %v4760_v49 = vld [vmem:[%s8438_s3 + $0x198] sm:$0xf0]  ;;  %5452 = vpow2.f32 %v922_v45  ;;  %v7250_v27 = vor.u32 %v5336_v5, %v4904_v46  ;;  %8643 = vst [vmem:[#allocation90_spill] sm:$0xff] %v7261_v63 }
 0x10f   :  { %v1030_v21 = vmul.f32 0.001, %v4540_v19  ;;  %5454 = vpow2.f32 %v924_v17  ;;  %v5282_v45 = vld [vmem:[%s8438_s3 + $0x104] sm:$0xf]  ;;  %v7263_v38 = vor.u32 %v5300_v25, %v4760_v49  ;;  %v5316_v5 = vld [vmem:[%s8438_s3 + $0x214] sm:$0xf]  ;;  %1912 = vmatpush.bf16.msrb.mxu0 %v7261_v63 }
 0x110   :  { %v1031_v37 = vmul.f32 0.001, %v4541_v11  ;;  %v4896_v11 = vld [vmem:[%s8438_s3 + $0x2a8] sm:$0xf0]  ;;  %8642 = vst [vmem:[#allocation89_spill] sm:$0xff] %v7250_v27  ;;  %1967 = vmatpush.bf16.msrb.mxu3 %v7250_v27  ;;  %vm2162_vm8 = vcmask 1031168  }
 0x111   :  { %v1078_v19 = vsel %vm790_vm2, %v7098_v6, %v1030_v21  ;;  %v4832_v6 = vld [vmem:[%s8438_s3 + $0x228] sm:$0xf0]  ;;  %v5334_v21 = vld [vmem:[%s8438_s3 + $0x2a4] sm:$0xf]  ;;  %8644 = vst [vmem:[#allocation91_spill] sm:$0xff] %v7263_v38  ;;  %1931 = vmatpush.bf16.msrb.mxu1 %v7263_v38  ;;  %vm2244_vm9 = vcmask 1022976  }
 0x112   :  { %v1079_v0 = vsel %vm791_vm3, %v7101_v30, %v1031_v37  ;;  %v4688_v30 = vld [vmem:[%s8438_s3 + $0x108] sm:$0xf0]  ;;  %v5298_v17 = vld [vmem:[%s8438_s3 + $0x184] sm:$0xf]  ;;  %v4824_v46 = vld [vmem:[%s8438_s3 + $0x218] sm:$0xf0] }
 0x113   :  { %v7248_v9 = vpack.c.bf16 %v1079_v0, %v1078_v19  ;;  %v4752_v37 = vld [vmem:[%s8438_s3 + $0x188] sm:$0xf0]  ;;  %v7265_v19 = vor.u32 %v5318_v10, %v4832_v6  ;;  %v7274_v0 = vor.u32 %v5334_v21, %v4896_v11  ;;  %v7278_v40 = vor.u32 %v5282_v45, %v4688_v30  ;;  %v5332_v25 = vld [vmem:[%s8438_s3 + $0x294] sm:$0xf]  ;;  %v4888_v49 = vld [vmem:[%s8438_s3 + $0x298] sm:$0xf0] }
 0x114   :  { %v7280_v54 = vor.u32 %v5298_v17, %v4752_v37  ;;  %v5453_v10 = vpop.eup %5452  ;;  %v7289_v6 = vor.u32 %v5316_v5, %v4824_v46  ;;  %v5314_v45 = vld [vmem:[%s8438_s3 + $0x204] sm:$0xf]  ;;  %v4816_v30 = vld [vmem:[%s8438_s3 + $0x208] sm:$0xf0]  ;;  %v7298_v37 = vor.u32 %v5332_v25, %v4888_v49  ;;  %vm2326_vm10 = vcmask 1014784  }
 0x115   :  { %8641 = vst [vmem:[#allocation88_spill] sm:$0xff] %v7248_v9  ;;  %1949 = vmatpush.bf16.msrb.mxu2 %v7265_v19  ;;  %v5455_v21 = vpop.eup %5454  ;;  %v4542_v11 = vadd.f32 -1.0, %v5453_v10  ;;  %1968 = vmatpush.bf16.msrb.mxu3 %v7274_v0  ;;  %v5330_v5 = vld [vmem:[%s8438_s3 + $0x284] sm:$0xf]  ;;  %v4880_v46 = vld [vmem:[%s8438_s3 + $0x288] sm:$0xf0]  ;;  %v7310_v25 = vor.u32 %v5314_v45, %v4816_v30  ;;  %v7334_v45 = vpop.f32.mrf.mxu2 }
 0x116   :  { %8645 = vst [vmem:[#allocation92_spill] sm:$0xff] %v7265_v19  ;;  %v4543_v17 = vadd.f32 -1.0, %v5455_v21  ;;  %1913 = vmatpush.bf16.msrb.mxu0 %v7278_v40  ;;  %1932 = vmatpush.bf16.msrb.mxu1 %v7280_v54  ;;  %s5561_s3 = smov 127   ;;  %vm2408_vm11 = vcmask 1006592   ;;  %vm2490_vm12 = vcmask 998400   ;;  %vm2572_vm13 = vcmask 990208  }
 0x117   :  { %8646 = vst [vmem:[#allocation93_spill] sm:$0xff] %v7274_v0  ;;  %v1032_v27 = vmul.f32 0.001, %v4542_v11  ;;  %v7317_v11 = vor.u32 %v5330_v5, %v4880_v46  ;;  %vm2654_vm14 = vcmask 982016   ;;  %vm2736_vm15 = vcmask 973824  }
 0x118   :  { %8647 = vst [vmem:[#allocation94_spill] sm:$0xff] %v7278_v40  ;;  %v1033_v10 = vmul.f32 0.001, %v4543_v17  ;;  %vm2818_vm0 = vcmask 965632  }
 0x119   :  { %8648 = vst [vmem:[#allocation95_spill] sm:$0xff] %v7280_v54  ;;  %1950 = vmatpush.bf16.msrb.mxu2 %v7289_v6  ;;  %v1080_v49 = vsel %vm792_vm4, %v7181_v13, %v1032_v27  ;;  %1969 = vmatpush.bf16.msrb.mxu3 %v7298_v37  ;;  %v7328_v27 = vpop.f32.mrf.mxu0 }
 0x11a   :  { %8649 = vst [vmem:[#allocation96_spill] sm:$0xff] %v7289_v6  ;;  %v1081_v21 = vsel %vm793_vm5, %v7184_v12, %v1033_v10  ;;  %1914 = vmatmul.bf16.vlgmr.msrb.gmra.mxu0 %v6568_v62  ;;  %v7331_v62 = vpop.f32.mrf.mxu1 }
 0x11b   :  { %8650 = vst [vmem:[#allocation97_spill] sm:$0xff] %v7298_v37  ;;  %v7319_v19 = vpack.c.bf16 %v1081_v21, %v1080_v49  ;;  %1933 = vmatmul.bf16.vlgmr.msrb.gmra.mxu1 %v6576_v42 }
 0x11c   :  { %8651 = vst [vmem:[#allocation98_spill] sm:$0xff] %v7310_v25 }
 0x11d   :  { %8652 = vst [vmem:[#allocation99_spill] sm:$0xff] %v7317_v11  ;;  %1951 = vmatpush.bf16.msrb.mxu2 %v7310_v25  ;;  %1970 = vmatpush.bf16.msrb.mxu3 %v7317_v11 }
 0x11e   :  { %8653 = vst [vmem:[#allocation100_spill] sm:$0xff] %v7319_v19 }
 0x11f   :  { %8654 = vst [vmem:[#allocation101_spill] sm:$0xff] %v7328_v27 }
 0x120   :  { %1952 = vmatmul.bf16.vlgmr.msrb.gmra.mxu2 %v6956_v44  ;;  %1971 = vmatmul.bf16.vlgmr.msrb.gmra.mxu3 %v6958_v32  ;;  %8655 = vst [vmem:[#allocation102_spill] sm:$0xff] %v7331_v62  ;;  %v7336_v44 = vpop.f32.mrf.mxu3 }
 0x121   :  { %8656 = vst [vmem:[#allocation103_spill] sm:$0xff] %v7334_v45 }
 0x122   :  { %8657 = vst [vmem:[#allocation104_spill] sm:$0xff] %v7336_v44 }
 0x12a   :  { %1919 = vmatmul.bf16.gmra.mxu0 %v6826_v51 }
 0x12b   :  { %1938 = vmatmul.bf16.gmra.mxu1 %v6836_v4 }
 0x130   :  { %1957 = vmatmul.bf16.gmra.mxu2 %v7174_v24  ;;  %1976 = vmatmul.bf16.gmra.mxu3 %v7177_v60 }
 0x13c   :  { %v1763_v42 = vpop.f32.mrf.mxu0 }
 0x13d   :  { %v1782_v13 = vpop.f32.mrf.mxu1 }
 0x13e   :  { %v1783_v12 = vadd.f32 %v1782_v13, %v1763_v42 }
 0x144   :  { %v1765_v4 = vpop.f32.mrf.mxu0 }
 0x145   :  { %v1784_v5 = vpop.f32.mrf.mxu1 }
 0x146   :  { %v1785_v20 = vadd.f32 %v1784_v5, %v1765_v4 }
 0x147   :  { %v1801_v32 = vpop.f32.mrf.mxu2 }
 0x148   :  { %v1802_v30 = vadd.f32 %v1801_v32, %v1783_v12 }
 0x149   :  { %v1820_v51 = vpop.f32.mrf.mxu3 }
 0x14a   :  { %v1821_v17 = vadd.f32 %v1820_v51, %v1802_v30 }
 0x14f   :  { %v1803_v49 = vpop.f32.mrf.mxu2 }
 0x150   :  { %v1804_v22 = vadd.f32 %v1803_v49, %v1785_v20 }
 0x151   :  { %v1822_v21 = vpop.f32.mrf.mxu3 }
 0x152   :  { %v1823_v44 = vadd.f32 %v1822_v21, %v1804_v22 }
 0x159   :  { %v1768_v46 = vpop.f32.mrf.mxu0 }
 0x15a   :  { %v1787_v10 = vpop.f32.mrf.mxu1 }
 0x15b   :  { %v1788_v24 = vadd.f32 %v1787_v10, %v1768_v46 }
 0x161   :  { %v1770_v42 = vpop.f32.mrf.mxu0 }
 0x162   :  { %v1789_v13 = vpop.f32.mrf.mxu1 }
 0x168   :  { %v1806_v25 = vpop.f32.mrf.mxu2 }
 0x169   :  { %v1807_v60 = vadd.f32 %v1806_v25, %v1788_v24  ;;  %v1825_v11 = vpop.f32.mrf.mxu3 }
 0x16b   :  { %v7338_v6 = vadd.f32 %v1825_v11, %v1807_v60 }
 0x16d   :  { %v1839_v0 = vpop.f32.mrf.mxu0  ;;  %v1858_v9 = vpop.f32.mrf.mxu1 }
 0x16e   :  { %v1840_v45 = vadd.f32 %v1839_v0, %v1821_v17 }
 0x170   :  { %v1808_v37 = vpop.f32.mrf.mxu2  ;;  %v1859_v52 = vadd.f32 %v1858_v9, %v1840_v45 }
 0x171   :  { %v7340_v12 = vpop.f32.mrf.mxu3 }
 0x175   :  { %v1841_v30 = vpop.f32.mrf.mxu0  ;;  %v1860_v51 = vpop.f32.mrf.mxu1 }
 0x176   :  { %v1842_v28 = vadd.f32 %v1841_v30, %v1823_v44 }
 0x179   :  { %v1877_v32 = vpop.f32.mrf.mxu2  ;;  %v1896_v19 = vpop.f32.mrf.mxu3 }
 0x17a   :  { %v1897_v63 = vadd.f32 %v1896_v19, %v1877_v32 }
 0x181   :  { %v1879_v61 = vpop.f32.mrf.mxu2  ;;  %v1898_v2 = vpop.f32.mrf.mxu3 }
 0x182   :  { %v1899_v36 = vadd.f32 %v1898_v2, %v1879_v61 }
 0x187   :  { %v1844_v46 = vpop.f32.mrf.mxu0 }
 0x188   :  { %v7342_v10 = vpop.f32.mrf.mxu1 }
 0x189   :  { %v1882_v24 = vpop.f32.mrf.mxu2  ;;  %v1901_v60 = vpop.f32.mrf.mxu3 }
 0x18a   :  { %v1902_v4 = vadd.f32 %v1901_v60, %v1882_v24  ;;  %v5347_v24 = vld [vmem:[%s8439_s4 + $0x8] sm:$0xff] }
 0x18f   :  { %v1846_v25 = vpop.f32.mrf.mxu0 }
 0x190   :  { %v7344_v11 = vpop.f32.mrf.mxu1 }
 0x191   :  { %v1884_v40 = vpop.f32.mrf.mxu2  ;;  %v1903_v15 = vpop.f32.mrf.mxu3 }
 0x197   :  { %v1915_v18 = vpop.f32.mrf.mxu0 }
 0x198   :  { %v1934_v54 = vpop.f32.mrf.mxu1  ;;  %v1916_v38 = vadd.f32 %v1915_v18, %v1897_v63  ;;  %v1861_v63 = vadd.f32 %v1860_v51, %v1842_v28 }
 0x19a   :  { %v1935_v47 = vadd.f32 %v1934_v54, %v1916_v38  ;;  %v1790_v54 = vadd.f32 %v1789_v13, %v1770_v42 }
 0x19f   :  { %v1917_v33 = vpop.f32.mrf.mxu0 }
 0x1a0   :  { %v1936_v43 = vpop.f32.mrf.mxu1  ;;  %v1918_v27 = vadd.f32 %v1917_v33, %v1899_v36  ;;  %v1809_v33 = vadd.f32 %v1808_v37, %v1790_v54 }
 0x1a2   :  { %v1937_v8 = vadd.f32 %v1936_v43, %v1918_v27  ;;  %v1828_v28 = vadd.f32 %v7340_v12, %v1809_v33 }
 0x1a3   :  { %v1953_v58 = vpop.f32.mrf.mxu2  ;;  %v1972_v62 = vpop.f32.mrf.mxu3 }
 0x1a4   :  { %v1954_v35 = vadd.f32 %v1953_v58, %v1935_v47 }
 0x1a6   :  { %v1973_v34 = vadd.f32 %v1972_v62, %v1954_v35  ;;  %v1904_v35 = vadd.f32 %v1903_v15, %v1884_v40  ;;  %v1847_v40 = vadd.f32 %v1846_v25, %v1828_v28 }
 0x1a7   :  { %v1920_v56 = vpop.f32.mrf.mxu0 }
 0x1a8   :  { %v1982_v5 = vpack.c.bf16 %v1973_v34, %v1859_v52  ;;  %v1939_v2 = vpop.f32.mrf.mxu1  ;;  %v1921_v38 = vadd.f32 %v1920_v56, %v1902_v4  ;;  %v1845_v56 = vadd.f32 %v1844_v46, %v7338_v6  ;;  %v1866_v21 = vadd.f32 %v7344_v11, %v1847_v40  ;;  %v5348_v4 = vld [vmem:[%s8439_s4 + $0x10] sm:$0xff] }
 0x1aa   :  { %v2009_v36 = vunpack.c.l.b16 %v1982_v5  ;;  %v2010_v47 = vunpack.c.h.b16 %v1982_v5  ;;  %v1940_v27 = vadd.f32 %v1939_v2, %v1921_v38  ;;  %v1864_v44 = vadd.f32 %v7342_v10, %v1845_v56  ;;  %v5346_v10 = vld [vmem:[%s8439_s4] sm:$0xff] }
 0x1ab   :  { %v1955_v23 = vpop.f32.mrf.mxu2  ;;  %v1974_v18 = vpop.f32.mrf.mxu3 }
 0x1ac   :  { %v1956_v19 = vadd.f32 %v1955_v23, %v1937_v8 }
 0x1ae   :  { %v1975_v20 = vadd.f32 %v1974_v18, %v1956_v19 }
 0x1af   :  { %v1922_v0 = vpop.f32.mrf.mxu0 }
 0x1b0   :  { %v1983_v61 = vpack.c.bf16 %v1975_v20, %v1861_v63  ;;  %v1923_v52 = vadd.f32 %v1922_v0, %v1904_v35  ;;  %v1941_v15 = vpop.f32.mrf.mxu1 }
 0x1b2   :  { %v2011_v58 = vunpack.c.l.b16 %v1983_v61  ;;  %v2012_v22 = vunpack.c.h.b16 %v1983_v61  ;;  %v1942_v37 = vadd.f32 %v1941_v15, %v1923_v52 }
 0x1b3   :  { %v1958_v43 = vpop.f32.mrf.mxu2  ;;  %v1977_v8 = vpop.f32.mrf.mxu3 }
 0x1b4   :  { %v7346_v9 = vpack.c.b16 %v2011_v58, %v2009_v36  ;;  %v7348_v23 = vpack.c.b16 %v2012_v22, %v2010_v47  ;;  %v1959_v34 = vadd.f32 %v1958_v43, %v1940_v27  ;;  %v5349_v58 = vld [vmem:[%s8439_s4 + $0x18] sm:$0xff] }
 0x1b6   :  { %2023 = vrot.lane.b32.xlu1 %v7348_v23, %s5561_s3  ;;  %2021 = vrot.lane.b32.xlu0 %v7346_v9, %s5561_s3  ;;  %v1978_v62 = vadd.f32 %v1977_v8, %v1959_v34  ;;  %v5350_v34 = vld [vmem:[%s8439_s4 + $0x20] sm:$0xff] }
 0x1b8   :  { %v1984_v42 = vpack.c.bf16 %v1978_v62, %v1864_v44 }
 0x1ba   :  { %v2013_v32 = vunpack.c.l.b16 %v1984_v42  ;;  %v2014_v6 = vunpack.c.h.b16 %v1984_v42 }
 0x1bb   :  { %v1960_v45 = vpop.f32.mrf.mxu2  ;;  %v1979_v49 = vpop.f32.mrf.mxu3 }
 0x1bc   :  { %v1961_v17 = vadd.f32 %v1960_v45, %v1942_v37  ;;  %v5353_v45 = vld [vmem:[%s8439_s4 + $0x38] sm:$0xff] }
 0x1be   :  { %v1980_v13 = vadd.f32 %v1979_v49, %v1961_v17  ;;  %2154 = vrot.lane.b32.xlu1 %v7346_v9, %s5562_s28 }
 0x1c0   :  { %v1985_v12 = vpack.c.bf16 %v1980_v13, %v1866_v21  ;;  %v5351_v21 = vld [vmem:[%s8439_s4 + $0x28] sm:$0xff] }
 0x1c2   :  { %v2015_v30 = vunpack.c.l.b16 %v1985_v12  ;;  %v2016_v51 = vunpack.c.h.b16 %v1985_v12 }
 0x1c4   :  { %v2019_v46 = vpack.c.b16 %v2015_v30, %v2013_v32  ;;  %v7360_v25 = vpack.c.b16 %v2016_v51, %v2014_v6  ;;  %v5356_v51 = vld [vmem:[%s8439_s4 + $0x50] sm:$0xff] }
 0x1c6   :  { %2242 = vrot.lane.b32.xlu1 %v7360_v25, %s5563_s29  ;;  %2160 = vrot.lane.b32.xlu0 %v7360_v25, %s5562_s28 }
 0x1c7   :  { %2126 = vmatpush.bf16.msra.mxu3 %v7360_v25  ;;  %2025 = vrot.lane.b32.xlu2 %v2019_v46, %s5561_s3 }
 0x1c8   :  { %2107 = vmatpush.bf16.msra.mxu2 %v2019_v46 }
 0x1cb   :  { %2127 = vmatpush.bf16.msra.mxu3 %v7348_v23 }
 0x1cc   :  { %2108 = vmatpush.bf16.msra.mxu2 %v7346_v9 }
 0x1ce   :  { %2322 = vrot.lane.b32.xlu1 %v2019_v46, %s5564_s30  ;;  %2240 = vrot.lane.b32.xlu0 %v2019_v46, %s5563_s29 }
 0x1cf   :  { %2027 = vrot.lane.b32.xlu2 %v7360_v25, %s5561_s3  ;;  %4966 = vmatmul.msk.bf16.vlgmr.msra.gmra.mxu3 %vm2036_vm6, %v5346_v10 }
 0x1d0   :  { %4964 = vmatmul.msk.bf16.vlgmr.msra.gmra.mxu2 %vm2036_vm6, %v5346_v10 }
 0x1d6   :  { %2320 = vrot.lane.b32.xlu1 %v7348_v23, %s5564_s30  ;;  %2238 = vrot.lane.b32.xlu0 %v7348_v23, %s5563_s29 }
 0x1d7   :  { %2158 = vrot.lane.b32.xlu2 %v2019_v46, %s5562_s28 }
 0x1de   :  { %2400 = vrot.lane.b32.xlu1 %v7346_v9, %s5565_s8  ;;  %2318 = vrot.lane.b32.xlu0 %v7346_v9, %s5564_s30 }
 0x1df   :  { %2156 = vrot.lane.b32.xlu2 %v7348_v23, %s5562_s28  ;;  %4967 = vmatmul.msk.bf16.gmra.mxu3 %vm2036_vm6, %v5347_v24 }
 0x1e0   :  { %4965 = vmatmul.msk.bf16.gmra.mxu2 %vm2036_vm6, %v5347_v24  ;;  %v5354_v24 = vld [vmem:[%s8439_s4 + $0x40] sm:$0xff] }
 0x1e6   :  { %2488 = vrot.lane.b32.xlu1 %v7360_v25, %s5566_s1  ;;  %2406 = vrot.lane.b32.xlu0 %v7360_v25, %s5565_s8 }
 0x1e7   :  { %2236 = vrot.lane.b32.xlu2 %v7346_v9, %s5563_s29 }
 0x1ee   :  { %2568 = vrot.lane.b32.xlu1 %v2019_v46, %s5567_s9  ;;  %2486 = vrot.lane.b32.xlu0 %v2019_v46, %s5566_s1 }
 0x1ef   :  { %2324 = vrot.lane.b32.xlu2 %v7360_v25, %s5564_s30 }
 0x1f6   :  { %2566 = vrot.lane.b32.xlu1 %v7348_v23, %s5567_s9  ;;  %2484 = vrot.lane.b32.xlu0 %v7348_v23, %s5566_s1 }
 0x1f7   :  { %2404 = vrot.lane.b32.xlu2 %v2019_v46, %s5565_s8 }
 0x1fe   :  { %2646 = vrot.lane.b32.xlu1 %v7346_v9, %s5568_s10  ;;  %2564 = vrot.lane.b32.xlu0 %v7346_v9, %s5567_s9 }
 0x1ff   :  { %2402 = vrot.lane.b32.xlu2 %v7348_v23, %s5565_s8 }
 0x206   :  { %2734 = vrot.lane.b32.xlu1 %v7360_v25, %s5569_s11  ;;  %2652 = vrot.lane.b32.xlu0 %v7360_v25, %s5568_s10 }
 0x207   :  { %2482 = vrot.lane.b32.xlu2 %v7346_v9, %s5566_s1 }
 0x20e   :  { %2814 = vrot.lane.b32.xlu1 %v2019_v46, %s5570_s14  ;;  %2732 = vrot.lane.b32.xlu0 %v2019_v46, %s5569_s11 }
 0x20f   :  { %2570 = vrot.lane.b32.xlu2 %v7360_v25, %s5567_s9 }
 0x216   :  { %2812 = vrot.lane.b32.xlu1 %v7348_v23, %s5570_s14  ;;  %2730 = vrot.lane.b32.xlu0 %v7348_v23, %s5569_s11 }
 0x217   :  { %2650 = vrot.lane.b32.xlu2 %v2019_v46, %s5568_s10 }
 0x21e   :  { %2810 = vrot.lane.b32.xlu0 %v7346_v9, %s5570_s14 }
 0x21f   :  { %2648 = vrot.lane.b32.xlu2 %v7348_v23, %s5568_s10 }
 0x221   :  { %v2026_v11 = vpop.permute.xlu2 %2025 }
 0x227   :  { %2728 = vrot.lane.b32.xlu2 %v7346_v9, %s5569_s11  ;;  %v5352_v9 = vld [vmem:[%s8439_s4 + $0x30] sm:$0xff] }
 0x228   :  { %v2024_v60 = vpop.permute.xlu1 %2023  ;;  %v2022_v63 = vpop.permute.xlu0 %2021 }
 0x229   :  { %v2028_v19 = vpop.permute.xlu2 %2027  ;;  %v2030_v5 = vsel %vm2029_vm7, %v2022_v63, %v2024_v60 }
 0x22a   :  { %v2031_v18 = vsel %vm2029_vm7, %v2026_v11, %v2028_v19  ;;  %2068 = vmatpush.bf16.msra.mxu1 %v2028_v19 }
 0x22b   :  { %2049 = vmatpush.bf16.msra.mxu0 %v2031_v18 }
 0x22e   :  { %2069 = vmatpush.bf16.msra.mxu1 %v2024_v60 }
 0x22f   :  { %2816 = vrot.lane.b32.xlu2 %v7360_v25, %s5570_s14  ;;  %2050 = vmatpush.bf16.msra.mxu0 %v2030_v5  ;;  %v5357_v5 = vld [vmem:[%s8439_s4 + $0x58] sm:$0xff] }
 0x230   :  { %v2155_v20 = vpop.permute.xlu1 %2154 }
 0x231   :  { %4954 = vmatmul.msk.bf16.vlgmr.msra.gmra.mxu1 %vm2036_vm6, %v5348_v4  ;;  %v2159_v2 = vpop.permute.xlu2 %2158 }
 0x232   :  { %4952 = vmatmul.msk.bf16.vlgmr.msra.gmra.mxu0 %vm2036_vm6, %v5348_v4 }
 0x238   :  { %v2243_v38 = vpop.permute.xlu1 %2242  ;;  %v2161_v61 = vpop.permute.xlu0 %2160 }
 0x239   :  { %v2164_v54 = vsel %vm2162_vm8, %v2159_v2, %v2161_v61  ;;  %v2157_v36 = vpop.permute.xlu2 %2156  ;;  %2200 = vmatpush.bf16.msrb.mxu1 %v2161_v61  ;;  %2282 = vmatpush.bf16.msrb.mxu3 %v2243_v38  ;;  %v5355_v61 = vld [vmem:[%s8439_s4 + $0x48] sm:$0xff] }
 0x23a   :  { %2181 = vmatpush.bf16.msrb.mxu0 %v2164_v54  ;;  %v2163_v47 = vsel %vm2162_vm8, %v2155_v20, %v2157_v36 }
 0x23d   :  { %2201 = vmatpush.bf16.msrb.mxu1 %v2157_v36 }
 0x23e   :  { %2182 = vmatpush.bf16.msrb.mxu0 %v2163_v47 }
 0x240   :  { %v2323_v22 = vpop.permute.xlu1 %2322  ;;  %v2241_v33 = vpop.permute.xlu0 %2240 }
 0x241   :  { %v2246_v0 = vsel %vm2244_vm9, %v2241_v33, %v2243_v38  ;;  %4955 = vmatmul.msk.bf16.gmra.mxu1 %vm2036_vm6, %v5349_v58  ;;  %v2237_v43 = vpop.permute.xlu2 %2236 }
 0x242   :  { %4953 = vmatmul.msk.bf16.gmra.mxu0 %vm2036_vm6, %v5349_v58  ;;  %2263 = vmatpush.bf16.msrb.mxu2 %v2246_v0 }
 0x248   :  { %v2321_v35 = vpop.permute.xlu1 %2320  ;;  %v2239_v27 = vpop.permute.xlu0 %2238 }
 0x249   :  { %v2325_v23 = vpop.permute.xlu2 %2324  ;;  %2283 = vmatpush.bf16.msrb.mxu3 %v2239_v27  ;;  %v2245_v8 = vsel %vm2244_vm9, %v2237_v43, %v2239_v27  ;;  %v5358_v43 = vld [vmem:[%s8439_s4 + $0x60] sm:$0xff] }
 0x24a   :  { %v2328_v52 = vsel %vm2326_vm10, %v2323_v22, %v2325_v23  ;;  %2364 = vmatpush.bf16.msra.mxu1 %v2325_v23  ;;  %2264 = vmatpush.bf16.msrb.mxu2 %v2245_v8  ;;  %v5360_v22 = vld [vmem:[%s8439_s4 + $0x70] sm:$0xff] }
 0x24b   :  { %2345 = vmatpush.bf16.msra.mxu0 %v2328_v52  ;;  %v8660_v52 = vld [vmem:[#allocation18_spill] sm:$0xff] }
 0x24c   :  { %4998 = vmatmul.msk.bf16.vlgmr.msrb.gmra.mxu3 %vm2036_vm6, %v5352_v9 }
 0x24d   :  { %4996 = vmatmul.msk.bf16.vlgmr.msrb.gmra.mxu2 %vm2036_vm6, %v5352_v9 }
 0x24e   :  { %2365 = vmatpush.bf16.msra.mxu1 %v2321_v35 }
 0x250   :  { %v2401_v28 = vpop.permute.xlu1 %2400  ;;  %v2319_v56 = vpop.permute.xlu0 %2318 }
 0x251   :  { %4982 = vmatmul.msk.bf16.vlgmr.msrb.gmra.mxu1 %vm2036_vm6, %v5350_v34  ;;  %v2405_v15 = vpop.permute.xlu2 %2404  ;;  %v2327_v40 = vsel %vm2326_vm10, %v2319_v56, %v2321_v35 }
 0x252   :  { %4980 = vmatmul.msk.bf16.vlgmr.msrb.gmra.mxu0 %vm2036_vm6, %v5350_v34 }
 0x253   :  { %2346 = vmatpush.bf16.msra.mxu0 %v2327_v40 }
 0x258   :  { %v2489_v37 = vpop.permute.xlu1 %2488  ;;  %v2407_v62 = vpop.permute.xlu0 %2406 }
 0x259   :  { %v2410_v44 = vsel %vm2408_vm11, %v2405_v15, %v2407_v62  ;;  %v2403_v17 = vpop.permute.xlu2 %2402  ;;  %2446 = vmatpush.bf16.msra.mxu3 %v2407_v62  ;;  %2528 = vmatpush.bf16.msrb.mxu1 %v2489_v37  ;;  %v8663_v62 = vld [vmem:[#allocation26_spill] sm:$0xff] }
 0x25a   :  { %2427 = vmatpush.bf16.msra.mxu2 %v2410_v44  ;;  %v2409_v49 = vsel %vm2408_vm11, %v2401_v28, %v2403_v17  ;;  %v8662_v28 = vld [vmem:[#allocation22_spill] sm:$0xff] }
 0x25c   :  { %4999 = vmatmul.msk.bf16.gmra.mxu3 %vm2036_vm6, %v5353_v45 }
 0x25d   :  { %4997 = vmatmul.msk.bf16.gmra.mxu2 %vm2036_vm6, %v5353_v45  ;;  %2447 = vmatpush.bf16.msra.mxu3 %v2403_v17  ;;  %v8664_v45 = vld [vmem:[#allocation47_spill] sm:$0xff] }
 0x25e   :  { %2428 = vmatpush.bf16.msra.mxu2 %v2409_v49  ;;  %v7573_v44 = vadd.f32 %v8664_v45, %v8663_v62  ;;  %v8665_v49 = vld [vmem:[#allocation28_spill] sm:$0xff] }
 0x260   :  { %v2569_v42 = vpop.permute.xlu1 %2568  ;;  %v2487_v13 = vpop.permute.xlu0 %2486  ;;  %vm800_vm3 = vcmp.gt.f32.partialorder %v7573_v44, 0.0 }
 0x261   :  { %v2492_v12 = vsel %vm2490_vm12, %v2487_v13, %v2489_v37  ;;  %4983 = vmatmul.msk.bf16.gmra.mxu1 %vm2036_vm6, %v5351_v21  ;;  %v2483_v32 = vpop.permute.xlu2 %2482  ;;  %v8667_v13 = vld [vmem:[#allocation6_spill] sm:$0xff] }
 0x262   :  { %4981 = vmatmul.msk.bf16.gmra.mxu0 %vm2036_vm6, %v5351_v21  ;;  %v8666_v21 = vld [vmem:[#allocation50_spill] sm:$0xff] }
 0x263   :  { %2509 = vmatpush.bf16.msrb.mxu0 %v2492_v12 }
 0x268   :  { %v2567_v6 = vpop.permute.xlu1 %2566  ;;  %v2485_v30 = vpop.permute.xlu0 %2484 }
 0x269   :  { %v2571_v46 = vpop.permute.xlu2 %2570  ;;  %2529 = vmatpush.bf16.msrb.mxu1 %v2485_v30  ;;  %v2491_v25 = vsel %vm2490_vm12, %v2483_v32, %v2485_v30  ;;  %v8668_v32 = vld [vmem:[#allocation5_spill] sm:$0xff] }
 0x26a   :  { %v2574_v10 = vsel %vm2572_vm13, %v2569_v42, %v2571_v46  ;;  %2610 = vmatpush.bf16.msrb.mxu3 %v2571_v46  ;;  %2510 = vmatpush.bf16.msrb.mxu0 %v2491_v25  ;;  %v7581_v42 = vadd.f32 %v8666_v21, %v8663_v62  ;;  %v8670_v46 = vld [vmem:[#allocation32_spill] sm:$0xff]  ;;  %v8690_v21 = vld [vmem:[#allocation51_spill] sm:$0xff] }
 0x26b   :  { %2591 = vmatpush.bf16.msrb.mxu2 %v2574_v10 }
 0x26c   :  { %5030 = vmatmul.msk.bf16.vlgmr.msra.gmra.mxu3 %vm2036_vm6, %v5356_v51  ;;  %v849_v25 = vmin.f32 %v7581_v42, 0.0  ;;  %vm801_vm4 = vcmp.gt.f32.partialorder %v7581_v42, 0.0 }
 0x26d   :  { %5028 = vmatmul.msk.bf16.vlgmr.msra.gmra.mxu2 %vm2036_vm6, %v5356_v51  ;;  %v848_v51 = vmin.f32 %v7573_v44, 0.0 }
 0x26e   :  { %2611 = vmatpush.bf16.msrb.mxu3 %v2567_v6 }
 0x270   :  { %v2647_v11 = vpop.permute.xlu1 %2646  ;;  %v2565_v60 = vpop.permute.xlu0 %2564 }
 0x271   :  { %5014 = vmatmul.msk.bf16.vlgmr.msra.gmra.mxu1 %vm2036_vm6, %v5354_v24  ;;  %v2651_v19 = vpop.permute.xlu2 %2650  ;;  %v2573_v18 = vsel %vm2572_vm13, %v2565_v60, %v2567_v6  ;;  %v8669_v6 = vld [vmem:[#allocation27_spill] sm:$0xff] }
 0x272   :  { %5012 = vmatmul.msk.bf16.vlgmr.msra.gmra.mxu0 %vm2036_vm6, %v5354_v24  ;;  %2592 = vmatpush.bf16.msrb.mxu2 %v2573_v18  ;;  %v8671_v24 = vld [vmem:[#allocation8_spill] sm:$0xff]  ;;  %v8672_v18 = vld [vmem:[#allocation7_spill] sm:$0xff] }
 0x278   :  { %v2735_v63 = vpop.permute.xlu1 %2734  ;;  %v2653_v4 = vpop.permute.xlu0 %2652 }
 0x279   :  { %v2656_v20 = vsel %vm2654_vm14, %v2651_v19, %v2653_v4  ;;  %2692 = vmatpush.bf16.msra.mxu1 %v2653_v4  ;;  %2774 = vmatpush.bf16.msra.mxu3 %v2735_v63  ;;  %v2649_v2 = vpop.permute.xlu2 %2648  ;;  %v5365_v4 = vld [vmem:[%s8439_s4 + $0x98] sm:$0xff] }
 0x27a   :  { %2673 = vmatpush.bf16.msra.mxu0 %v2656_v20  ;;  %v2655_v38 = vsel %vm2654_vm14, %v2647_v11, %v2649_v2  ;;  %v8674_v20 = vld [vmem:[#allocation36_spill] sm:$0xff] }
 0x27c   :  { %5031 = vmatmul.msk.bf16.gmra.mxu3 %vm2036_vm6, %v5357_v5 }
 0x27d   :  { %5029 = vmatmul.msk.bf16.gmra.mxu2 %vm2036_vm6, %v5357_v5  ;;  %2693 = vmatpush.bf16.msra.mxu1 %v2649_v2  ;;  %v938_v5 = vmul.f32 1.442695, %v848_v51  ;;  %v940_v2 = vmul.f32 1.442695, %v849_v25 }
 0x27e   :  { %2674 = vmatpush.bf16.msra.mxu0 %v2655_v38 }
 0x280   :  { %v2733_v54 = vpop.permute.xlu0 %2732  ;;  %v2815_v0 = vpop.permute.xlu1 %2814 }
 0x281   :  { %v2738_v36 = vsel %vm2736_vm15, %v2733_v54, %v2735_v63  ;;  %5015 = vmatmul.msk.bf16.gmra.mxu1 %vm2036_vm6, %v5355_v61  ;;  %v2729_v47 = vpop.permute.xlu2 %2728  ;;  %v8673_v63 = vld [vmem:[#allocation31_spill] sm:$0xff] }
 0x282   :  { %5013 = vmatmul.msk.bf16.gmra.mxu0 %vm2036_vm6, %v5355_v61  ;;  %2755 = vmatpush.bf16.msra.mxu2 %v2738_v36  ;;  %v8675_v61 = vld [vmem:[#allocation10_spill] sm:$0xff] }
 0x288   :  { %v2731_v58 = vpop.permute.xlu0 %2730  ;;  %v2813_v23 = vpop.permute.xlu1 %2812 }
 0x289   :  { %2775 = vmatpush.bf16.msra.mxu3 %v2731_v58  ;;  %v2737_v33 = vsel %vm2736_vm15, %v2729_v47, %v2731_v58  ;;  %v2817_v35 = vpop.permute.xlu2 %2816  ;;  %v8676_v58 = vld [vmem:[#allocation9_spill] sm:$0xff] }
 0x28a   :  { %2756 = vmatpush.bf16.msra.mxu2 %v2737_v33  ;;  %v2820_v27 = vsel %vm2818_vm0, %v2815_v0, %v2817_v35  ;;  %v5363_v33 = vld [vmem:[%s8439_s4 + $0x88] sm:$0xff] }
 0x28b   :  { %v8678_v0 = vld [vmem:[#allocation41_spill] sm:$0xff] }
 0x28c   :  { %5062 = vmatmul.msk.bf16.vlgmr.msrb.gmra.mxu3 %vm2036_vm6, %v5360_v22 }
 0x28d   :  { %5060 = vmatmul.msk.bf16.vlgmr.msrb.gmra.mxu2 %vm2036_vm6, %v5360_v22  ;;  %3155 = vmatpush.bf16.msrb.mxu3 %v6140_v50  ;;  %v5361_v50 = vld [vmem:[%s8439_s4 + $0x78] sm:$0xff] }
 0x28e   :  { %3136 = vmatpush.bf16.msrb.mxu2 %v6135_v48  ;;  %v8677_v22 = vld [vmem:[#allocation35_spill] sm:$0xff] }
 0x290   :  { %v2811_v9 = vpop.permute.xlu0 %2810 }
 0x291   :  { %5046 = vmatmul.msk.bf16.vlgmr.msrb.gmra.mxu1 %vm2036_vm6, %v5358_v43  ;;  %3156 = vmatpush.bf16.msrb.mxu3 %v6158_v55  ;;  %v2819_v48 = vsel %vm2818_vm0, %v2811_v9, %v2813_v23  ;;  %v7539_v55 = vadd.f32 %v6649_v7, %v6404_v31 }
 0x292   :  { %2856 = vmatpush.bf16.msrb.mxu1 %v2817_v35  ;;  %5044 = vmatmul.msk.bf16.vlgmr.msrb.gmra.mxu0 %vm2036_vm6, %v5358_v43  ;;  %v8679_v35 = vld [vmem:[#allocation12_spill] sm:$0xff] }
 0x293   :  { %2837 = vmatpush.bf16.msrb.mxu0 %v2820_v27  ;;  %3137 = vmatpush.bf16.msrb.mxu2 %v6153_v53  ;;  %v5359_v53 = vld [vmem:[%s8439_s4 + $0x68] sm:$0xff]  ;;  %vm776_vm1 = vcmp.gt.f32.partialorder %v7539_v55, 0.0 }
 0x295   :  { %3157 = vmatpush.bf16.msrb.mxu3 %v6194_v3  ;;  %v824_v3 = vmin.f32 %v7539_v55, 0.0 }
 0x296   :  { %2857 = vmatpush.bf16.msrb.mxu1 %v2813_v23 }
 0x297   :  { %2838 = vmatpush.bf16.msrb.mxu0 %v2819_v48  ;;  %3138 = vmatpush.bf16.msrb.mxu2 %v6188_v1  ;;  %v7545_v1 = vadd.f32 %v6654_v59, %v6404_v31  ;;  %v890_v7 = vmul.f32 1.442695, %v824_v3  ;;  %v8659_v59 = vld [vmem:[#allocation19_spill] sm:$0xff]  ;;  %v8682_v3 = vld [vmem:[#allocation76_spill] sm:$0xff] }
 0x299   :  { %3158 = vmatpush.bf16.msrb.mxu3 %v6230_v16  ;;  %v2129_v16 = vpop.f32.mrf.mxu3  ;;  %5456 = vpow2.f32 %v890_v7  ;;  %vm777_vm2 = vcmp.gt.f32.partialorder %v7545_v1, 0.0 }
 0x29b   :  { %3139 = vmatpush.bf16.msrb.mxu2 %v6224_v14  ;;  %v825_v14 = vmin.f32 %v7545_v1, 0.0 }
 0x29c   :  { %5063 = vmatmul.msk.bf16.gmra.mxu3 %vm2036_vm6, %v5361_v50 }
 0x29d   :  { %5061 = vmatmul.msk.bf16.gmra.mxu2 %vm2036_vm6, %v5361_v50  ;;  %3159 = vmatpush.bf16.msrb.mxu3 %v6266_v29  ;;  %v8658_v29 = vld [vmem:[#allocation15_spill] sm:$0xff]  ;;  %v892_v8 = vmul.f32 1.442695, %v825_v14  ;;  %v7621_v14 = vadd.f32 %v8682_v3, %v6404_v31 }
 0x29e   :  { %v8680_v50 = vld [vmem:[#allocation11_spill] sm:$0xff] }
 0x29f   :  { %3140 = vmatpush.bf16.msrb.mxu2 %v6260_v26  ;;  %v2110_v26 = vpop.f32.mrf.mxu2  ;;  %5458 = vpow2.f32 %v892_v8  ;;  %v5457_v12 = vpop.eup %5456  ;;  %vm780_vm5 = vcmp.gt.f32.partialorder %v7621_v14, 0.0 }
 0x2a0   :  { %v4526_v11 = vadd.f32 -1.0, %v5457_v12  ;;  %5460 = vpow2.f32 %v938_v5 }
 0x2a1   :  { %5047 = vmatmul.msk.bf16.gmra.mxu1 %vm2036_vm6, %v5359_v53  ;;  %3160 = vmatpush.bf16.msrb.mxu3 %v6302_v41  ;;  %v5364_v41 = vld [vmem:[%s8439_s4 + $0x90] sm:$0xff]  ;;  %v7569_v37 = vpop.f32.mrf.mxu3  ;;  %5462 = vpow2.f32 %v940_v2 }
 0x2a2   :  { %5045 = vmatmul.msk.bf16.gmra.mxu0 %vm2036_vm6, %v5359_v53  ;;  %v1016_v54 = vmul.f32 0.001, %v4526_v11  ;;  %v8681_v53 = vld [vmem:[#allocation40_spill] sm:$0xff] }
 0x2a3   :  { %3141 = vmatpush.bf16.msrb.mxu2 %v6297_v39  ;;  %v5362_v39 = vld [vmem:[%s8439_s4 + $0x80] sm:$0xff] }
 0x2a4   :  { %v1064_v27 = vsel %vm776_vm1, %v7539_v55, %v1016_v54  ;;  %v8692_v11 = vld [vmem:[#allocation16_spill] sm:$0xff] }
 0x2a5   :  { %3161 = vmatpush.bf16.msrb.mxu3 %v6340_v57  ;;  %v8661_v57 = vld [vmem:[#allocation23_spill] sm:$0xff]  ;;  %v5459_v30 = vpop.eup %5458 }
 0x2a6   :  { %v4527_v60 = vadd.f32 -1.0, %v5459_v30  ;;  %v5461_v7 = vpop.eup %5460  ;;  %v8691_v30 = vld [vmem:[#allocation17_spill] sm:$0xff] }
 0x2a7   :  { %3142 = vmatpush.bf16.msrb.mxu2 %v8658_v29  ;;  %v7576_v17 = vpop.f32.mrf.mxu2  ;;  %v4550_v51 = vadd.f32 -1.0, %v5461_v7  ;;  %v8702_v7 = vld [vmem:[#allocation24_spill] sm:$0xff] }
 0x2a8   :  { %v1017_v36 = vmul.f32 0.001, %v4527_v60  ;;  %v8693_v60 = vld [vmem:[#allocation49_spill] sm:$0xff] }
 0x2a9   :  { %3162 = vmatpush.bf16.msrb.mxu3 %v8659_v59  ;;  %v2134_v38 = vpop.f32.mrf.mxu3  ;;  %v8686_v59 = vld [vmem:[#allocation65_spill] sm:$0xff] }
 0x2aa   :  { %v1065_v9 = vsel %vm777_vm2, %v7545_v1, %v1017_v36  ;;  %v8684_v1 = vld [vmem:[#allocation77_spill] sm:$0xff]  ;;  %v7635_v8 = vadd.f32 %v8686_v59, %v6404_v31 }
 0x2ab   :  { %3143 = vmatpush.bf16.msrb.mxu2 %v8660_v52  ;;  %v1103_v55 = vpack.c.bf16 %v1065_v9, %v1064_v27  ;;  %v7629_v29 = vadd.f32 %v8684_v1, %v6404_v31  ;;  %v8687_v52 = vld [vmem:[#allocation13_spill] sm:$0xff]  ;;  %v8699_v9 = vld [vmem:[#allocation60_spill] sm:$0xff] }
 0x2ac   :  { %5094 = vmatmul.msk.bf16.vlgmr.msra.gmra.mxu3 %vm2036_vm6, %v5364_v41  ;;  %v826_v25 = vmin.f32 %v7635_v8, 0.0  ;;  %v8696_v36 = vld [vmem:[#allocation21_spill] sm:$0xff]  ;;  %vm778_vm2 = vcmp.gt.f32.partialorder %v7635_v8, 0.0 }
 0x2ad   :  { %5092 = vmatmul.msk.bf16.vlgmr.msra.gmra.mxu2 %vm2036_vm6, %v5364_v41  ;;  %3231 = vmatpush.bf16.msra.mxu3 %v8661_v57  ;;  %v8685_v41 = vld [vmem:[#allocation14_spill] sm:$0xff]  ;;  %v5463_v57 = vpop.eup %5462  ;;  %v3095_v12 = vunpack.c.h.b16 %v1103_v55  ;;  %v5366_v27 = vld [vmem:[%s8439_s4 + $0xa0] sm:$0xff]  ;;  %vm781_vm1 = vcmp.gt.f32.partialorder %v7629_v29, 0.0 }
 0x2ae   :  { %v2071_v34 = vpop.f32.mrf.mxu1 }
 0x2af   :  { %3212 = vmatpush.bf16.msra.mxu2 %v8662_v28  ;;  %v7565_v56 = vadd.f32 %v2129_v16, %v2071_v34  ;;  %v2052_v15 = vpop.f32.mrf.mxu0  ;;  %v2115_v47 = vpop.f32.mrf.mxu2  ;;  %v8689_v34 = vld [vmem:[#allocation66_spill] sm:$0xff] }
 0x2b0   :  { %v7567_v40 = vadd.f32 %v2110_v26, %v2052_v15  ;;  %v8683_v26 = vld [vmem:[#allocation45_spill] sm:$0xff]  ;;  %v7641_v28 = vadd.f32 %v8689_v34, %v6404_v31  ;;  %v828_v15 = vmin.f32 %v7621_v14, 0.0 }
 0x2b1   :  { %5078 = vmatmul.msk.bf16.vlgmr.msra.gmra.mxu1 %vm2036_vm6, %v5362_v39  ;;  %3232 = vmatpush.bf16.msra.mxu3 %v8665_v49  ;;  %v2136_v45 = vpop.f32.mrf.mxu3 }
 0x2b2   :  { %5076 = vmatmul.msk.bf16.vlgmr.msra.gmra.mxu0 %vm2036_vm6, %v5362_v39  ;;  %3193 = vmatpush.bf16.msra.mxu1 %v8667_v13  ;;  %v8688_v39 = vld [vmem:[#allocation44_spill] sm:$0xff]  ;;  %v3094_v13 = vunpack.c.l.b16 %v1103_v55  ;;  %v898_v5 = vmul.f32 1.442695, %v828_v15 }
 0x2b3   :  { %3174 = vmatpush.bf16.msra.mxu0 %v8668_v32  ;;  %3213 = vmatpush.bf16.msra.mxu2 %v8669_v6  ;;  %v829_v32 = vmin.f32 %v7629_v29, 0.0  ;;  %v8705_v15 = vld [vmem:[#allocation104_spill] sm:$0xff] }
 0x2b4   :  { %5464 = vpow2.f32 %v898_v5  ;;  %v8711_v5 = vld [vmem:[#allocation34_spill] sm:$0xff] }
 0x2b5   :  { %3233 = vmatpush.bf16.msra.mxu3 %v8670_v46  ;;  %v4551_v46 = vadd.f32 -1.0, %v5463_v57  ;;  %v900_v54 = vmul.f32 1.442695, %v829_v32 }
 0x2b6   :  { %v7590_v10 = vpop.f32.mrf.mxu1  ;;  %3194 = vmatpush.bf16.msra.mxu1 %v8671_v24 }
 0x2b7   :  { %v7593_v19 = vpop.f32.mrf.mxu0  ;;  %3175 = vmatpush.bf16.msra.mxu0 %v8672_v18  ;;  %3214 = vmatpush.bf16.msra.mxu2 %v8673_v63  ;;  %v2117_v49 = vpop.f32.mrf.mxu2  ;;  %v8694_v18 = vld [vmem:[#allocation37_spill] sm:$0xff]  ;;  %5466 = vpow2.f32 %v900_v54 }
 0x2b8   :  { %v3089_v63 = vunpack.c.h.b16 %v8694_v18  ;;  %v3088_v2 = vunpack.c.l.b16 %v8694_v18  ;;  %v2113_v18 = vadd.f32 %v7576_v17, %v7593_v19  ;;  %v8715_v19 = vld [vmem:[#allocation58_spill] sm:$0xff] }
 0x2b9   :  { %3234 = vmatpush.bf16.msra.mxu3 %v8674_v20 }
 0x2ba   :  { %3195 = vmatpush.bf16.msra.mxu1 %v8675_v61  ;;  %v7658_v61 = vpack.c.b16 %v3095_v12, %v3089_v63 }
 0x2bb   :  { %3176 = vmatpush.bf16.msra.mxu0 %v8676_v58  ;;  %3215 = vmatpush.bf16.msra.mxu2 %v8677_v22  ;;  %v1040_v58 = vmul.f32 0.001, %v4550_v51  ;;  %v1041_v22 = vmul.f32 0.001, %v4551_v46  ;;  %v2132_v51 = vadd.f32 %v7569_v37, %v7590_v10  ;;  %v8709_v46 = vld [vmem:[#allocation70_spill] sm:$0xff] }
 0x2bc   :  { %5095 = vmatmul.msk.bf16.gmra.mxu3 %vm2036_vm6, %v5365_v4 }
 0x2bd   :  { %5093 = vmatmul.msk.bf16.gmra.mxu2 %vm2036_vm6, %v5365_v4  ;;  %3235 = vmatpush.bf16.msra.mxu3 %v8678_v0  ;;  %v827_v4 = vmin.f32 %v7641_v28, 0.0  ;;  %v8697_v0 = vld [vmem:[#allocation20_spill] sm:$0xff]  ;;  %v1088_v3 = vsel %vm800_vm3, %v7573_v44, %v1040_v58  ;;  %vm779_vm3 = vcmp.gt.f32.partialorder %v7641_v28, 0.0 }
 0x2be   :  { %v2076_v43 = vpop.f32.mrf.mxu1  ;;  %3196 = vmatpush.bf16.msra.mxu1 %v8679_v35  ;;  %v8704_v44 = vld [vmem:[#allocation64_spill] sm:$0xff] }
 0x2bf   :  { %v7615_v23 = vadd.f32 %v2134_v38, %v2076_v43  ;;  %v2057_v48 = vpop.f32.mrf.mxu0  ;;  %3177 = vmatpush.bf16.msra.mxu0 %v8680_v50  ;;  %3216 = vmatpush.bf16.msra.mxu2 %v8681_v53  ;;  %v8695_v38 = vld [vmem:[#allocation55_spill] sm:$0xff]  ;;  %v8698_v43 = vld [vmem:[#allocation54_spill] sm:$0xff]  ;;  %v896_v35 = vmul.f32 1.442695, %v827_v4  ;;  %v8700_v50 = vld [vmem:[#allocation25_spill] sm:$0xff] }
 0x2c0   :  { %v7623_v16 = vadd.f32 %v2115_v47, %v2057_v48  ;;  %v7661_v47 = vpack.c.b16 %v3094_v13, %v3088_v2  ;;  %v8701_v53 = vld [vmem:[#allocation59_spill] sm:$0xff] }
 0x2c1   :  { %5079 = vmatmul.msk.bf16.gmra.mxu1 %vm2036_vm6, %v5363_v33  ;;  %3236 = vmatpush.bf16.msra.mxu3 %v8683_v26  ;;  %v1089_v26 = vsel %vm801_vm4, %v7581_v42, %v1041_v22  ;;  %v5465_v42 = vpop.eup %5464  ;;  %v8708_v13 = vld [vmem:[#allocation63_spill] sm:$0xff]  ;;  %v8713_v22 = vld [vmem:[#allocation33_spill] sm:$0xff] }
 0x2c2   :  { %5077 = vmatmul.msk.bf16.gmra.mxu0 %vm2036_vm6, %v5363_v33  ;;  %3197 = vmatpush.bf16.msra.mxu1 %v8685_v41  ;;  %v894_v33 = vmul.f32 1.442695, %v826_v25  ;;  %v5467_v12 = vpop.eup %5466 }
 0x2c3   :  { %3178 = vmatpush.bf16.msra.mxu0 %v8687_v52  ;;  %3217 = vmatpush.bf16.msra.mxu2 %v8688_v39  ;;  %v8703_v39 = vld [vmem:[#allocation103_spill] sm:$0xff]  ;;  %v4531_v2 = vadd.f32 -1.0, %v5467_v12 }
 0x2c4   :  { %5468 = vpow2.f32 %v894_v33  ;;  %v7682_v57 = vadd.f32 %v8703_v39, %v8663_v62  ;;  %v8714_v33 = vld [vmem:[#allocation69_spill] sm:$0xff]  ;;  %v8718_v39 = vld [vmem:[#allocation38_spill] sm:$0xff]  ;;  %v8721_v12 = vld [vmem:[#allocation43_spill] sm:$0xff] }
 0x2c5   :  { %3237 = vmatpush.bf16.msra.mxu3 %v8690_v21  ;;  %5470 = vpow2.f32 %v896_v35  ;;  %v8707_v21 = vld [vmem:[#allocation29_spill] sm:$0xff]  ;;  %v3101_v35 = vunpack.c.h.b16 %v8715_v19 }
 0x2c6   :  { %v2078_v6 = vpop.f32.mrf.mxu1  ;;  %3198 = vmatpush.bf16.msra.mxu1 %v8691_v30  ;;  %v852_v30 = vmin.f32 %v7682_v57, 0.0  ;;  %vm804_vm4 = vcmp.gt.f32.partialorder %v7682_v57, 0.0 }
 0x2c7   :  { %v7648_v24 = vadd.f32 %v2136_v45, %v2078_v6  ;;  %v2059_v31 = vpop.f32.mrf.mxu0  ;;  %3179 = vmatpush.bf16.msra.mxu0 %v8692_v11  ;;  %3218 = vmatpush.bf16.msra.mxu2 %v8693_v60  ;;  %v7690_v45 = vadd.f32 %v8705_v15, %v8663_v62  ;;  %v4530_v6 = vadd.f32 -1.0, %v5465_v42  ;;  %v5367_v42 = vld [vmem:[%s8439_s4 + $0xa8] sm:$0xff] }
 0x2c8   :  { %v7654_v20 = vadd.f32 %v2117_v49, %v2059_v31  ;;  %v8710_v31 = vld [vmem:[#allocation101_spill] sm:$0xff] }
 0x2c9   :  { %3238 = vmatpush.bf16.msra.mxu3 %v8695_v38  ;;  %v7704_v11 = vadd.f32 %v8710_v31, %v8663_v62  ;;  %v853_v60 = vmin.f32 %v7690_v45, 0.0  ;;  %v8712_v38 = vld [vmem:[#allocation102_spill] sm:$0xff] }
 0x2ca   :  { %3199 = vmatpush.bf16.msra.mxu1 %v8696_v36  ;;  %v5469_v32 = vpop.eup %5468  ;;  %v7712_v37 = vadd.f32 %v8712_v38, %v8663_v62  ;;  %v3100_v62 = vunpack.c.l.b16 %v8715_v19  ;;  %v8722_v31 = vld [vmem:[#allocation42_spill] sm:$0xff] }
 0x2cb   :  { %3180 = vmatpush.bf16.msra.mxu0 %v8697_v0  ;;  %3219 = vmatpush.bf16.msra.mxu2 %v8698_v43  ;;  %v5471_v25 = vpop.eup %5470  ;;  %v4528_v0 = vadd.f32 -1.0, %v5469_v32 }
 0x2cc   :  { %3163 = vmatmul.bf16.vlgmr.msrb.gmra.mxu3 %v7658_v61 }
 0x2cd   :  { %3144 = vmatmul.bf16.vlgmr.msrb.gmra.mxu2 %v7661_v47  ;;  %3307 = vmatpush.bf16.msrb.mxu3 %v8699_v9  ;;  %v946_v9 = vmul.f32 1.442695, %v852_v30  ;;  %v1018_v15 = vmul.f32 0.001, %v4528_v0 }
 0x2ce   :  { %v2203_v48 = vpop.f32.mrf.mxu1  ;;  %3200 = vmatpush.bf16.msra.mxu1 %v8700_v50  ;;  %v8716_v50 = vld [vmem:[#allocation75_spill] sm:$0xff] }
 0x2cf   :  { %3288 = vmatpush.bf16.msrb.mxu2 %v8701_v53  ;;  %v2214_v55 = vadd.f32 %v2203_v48, %v7565_v56  ;;  %v2184_v1 = vpop.f32.mrf.mxu0  ;;  %v2285_v41 = vpop.f32.mrf.mxu3  ;;  %3181 = vmatpush.bf16.msra.mxu0 %v8702_v7  ;;  %v1115_v56 = vpack.c.bf16 %v1089_v26, %v1088_v3  ;;  %v850_v53 = vmin.f32 %v7704_v11, 0.0  ;;  %v948_v3 = vmul.f32 1.442695, %v853_v60  ;;  %v8723_v60 = vld [vmem:[#allocation81_spill] sm:$0xff] }
 0x2d0   :  { %v2213_v59 = vadd.f32 %v2184_v1, %v7567_v40  ;;  %v2266_v52 = vpop.f32.mrf.mxu2  ;;  %v8706_v40 = vld [vmem:[#allocation30_spill] sm:$0xff]  ;;  %v8717_v1 = vld [vmem:[#allocation39_spill] sm:$0xff]  ;;  %v1021_v7 = vmul.f32 0.001, %v4531_v2  ;;  %5472 = vpow2.f32 %v946_v9  ;;  %v1066_v2 = vsel %vm778_vm2, %v7635_v8, %v1018_v15  ;;  %v8730_v9 = vld [vmem:[#allocation52_spill] sm:$0xff] }
 0x2d1   :  { %v7684_v34 = vadd.f32 %v2285_v41, %v2214_v55  ;;  %5110 = vmatmul.msk.bf16.vlgmr.msrb.gmra.mxu1 %vm2036_vm6, %v5366_v27  ;;  %3308 = vmatpush.bf16.msrb.mxu3 %v8704_v44  ;;  %v3107_v4 = vunpack.c.h.b16 %v1115_v56  ;;  %v3106_v58 = vunpack.c.l.b16 %v1115_v56  ;;  %v1020_v41 = vmul.f32 0.001, %v4530_v6  ;;  %v8719_v44 = vld [vmem:[#allocation74_spill] sm:$0xff] }
 0x2d2   :  { %v7692_v49 = vadd.f32 %v2266_v52, %v2213_v59  ;;  %5108 = vmatmul.msk.bf16.vlgmr.msrb.gmra.mxu0 %vm2036_vm6, %v5366_v27  ;;  %3269 = vmatpush.bf16.msrb.mxu1 %v8706_v40  ;;  %v4529_v27 = vadd.f32 -1.0, %v5471_v25  ;;  %v851_v59 = vmin.f32 %v7712_v37, 0.0  ;;  %v8720_v56 = vld [vmem:[#allocation82_spill] sm:$0xff]  ;;  %5474 = vpow2.f32 %v948_v3 }
 0x2d3   :  { %3250 = vmatpush.bf16.msrb.mxu0 %v8707_v21  ;;  %3289 = vmatpush.bf16.msrb.mxu2 %v8708_v13  ;;  %v7724_v55 = vpack.c.b16 %v3107_v4, %v3101_v35  ;;  %v7728_v52 = vpack.c.b16 %v3106_v58, %v3100_v62  ;;  %v942_v21 = vmul.f32 1.442695, %v850_v53  ;;  %v1068_v32 = vsel %vm780_vm5, %v7621_v14, %v1020_v41  ;;  %v8724_v14 = vld [vmem:[#allocation86_spill] sm:$0xff]  ;;  %v8728_v58 = vld [vmem:[#allocation91_spill] sm:$0xff] }
 0x2d4   :  { %v1019_v40 = vmul.f32 0.001, %v4529_v27  ;;  %v1069_v6 = vsel %vm781_vm1, %v7629_v29, %v1021_v7  ;;  %v944_v30 = vmul.f32 1.442695, %v851_v59  ;;  %v8731_v62 = vld [vmem:[#allocation90_spill] sm:$0xff]  ;;  %v8732_v53 = vld [vmem:[#allocation79_spill] sm:$0xff] }
 0x2d5   :  { %3309 = vmatpush.bf16.msrb.mxu3 %v8709_v46  ;;  %5476 = vpow2.f32 %v942_v21  ;;  %v3093_v3 = vunpack.c.h.b16 %v8732_v53  ;;  %v3092_v59 = vunpack.c.l.b16 %v8732_v53  ;;  %vm805_vm5 = vcmp.gt.f32.partialorder %v7690_v45, 0.0 }
 0x2d6   :  { %v2205_v63 = vpop.f32.mrf.mxu1  ;;  %3270 = vmatpush.bf16.msrb.mxu1 %v8711_v5  ;;  %v8725_v5 = vld [vmem:[#allocation48_spill] sm:$0xff]  ;;  %v1067_v38 = vsel %vm779_vm3, %v7641_v28, %v1019_v40  ;;  %5478 = vpow2.f32 %v944_v30  ;;  %vm802_vm1 = vcmp.gt.f32.partialorder %v7704_v11, 0.0  ;;  %vm803_vm2 = vcmp.gt.f32.partialorder %v7712_v37, 0.0 }
 0x2d7   :  { %v2216_v10 = vadd.f32 %v2205_v63, %v2132_v51  ;;  %v2186_v54 = vpop.f32.mrf.mxu0  ;;  %v2287_v36 = vpop.f32.mrf.mxu3  ;;  %3251 = vmatpush.bf16.msrb.mxu0 %v8713_v22  ;;  %3290 = vmatpush.bf16.msrb.mxu2 %v8714_v33  ;;  %v1104_v22 = vpack.c.bf16 %v1067_v38, %v1066_v2  ;;  %v8739_v2 = vld [vmem:[#allocation61_spill] sm:$0xff] }
 0x2d8   :  { %v2215_v43 = vadd.f32 %v2186_v54, %v2113_v18  ;;  %v2268_v17 = vpop.f32.mrf.mxu2  ;;  %v8727_v54 = vld [vmem:[#allocation85_spill] sm:$0xff] }
 0x2d9   :  { %v7717_v48 = vadd.f32 %v2287_v36, %v2216_v10  ;;  %3310 = vmatpush.bf16.msrb.mxu3 %v8716_v50  ;;  %v8726_v10 = vld [vmem:[#allocation46_spill] sm:$0xff]  ;;  %v3097_v15 = vunpack.c.h.b16 %v1104_v22 }
 0x2da   :  { %v7722_v26 = vadd.f32 %v2268_v17, %v2215_v43  ;;  %3271 = vmatpush.bf16.msrb.mxu1 %v8717_v1  ;;  %v8729_v43 = vld [vmem:[#allocation53_spill] sm:$0xff] }
 0x2db   :  { %3252 = vmatpush.bf16.msrb.mxu0 %v8718_v39  ;;  %3291 = vmatpush.bf16.msrb.mxu2 %v8719_v44  ;;  %v8733_v44 = vld [vmem:[#allocation95_spill] sm:$0xff] }
 0x2dc   :  { %3168 = vmatmul.bf16.gmra.mxu3 %v7724_v55 }
 0x2dd   :  { %3149 = vmatmul.bf16.gmra.mxu2 %v7728_v52  ;;  %3311 = vmatpush.bf16.msrb.mxu3 %v8720_v56  ;;  %v8734_v56 = vld [vmem:[#allocation57_spill] sm:$0xff] }
 0x2de   :  { %v2208_v13 = vpop.f32.mrf.mxu1  ;;  %3272 = vmatpush.bf16.msrb.mxu1 %v8721_v12  ;;  %v8736_v12 = vld [vmem:[#allocation94_spill] sm:$0xff] }
 0x2df   :  { %v2218_v51 = vadd.f32 %v2208_v13, %v7615_v23  ;;  %v2189_v46 = vpop.f32.mrf.mxu0  ;;  %v2290_v25 = vpop.f32.mrf.mxu3  ;;  %3253 = vmatpush.bf16.msrb.mxu0 %v8722_v31  ;;  %3292 = vmatpush.bf16.msrb.mxu2 %v8723_v60  ;;  %v1105_v23 = vpack.c.bf16 %v1069_v6, %v1068_v32  ;;  %v3096_v32 = vunpack.c.l.b16 %v1104_v22  ;;  %v8738_v60 = vld [vmem:[#allocation62_spill] sm:$0xff] }
 0x2e0   :  { %v2217_v18 = vadd.f32 %v2189_v46, %v7623_v16  ;;  %v2271_v63 = vpop.f32.mrf.mxu2  ;;  %v5473_v16 = vpop.eup %5472 }
 0x2e1   :  { %v7748_v4 = vadd.f32 %v2290_v25, %v2218_v51  ;;  %5111 = vmatmul.msk.bf16.gmra.mxu1 %vm2036_vm6, %v5367_v42  ;;  %3312 = vmatpush.bf16.msrb.mxu3 %v8724_v14  ;;  %v5475_v36 = vpop.eup %5474  ;;  %v3099_v33 = vunpack.c.h.b16 %v1105_v23  ;;  %v3098_v17 = vunpack.c.l.b16 %v1105_v23  ;;  %v4554_v19 = vadd.f32 -1.0, %v5473_v16  ;;  %v8737_v51 = vld [vmem:[#allocation73_spill] sm:$0xff] }
 0x2e2   :  { %v7753_v29 = vadd.f32 %v2271_v63, %v2217_v18  ;;  %5109 = vmatmul.msk.bf16.gmra.mxu0 %vm2036_vm6, %v5367_v42  ;;  %3273 = vmatpush.bf16.msrb.mxu1 %v8725_v5  ;;  %v4555_v35 = vadd.f32 -1.0, %v5475_v36  ;;  %v5477_v50 = vpop.eup %5476  ;;  %v3091_v46 = vunpack.c.h.b16 %v8737_v51  ;;  %v3090_v25 = vunpack.c.l.b16 %v8737_v51 }
 0x2e3   :  { %3254 = vmatpush.bf16.msrb.mxu0 %v8726_v10  ;;  %3293 = vmatpush.bf16.msrb.mxu2 %v8727_v54  ;;  %v5479_v7 = vpop.eup %5478  ;;  %v7777_v40 = vpack.c.b16 %v3098_v17, %v3092_v59  ;;  %v1044_v21 = vmul.f32 0.001, %v4554_v19  ;;  %v4552_v6 = vadd.f32 -1.0, %v5477_v50  ;;  %v8742_v19 = vld [vmem:[#allocation72_spill] sm:$0xff]  ;;  %v8746_v59 = vld [vmem:[#allocation78_spill] sm:$0xff] }
 0x2e4   :  { %v1045_v13 = vmul.f32 0.001, %v4555_v35  ;;  %v4553_v30 = vadd.f32 -1.0, %v5479_v7  ;;  %v7788_v18 = vpack.c.b16 %v3097_v15, %v3091_v46  ;;  %v7794_v38 = vpack.c.b16 %v3096_v32, %v3090_v25 }
 0x2e5   :  { %3313 = vmatpush.bf16.msrb.mxu3 %v8728_v58  ;;  %v1092_v63 = vsel %vm804_vm4, %v7682_v57, %v1044_v21  ;;  %v1042_v10 = vmul.f32 0.001, %v4552_v6 }
 0x2e6   :  { %v2210_v0 = vpop.f32.mrf.mxu1  ;;  %3274 = vmatpush.bf16.msrb.mxu1 %v8729_v43  ;;  %v1093_v14 = vsel %vm805_vm5, %v7690_v45, %v1045_v13  ;;  %v1043_v54 = vmul.f32 0.001, %v4553_v30  ;;  %v8741_v45 = vld [vmem:[#allocation67_spill] sm:$0xff]  ;;  %v8748_v13 = vld [vmem:[#allocation84_spill] sm:$0xff] }
 0x2e7   :  { %v2220_v8 = vadd.f32 %v2210_v0, %v7648_v24  ;;  %v2191_v27 = vpop.f32.mrf.mxu0  ;;  %v2292_v28 = vpop.f32.mrf.mxu3  ;;  %3255 = vmatpush.bf16.msrb.mxu0 %v8730_v9  ;;  %3294 = vmatpush.bf16.msrb.mxu2 %v8731_v62  ;;  %v7772_v24 = vpack.c.b16 %v3099_v33, %v3093_v3  ;;  %v1117_v57 = vpack.c.bf16 %v1093_v14, %v1092_v63  ;;  %v8743_v62 = vld [vmem:[#allocation71_spill] sm:$0xff]  ;;  %v8750_v63 = vld [vmem:[#allocation89_spill] sm:$0xff] }
 0x2e8   :  { %v2219_v1 = vadd.f32 %v2191_v27, %v7654_v20  ;;  %v2273_v41 = vpop.f32.mrf.mxu2  ;;  %v8735_v20 = vld [vmem:[#allocation56_spill] sm:$0xff]  ;;  %v1091_v0 = vsel %vm803_vm2, %v7712_v37, %v1043_v54  ;;  %v8749_v30 = vld [vmem:[#allocation83_spill] sm:$0xff] }
 0x2e9   :  { %v7769_v39 = vadd.f32 %v2292_v28, %v2220_v8  ;;  %3314 = vmatpush.bf16.msrb.mxu3 %v8733_v44  ;;  %v3111_v17 = vunpack.c.h.b16 %v1117_v57  ;;  %v3110_v9 = vunpack.c.l.b16 %v1117_v57  ;;  %v8744_v37 = vld [vmem:[#allocation100_spill] sm:$0xff]  ;;  %v8751_v14 = vld [vmem:[#allocation87_spill] sm:$0xff] }
 0x2ea   :  { %v7774_v42 = vadd.f32 %v2273_v41, %v2219_v1  ;;  %3275 = vmatpush.bf16.msrb.mxu1 %v8734_v56  ;;  %v3105_v53 = vunpack.c.h.b16 %v8744_v37  ;;  %v3104_v3 = vunpack.c.l.b16 %v8744_v37  ;;  %v8745_v41 = vld [vmem:[#allocation80_spill] sm:$0xff]  ;;  %v8756_v57 = vld [vmem:[#allocation99_spill] sm:$0xff] }
 0x2eb   :  { %3256 = vmatpush.bf16.msrb.mxu0 %v8735_v20  ;;  %3295 = vmatpush.bf16.msrb.mxu2 %v8736_v12 }
 0x2ec   :  { %3239 = vmatmul.bf16.vlgmr.msra.gmra.mxu3 %v7772_v24  ;;  %v7823_v1 = vpack.c.b16 %v3111_v17, %v3105_v53 }
 0x2ed   :  { %3220 = vmatmul.bf16.vlgmr.msra.gmra.mxu2 %v7777_v40 }
 0x2ee   :  { %v2367_v31 = vpop.f32.mrf.mxu1  ;;  %3276 = vmatpush.bf16.msrb.mxu1 %v8738_v60 }
 0x2ef   :  { %v2378_v23 = vadd.f32 %v2367_v31, %v7684_v34  ;;  %v2348_v5 = vpop.f32.mrf.mxu0  ;;  %v2449_v16 = vpop.f32.mrf.mxu3  ;;  %3257 = vmatpush.bf16.msrb.mxu0 %v8739_v2  ;;  %v8740_v34 = vld [vmem:[#allocation68_spill] sm:$0xff] }
 0x2f0   :  { %v2377_v36 = vadd.f32 %v2348_v5, %v7692_v49  ;;  %v2430_v58 = vpop.f32.mrf.mxu2  ;;  %v1090_v49 = vsel %vm802_vm1, %v7704_v11, %v1042_v10  ;;  %v8752_v5 = vld [vmem:[#allocation93_spill] sm:$0xff] }
 0x2f1   :  { %v7797_v22 = vadd.f32 %v2449_v16, %v2378_v23  ;;  %3201 = vmatmul.bf16.vlgmr.msra.gmra.mxu1 %v7788_v18  ;;  %v1116_v35 = vpack.c.bf16 %v1091_v0, %v1090_v49  ;;  %v8757_v0 = vld [vmem:[#allocation98_spill] sm:$0xff] }
 0x2f2   :  { %v7800_v33 = vadd.f32 %v2430_v58, %v2377_v36  ;;  %3182 = vmatmul.bf16.vlgmr.msra.gmra.mxu0 %v7794_v38  ;;  %3345 = vmatpush.bf16.msra.mxu1 %v8740_v34  ;;  %v8754_v36 = vld [vmem:[#allocation97_spill] sm:$0xff]  ;;  %v8755_v58 = vld [vmem:[#allocation96_spill] sm:$0xff] }
 0x2f3   :  { %3326 = vmatpush.bf16.msra.mxu0 %v8741_v45  ;;  %v3109_v7 = vunpack.c.h.b16 %v1116_v35  ;;  %v3108_v44 = vunpack.c.l.b16 %v1116_v35 }
 0x2f6   :  { %v2369_v43 = vpop.f32.mrf.mxu1  ;;  %3346 = vmatpush.bf16.msra.mxu1 %v8742_v19 }
 0x2f7   :  { %v7811_v8 = vadd.f32 %v2369_v43, %v7717_v48  ;;  %v2350_v27 = vpop.f32.mrf.mxu0  ;;  %v7813_v28 = vpop.f32.mrf.mxu3  ;;  %3327 = vmatpush.bf16.msra.mxu0 %v8743_v62  ;;  %v7826_v48 = vpack.c.b16 %v3110_v9, %v3104_v3 }
 0x2f8   :  { %v7817_v50 = vadd.f32 %v2350_v27, %v7722_v26  ;;  %v7819_v11 = vpop.f32.mrf.mxu2  ;;  %v8747_v26 = vld [vmem:[#allocation88_spill] sm:$0xff] }
 0x2f9   :  { %v3103_v56 = vunpack.c.h.b16 %v8747_v26  ;;  %v3102_v21 = vunpack.c.l.b16 %v8747_v26 }
 0x2fa   :  { %3347 = vmatpush.bf16.msra.mxu1 %v8745_v41 }
 0x2fb   :  { %3328 = vmatpush.bf16.msra.mxu0 %v8746_v59  ;;  %v3121_v6 = vpack.c.b16 %v3109_v7, %v3103_v56  ;;  %v3120_v25 = vpack.c.b16 %v3108_v44, %v3102_v21 }
 0x2fc   :  { %3244 = vmatmul.bf16.gmra.mxu3 %v7823_v1 }
 0x2fd   :  { %3225 = vmatmul.bf16.gmra.mxu2 %v7826_v48 }
 0x2fe   :  { %v2372_v15 = vpop.f32.mrf.mxu1  ;;  %3348 = vmatpush.bf16.msra.mxu1 %v8748_v13 }
 0x2ff   :  { %v2382_v20 = vadd.f32 %v2372_v15, %v7748_v4  ;;  %v2353_v12 = vpop.f32.mrf.mxu0  ;;  %v2454_v32 = vpop.f32.mrf.mxu3  ;;  %3329 = vmatpush.bf16.msra.mxu0 %v8749_v30 }
 0x300   :  { %v2381_v51 = vadd.f32 %v2353_v12, %v7753_v29  ;;  %v2435_v46 = vpop.f32.mrf.mxu2  ;;  %v8753_v29 = vld [vmem:[#allocation92_spill] sm:$0xff] }
 0x301   :  { %v2464_v31 = vadd.f32 %v2454_v32, %v2382_v20  ;;  %3206 = vmatmul.bf16.gmra.mxu1 %v3121_v6 }
 0x302   :  { %v2463_v60 = vadd.f32 %v2435_v46, %v2381_v51  ;;  %3187 = vmatmul.bf16.gmra.mxu0 %v3120_v25  ;;  %3349 = vmatpush.bf16.msra.mxu1 %v8750_v63 }
 0x303   :  { %3330 = vmatpush.bf16.msra.mxu0 %v8751_v14 }
 0x306   :  { %v2374_v23 = vpop.f32.mrf.mxu1  ;;  %3350 = vmatpush.bf16.msra.mxu1 %v8752_v5 }
 0x307   :  { %v7841_v4 = vadd.f32 %v2374_v23, %v7769_v39  ;;  %v2355_v16 = vpop.f32.mrf.mxu0  ;;  %v7843_v2 = vpop.f32.mrf.mxu3  ;;  %3331 = vmatpush.bf16.msra.mxu0 %v8753_v29 }
 0x308   :  { %v7847_v10 = vadd.f32 %v2355_v16, %v7774_v42  ;;  %v7849_v54 = vpop.f32.mrf.mxu2 }
 0x30a   :  { %3351 = vmatpush.bf16.msra.mxu1 %v8754_v36 }
 0x30b   :  { %3332 = vmatpush.bf16.msra.mxu0 %v8755_v58 }
 0x30c   :  { %3315 = vmatmul.bf16.vlgmr.msrb.gmra.mxu3 %v7788_v18 }
 0x30d   :  { %3296 = vmatmul.bf16.vlgmr.msrb.gmra.mxu2 %v7794_v38 }
 0x30e   :  { %v2531_v39 = vpop.f32.mrf.mxu1  ;;  %3352 = vmatpush.bf16.msra.mxu1 %v8756_v57 }
 0x30f   :  { %v2542_v34 = vadd.f32 %v2531_v39, %v7797_v22  ;;  %v2512_v45 = vpop.f32.mrf.mxu0  ;;  %v2613_v49 = vpop.f32.mrf.mxu3  ;;  %3333 = vmatpush.bf16.msra.mxu0 %v8757_v0 }
 0x310   :  { %v2541_v42 = vadd.f32 %v2512_v45, %v7800_v33  ;;  %v2594_v43 = vpop.f32.mrf.mxu2 }
 0x311   :  { %v2624_v17 = vadd.f32 %v2613_v49, %v2542_v34  ;;  %3277 = vmatmul.bf16.vlgmr.msrb.gmra.mxu1 %v7658_v61 }
 0x312   :  { %v2623_v19 = vadd.f32 %v2594_v43, %v2541_v42  ;;  %3258 = vmatmul.bf16.vlgmr.msrb.gmra.mxu0 %v7661_v47 }
 0x316   :  { %v7861_v18 = vpop.f32.mrf.mxu1 }
 0x317   :  { %v7863_v38 = vpop.f32.mrf.mxu0  ;;  %v7865_v35 = vpop.f32.mrf.mxu3 }
 0x318   :  { %v7867_v22 = vpop.f32.mrf.mxu2 }
 0x31c   :  { %3320 = vmatmul.bf16.gmra.mxu3 %v3121_v6 }
 0x31d   :  { %3301 = vmatmul.bf16.gmra.mxu2 %v3120_v25 }
 0x31e   :  { %v2536_v27 = vpop.f32.mrf.mxu1 }
 0x31f   :  { %v2546_v9 = vadd.f32 %v2536_v27, %v2464_v31  ;;  %v2517_v33 = vpop.f32.mrf.mxu0  ;;  %v2618_v62 = vpop.f32.mrf.mxu3 }
 0x320   :  { %v2545_v37 = vadd.f32 %v2517_v33, %v2463_v60  ;;  %v2599_v53 = vpop.f32.mrf.mxu2 }
 0x321   :  { %v2628_v61 = vadd.f32 %v2618_v62, %v2546_v9  ;;  %3282 = vmatmul.bf16.gmra.mxu1 %v7724_v55 }
 0x322   :  { %v2627_v47 = vadd.f32 %v2599_v53, %v2545_v37  ;;  %3263 = vmatmul.bf16.gmra.mxu0 %v7728_v52 }
 0x326   :  { %v7871_v3 = vpop.f32.mrf.mxu1 }
 0x327   :  { %v7873_v41 = vpop.f32.mrf.mxu0  ;;  %v7875_v7 = vpop.f32.mrf.mxu3 }
 0x328   :  { %8758 = vst [vmem:[#allocation15_spill] sm:$0xff] %v7873_v41  ;;  %v7877_v59 = vpop.f32.mrf.mxu2 }
 0x329   :  { %8759 = vst [vmem:[#allocation19_spill] sm:$0xff] %v7875_v7 }
 0x32a   :  { %8760 = vst [vmem:[#allocation18_spill] sm:$0xff] %v7877_v59 }
 0x32e   :  { %v2695_v44 = vpop.f32.mrf.mxu1 }
 0x32f   :  { %v2706_v26 = vadd.f32 %v2695_v44, %v2624_v17  ;;  %v2676_v56 = vpop.f32.mrf.mxu0  ;;  %v2777_v15 = vpop.f32.mrf.mxu3 }
 0x330   :  { %v2705_v21 = vadd.f32 %v2676_v56, %v2623_v19  ;;  %v2758_v13 = vpop.f32.mrf.mxu2 }
 0x331   :  { %v2788_v20 = vadd.f32 %v2777_v15, %v2706_v26  ;;  %3353 = vmatmul.bf16.vlgmr.msra.gmra.mxu1 %v7772_v24 }
 0x332   :  { %v2787_v55 = vadd.f32 %v2758_v13, %v2705_v21  ;;  %3334 = vmatmul.bf16.vlgmr.msra.gmra.mxu0 %v7777_v40 }
 0x336   :  { %v7881_v52 = vpop.f32.mrf.mxu1 }
 0x337   :  { %v7883_v12 = vpop.f32.mrf.mxu0  ;;  %v7885_v32 = vpop.f32.mrf.mxu3 }
 0x338   :  { %8761 = vst [vmem:[#allocation23_spill] sm:$0xff] %v7885_v32  ;;  %v7887_v6 = vpop.f32.mrf.mxu2 }
 0x339   :  { %8762 = vst [vmem:[#allocation22_spill] sm:$0xff] %v7887_v6 }
 0x33e   :  { %v2700_v30 = vpop.f32.mrf.mxu1 }
 0x33f   :  { %v2710_v51 = vadd.f32 %v2700_v30, %v2628_v61  ;;  %v2681_v46 = vpop.f32.mrf.mxu0  ;;  %v2782_v25 = vpop.f32.mrf.mxu3 }
 0x340   :  { %v2709_v31 = vadd.f32 %v2681_v46, %v2627_v47  ;;  %v2763_v60 = vpop.f32.mrf.mxu2 }
 0x341   :  { %v2792_v63 = vadd.f32 %v2782_v25, %v2710_v51  ;;  %3358 = vmatmul.bf16.gmra.mxu1 %v7823_v1 }
 0x342   :  { %v2791_v24 = vadd.f32 %v2763_v60, %v2709_v31  ;;  %3339 = vmatmul.bf16.gmra.mxu0 %v7826_v48 }
 0x346   :  { %v7891_v40 = vpop.f32.mrf.mxu1 }
 0x347   :  { %8763 = vst [vmem:[#allocation26_spill] sm:$0xff] %v7891_v40  ;;  %v7893_v14 = vpop.f32.mrf.mxu0  ;;  %v7895_v23 = vpop.f32.mrf.mxu3 }
 0x348   :  { %8764 = vst [vmem:[#allocation47_spill] sm:$0xff] %v7893_v14  ;;  %v7897_v5 = vpop.f32.mrf.mxu2 }
 0x349   :  { %8765 = vst [vmem:[#allocation28_spill] sm:$0xff] %v7895_v23 }
 0x34a   :  { %8766 = vst [vmem:[#allocation50_spill] sm:$0xff] %v7897_v5 }
 0x34e   :  { %v2859_v16 = vpop.f32.mrf.mxu1 }
 0x34f   :  { %v7899_v29 = vadd.f32 %v2859_v16, %v2788_v20  ;;  %v2840_v36 = vpop.f32.mrf.mxu0  ;;  %v3164_v58 = vpop.f32.mrf.mxu3 }
 0x350   :  { %v7901_v39 = vadd.f32 %v2840_v36, %v2787_v55  ;;  %v3145_v57 = vpop.f32.mrf.mxu2 }
 0x351   :  { %8767 = vst [vmem:[#allocation6_spill] sm:$0xff] %v7899_v29  ;;  %v3165_v1 = vadd.f32 %v3164_v58, %v3145_v57 }
 0x352   :  { %8768 = vst [vmem:[#allocation5_spill] sm:$0xff] %v7901_v39 }
 0x356   :  { %v7903_v34 = vpop.f32.mrf.mxu1 }
 0x357   :  { %8769 = vst [vmem:[#allocation27_spill] sm:$0xff] %v7903_v34  ;;  %v7905_v48 = vpop.f32.mrf.mxu0  ;;  %v3166_v45 = vpop.f32.mrf.mxu3 }
 0x358   :  { %8770 = vst [vmem:[#allocation32_spill] sm:$0xff] %v7905_v48  ;;  %v3147_v49 = vpop.f32.mrf.mxu2 }
 0x35e   :  { %v2864_v0 = vpop.f32.mrf.mxu1 }
 0x35f   :  { %v7907_v42 = vadd.f32 %v2864_v0, %v2792_v63  ;;  %v2845_v43 = vpop.f32.mrf.mxu0  ;;  %v3169_v17 = vpop.f32.mrf.mxu3 }
 0x360   :  { %v7909_v19 = vadd.f32 %v2845_v43, %v2791_v24  ;;  %v3150_v27 = vpop.f32.mrf.mxu2 }
 0x361   :  { %8771 = vst [vmem:[#allocation8_spill] sm:$0xff] %v7907_v42  ;;  %v3170_v9 = vadd.f32 %v3169_v17, %v3150_v27 }
 0x366   :  { %v7911_v33 = vpop.f32.mrf.mxu1 }
 0x367   :  { %8772 = vst [vmem:[#allocation7_spill] sm:$0xff] %v7911_v33  ;;  %v7913_v62 = vpop.f32.mrf.mxu0  ;;  %v3171_v26 = vpop.f32.mrf.mxu3 }
 0x368   :  { %8773 = vst [vmem:[#allocation31_spill] sm:$0xff] %v7913_v62  ;;  %v3152_v37 = vpop.f32.mrf.mxu2 }
 0x36e   :  { %v3202_v53 = vpop.f32.mrf.mxu1 }
 0x36f   :  { %v3183_v61 = vpop.f32.mrf.mxu0  ;;  %v3240_v20 = vpop.f32.mrf.mxu3 }
 0x370   :  { %v3184_v47 = vadd.f32 %v3183_v61, %v3165_v1  ;;  %v3221_v21 = vpop.f32.mrf.mxu2 }
 0x372   :  { %v3203_v44 = vadd.f32 %v3202_v53, %v3184_v47 }
 0x374   :  { %v3222_v34 = vadd.f32 %v3221_v21, %v3203_v44 }
 0x376   :  { %v3204_v56 = vpop.f32.mrf.mxu1 }
 0x377   :  { %v3185_v15 = vpop.f32.mrf.mxu0  ;;  %v3242_v60 = vpop.f32.mrf.mxu3 }
 0x378   :  { %v3223_v51 = vpop.f32.mrf.mxu2 }
 0x37e   :  { %v3207_v13 = vpop.f32.mrf.mxu1 }
 0x37f   :  { %v3188_v55 = vpop.f32.mrf.mxu0  ;;  %v3245_v36 = vpop.f32.mrf.mxu3 }
 0x380   :  { %v3189_v30 = vadd.f32 %v3188_v55, %v3170_v9  ;;  %v3226_v63 = vpop.f32.mrf.mxu2 }
 0x382   :  { %v3208_v46 = vadd.f32 %v3207_v13, %v3189_v30  ;;  %v3167_v13 = vadd.f32 %v3166_v45, %v3147_v49 }
 0x384   :  { %v3186_v29 = vadd.f32 %v3185_v15, %v3167_v13 }
 0x386   :  { %v3209_v25 = vpop.f32.mrf.mxu1  ;;  %v3205_v14 = vadd.f32 %v3204_v56, %v3186_v29 }
 0x387   :  { %v3190_v31 = vpop.f32.mrf.mxu0  ;;  %v3247_v0 = vpop.f32.mrf.mxu3 }
 0x388   :  { %v3228_v58 = vpop.f32.mrf.mxu2  ;;  %v3224_v7 = vadd.f32 %v3223_v51, %v3205_v14 }
 0x38a   :  { %v3243_v49 = vadd.f32 %v3242_v60, %v3224_v7  ;;  %v3227_v7 = vadd.f32 %v3226_v63, %v3208_v46 }
 0x38e   :  { %v3278_v24 = vpop.f32.mrf.mxu1 }
 0x38f   :  { %v3259_v16 = vpop.f32.mrf.mxu0  ;;  %v3316_v61 = vpop.f32.mrf.mxu3 }
 0x390   :  { %v3297_v27 = vpop.f32.mrf.mxu2  ;;  %v3279_v9 = vadd.f32 %v3278_v24, %v3259_v16  ;;  %v3241_v24 = vadd.f32 %v3240_v20, %v3222_v34 }
 0x392   :  { %v3298_v30 = vadd.f32 %v3297_v27, %v3279_v9  ;;  %v3172_v27 = vadd.f32 %v3171_v26, %v3152_v37  ;;  %v3246_v26 = vadd.f32 %v3245_v36, %v3227_v7  ;;  %v5512_v36 = vld [vmem:[%s8439_s4] sm:$0xff] }
 0x394   :  { %v3317_v5 = vadd.f32 %v3316_v61, %v3298_v30  ;;  %v3191_v29 = vadd.f32 %v3190_v31, %v3172_v27  ;;  %v5113_v30 = vld [vmem:[%s8437_s2 + $0x28] sm:$0xff] }
 0x396   :  { %v3280_v57 = vpop.f32.mrf.mxu1 }
 0x397   :  { %v3261_v1 = vpop.f32.mrf.mxu0  ;;  %v3318_v23 = vpop.f32.mrf.mxu3 }
 0x398   :  { %v3299_v55 = vpop.f32.mrf.mxu2  ;;  %v3281_v39 = vadd.f32 %v3280_v57, %v3261_v1 }
 0x39a   :  { %v3300_v40 = vadd.f32 %v3299_v55, %v3281_v39 }
 0x39c   :  { %v3319_v41 = vadd.f32 %v3318_v23, %v3300_v40  ;;  %v3210_v23 = vadd.f32 %v3209_v25, %v3191_v29 }
 0x39e   :  { %v3283_v43 = vpop.f32.mrf.mxu1 }
 0x39f   :  { %v3264_v17 = vpop.f32.mrf.mxu0  ;;  %v3321_v1 = vpop.f32.mrf.mxu3 }
 0x3a0   :  { %v3302_v59 = vpop.f32.mrf.mxu2  ;;  %v3284_v16 = vadd.f32 %v3283_v43, %v3264_v17 }
 0x3a2   :  { %v3303_v61 = vadd.f32 %v3302_v59, %v3284_v16  ;;  %v3229_v59 = vadd.f32 %v3228_v58, %v3210_v23  ;;  %v5513_v58 = vld [vmem:[%s8439_s4 + $0x8] sm:$0xff]  ;;  %v5112_v16 = vld [vmem:[%s8437_s2 + $0x20] sm:$0xff] }
 0x3a4   :  { %v3322_v40 = vadd.f32 %v3321_v1, %v3303_v61  ;;  %v3248_v20 = vadd.f32 %v3247_v0, %v3229_v59  ;;  %v5516_v59 = vld [vmem:[%s8439_s4 + $0x30] sm:$0xff] }
 0x3a6   :  { %v3285_v53 = vpop.f32.mrf.mxu1 }
 0x3a7   :  { %v3266_v47 = vpop.f32.mrf.mxu0 }
 0x3a8   :  { %v3286_v39 = vadd.f32 %v3285_v53, %v3266_v47 }
 0x3ae   :  { %v3354_v62 = vpop.f32.mrf.mxu1 }
 0x3af   :  { %v3335_v33 = vpop.f32.mrf.mxu0 }
 0x3b0   :  { %v3336_v48 = vadd.f32 %v3335_v33, %v3317_v5  ;;  %v3304_v5 = vpop.f32.mrf.mxu2 }
 0x3b1   :  { %v3305_v34 = vadd.f32 %v3304_v5, %v3286_v39 }
 0x3b2   :  { %v3355_v6 = vadd.f32 %v3354_v62, %v3336_v48 }
 0x3b4   :  { %v3364_v15 = vpack.c.bf16 %v3355_v6, %v3241_v24 }
 0x3b6   :  { %v3356_v32 = vpop.f32.mrf.mxu1  ;;  %v3372_v33 = vunpack.c.l.b16 %v3364_v15  ;;  %v3373_v46 = vunpack.c.h.b16 %v3364_v15  ;;  %v5115_v15 = vld [vmem:[%s8437_s2 + $0x38] sm:$0xff] }
 0x3b7   :  { %v3337_v42 = vpop.f32.mrf.mxu0 }
 0x3b8   :  { %v3338_v45 = vadd.f32 %v3337_v42, %v3319_v41 }
 0x3ba   :  { %v3357_v57 = vadd.f32 %v3356_v32, %v3338_v45  ;;  %v3323_v32 = vpop.f32.mrf.mxu3 }
 0x3bb   :  { %v3324_v42 = vadd.f32 %v3323_v32, %v3305_v34  ;;  %v5515_v32 = vld [vmem:[%s8439_s4 + $0x18] sm:$0xff] }
 0x3bc   :  { %v3365_v9 = vpack.c.bf16 %v3357_v57, %v3243_v49  ;;  %v5114_v57 = vld [vmem:[%s8437_s2 + $0x30] sm:$0xff]  ;;  %s5571_s2 = smov [#allocation2]  }
 0x3bd   :  { %s4177_s12 = sshll.u32 %s5571_s2, 4  ;;  %s4178_s12 = int_to_ptr.vmem [resolvable:$true] %s4177_s12 }
 0x3be   :  { %v3374_v44 = vunpack.c.l.b16 %v3365_v9  ;;  %v3359_v14 = vpop.f32.mrf.mxu1  ;;  %v3375_v13 = vunpack.c.h.b16 %v3365_v9 }
 0x3bf   :  { %v3340_v48 = vpop.f32.mrf.mxu0 }
 0x3c0   :  { %v7915_v62 = vpack.c.b16 %v3374_v44, %v3372_v33  ;;  %v3341_v41 = vadd.f32 %v3340_v48, %v3322_v40  ;;  %v3381_v63 = vpack.c.b16 %v3375_v13, %v3373_v46  ;;  %v5514_v33 = vld [vmem:[%s8439_s4 + $0x10] sm:$0xff] }
 0x3c2   :  { %3384 = vrot.lane.b32.xlu1 %v7915_v62, %s5561_s3  ;;  %v3360_v6 = vadd.f32 %v3359_v14, %v3341_v41 }
 0x3c4   :  { %v3366_v51 = vpack.c.bf16 %v3360_v6, %v3246_v26 }
 0x3c6   :  { %v3361_v21 = vpop.f32.mrf.mxu1  ;;  %v3376_v43 = vunpack.c.l.b16 %v3366_v51  ;;  %v3377_v25 = vunpack.c.h.b16 %v3366_v51 }
 0x3c7   :  { %v3342_v37 = vpop.f32.mrf.mxu0 }
 0x3c8   :  { %v3343_v56 = vadd.f32 %v3342_v37, %v3324_v42 }
 0x3ca   :  { %v3362_v31 = vadd.f32 %v3361_v21, %v3343_v56 }
 0x3cc   :  { %v3367_v60 = vpack.c.bf16 %v3362_v31, %v3248_v20 }
 0x3ce   :  { %v3378_v17 = vunpack.c.l.b16 %v3367_v60  ;;  %v3379_v53 = vunpack.c.h.b16 %v3367_v60  ;;  %v5517_v60 = vld [vmem:[%s8439_s4 + $0x20] sm:$0xff] }
 0x3d0   :  { %v3382_v47 = vpack.c.b16 %v3378_v17, %v3376_v43  ;;  %v3383_v55 = vpack.c.b16 %v3379_v53, %v3377_v25  ;;  %v5518_v43 = vld [vmem:[%s8439_s4 + $0x38] sm:$0xff] }
 0x3d2   :  { %3484 = vrot.lane.b32.xlu1 %v3383_v55, %s5562_s28  ;;  %3390 = vrot.lane.b32.xlu0 %v3383_v55, %s5561_s3 }
 0x3d3   :  { %3465 = vmatpush.bf16.msrb.mxu1 %v3383_v55  ;;  %3388 = vrot.lane.b32.xlu2 %v3382_v47, %s5561_s3 }
 0x3d4   :  { %3446 = vmatpush.bf16.msrb.mxu0 %v3382_v47 }
 0x3d7   :  { %3466 = vmatpush.bf16.msrb.mxu1 %v3381_v63 }
 0x3d8   :  { %3447 = vmatpush.bf16.msrb.mxu0 %v7915_v62 }
 0x3da   :  { %3602 = vrot.lane.b32.xlu1 %v3382_v47, %s5564_s30  ;;  %3482 = vrot.lane.b32.xlu0 %v3382_v47, %s5562_s28 }
 0x3db   :  { %3386 = vrot.lane.b32.xlu2 %v3381_v63, %s5561_s3  ;;  %5130 = vmatmul.msk.bf16.vlgmr.msrb.gmra.mxu1 %vm2036_vm6, %v5512_v36 }
 0x3dc   :  { %5128 = vmatmul.msk.bf16.vlgmr.msrb.gmra.mxu0 %vm2036_vm6, %v5512_v36 }
 0x3e2   :  { %3544 = vrot.lane.b32.xlu1 %v3383_v55, %s5563_s29  ;;  %3480 = vrot.lane.b32.xlu0 %v3381_v63, %s5562_s28 }
 0x3e3   :  { %3478 = vrot.lane.b32.xlu2 %v7915_v62, %s5562_s28 }
 0x3ea   :  { %3538 = vrot.lane.b32.xlu1 %v7915_v62, %s5563_s29  ;;  %3542 = vrot.lane.b32.xlu0 %v3382_v47, %s5563_s29 }
 0x3eb   :  { %3598 = vrot.lane.b32.xlu2 %v7915_v62, %s5564_s30  ;;  %5131 = vmatmul.msk.bf16.gmra.mxu1 %vm2036_vm6, %v5513_v58 }
 0x3ec   :  { %5129 = vmatmul.msk.bf16.gmra.mxu0 %vm2036_vm6, %v5513_v58  ;;  %v5519_v58 = vld [vmem:[%s8439_s4 + $0x28] sm:$0xff] }
 0x3f2   :  { %3718 = vrot.lane.b32.xlu1 %v7915_v62, %s5566_s1  ;;  %3600 = vrot.lane.b32.xlu0 %v3381_v63, %s5564_s30 }
 0x3f3   :  { %3604 = vrot.lane.b32.xlu2 %v3383_v55, %s5564_s30 }
 0x3fa   :  { %3724 = vrot.lane.b32.xlu1 %v3383_v55, %s5566_s1  ;;  %3722 = vrot.lane.b32.xlu0 %v3382_v47, %s5566_s1 }
 0x3fb   :  { %3540 = vrot.lane.b32.xlu2 %v3381_v63, %s5563_s29 }
 0x402   :  { %3660 = vrot.lane.b32.xlu1 %v3381_v63, %s5565_s8  ;;  %3664 = vrot.lane.b32.xlu0 %v3383_v55, %s5565_s8 }
 0x403   :  { %3662 = vrot.lane.b32.xlu2 %v3382_v47, %s5565_s8 }
 0x40a   :  { %3782 = vrot.lane.b32.xlu1 %v3382_v47, %s5567_s9  ;;  %3658 = vrot.lane.b32.xlu0 %v7915_v62, %s5565_s8 }
 0x40b   :  { %3720 = vrot.lane.b32.xlu2 %v3381_v63, %s5566_s1 }
 0x412   :  { %3840 = vrot.lane.b32.xlu1 %v3381_v63, %s5568_s10  ;;  %3838 = vrot.lane.b32.xlu0 %v7915_v62, %s5568_s10 }
 0x413   :  { %3842 = vrot.lane.b32.xlu2 %v3382_v47, %s5568_s10 }
 0x41a   :  { %3962 = vrot.lane.b32.xlu1 %v3382_v47, %s5570_s14  ;;  %3844 = vrot.lane.b32.xlu0 %v3383_v55, %s5568_s10 }
 0x41b   :  { %3784 = vrot.lane.b32.xlu2 %v3383_v55, %s5567_s9 }
 0x422   :  { %3904 = vrot.lane.b32.xlu1 %v3383_v55, %s5569_s11  ;;  %3780 = vrot.lane.b32.xlu0 %v3381_v63, %s5567_s9 }
 0x423   :  { %3778 = vrot.lane.b32.xlu2 %v7915_v62, %s5567_s9 }
 0x42a   :  { %3898 = vrot.lane.b32.xlu1 %v7915_v62, %s5569_s11  ;;  %3902 = vrot.lane.b32.xlu0 %v3382_v47, %s5569_s11 }
 0x42b   :  { %3958 = vrot.lane.b32.xlu2 %v7915_v62, %s5570_s14 }
 0x42d   :  { %v3389_v0 = vpop.permute.xlu2 %3388 }
 0x432   :  { %2889 = vperm.xlu1 %5381, %v5113_v30   ;;  %3960 = vrot.lane.b32.xlu0 %v3381_v63, %s5570_s14 }
 0x433   :  { %3964 = vrot.lane.b32.xlu2 %v3383_v55, %s5570_s14 }
 0x434   :  { %v3385_v45 = vpop.permute.xlu1 %3384 }
 0x435   :  { %v3387_v24 = vpop.permute.xlu2 %3386 }
 0x436   :  { %v3392_v29 = vsel %vm2029_vm7, %v3385_v45, %v3387_v24 }
 0x43a   :  { %2884 = vperm.xlu0 %5380, %v5112_v16  }
 0x43b   :  { %3900 = vrot.lane.b32.xlu2 %v3381_v63, %s5569_s11 }
 0x43d   :  { %v3479_v49 = vpop.permute.xlu2 %3478 }
 0x442   :  { %2899 = vperm.xlu0 %5380, %v5115_v15  }
 0x443   :  { %2894 = vperm.xlu2 %5382, %v5114_v57  }
 0x444   :  { %v3485_v1 = vpop.permute.xlu1 %3484  ;;  %v3391_v27 = vpop.permute.xlu0 %3390 }
 0x445   :  { %v3393_v61 = vsel %vm2029_vm7, %v3389_v0, %v3391_v27  ;;  %v3599_v9 = vpop.permute.xlu2 %3598  ;;  %3423 = vmatpush.bf16.msra.mxu3 %v3391_v27  ;;  %v5520_v0 = vld [vmem:[%s8439_s4 + $0x50] sm:$0xff]  ;;  %v5521_v27 = vld [vmem:[%s8439_s4 + $0x40] sm:$0xff]  ;;  %vm3006_vm7 = vcmask 457728  }
 0x446   :  { %3404 = vmatpush.bf16.msra.mxu2 %v3393_v61  ;;  %v5522_v61 = vld [vmem:[%s8439_s4 + $0x58] sm:$0xff] }
 0x449   :  { %3424 = vmatpush.bf16.msra.mxu3 %v3387_v24 }
 0x44a   :  { %3405 = vmatpush.bf16.msra.mxu2 %v3392_v29 }
 0x44c   :  { %v3603_v39 = vpop.permute.xlu1 %3602  ;;  %v3483_v5 = vpop.permute.xlu0 %3482  ;;  %5126 = vmatmul.msk.bf16.vlgmr.msra.gmra.mxu3 %vm2036_vm6, %v5514_v33 }
 0x44d   :  { %3517 = vmatpush.bf16.msrb.mxu3 %v3485_v1  ;;  %v3487_v44 = vsel %vm2162_vm8, %v3483_v5, %v3485_v1  ;;  %v3605_v14 = vpop.permute.xlu2 %3604  ;;  %5124 = vmatmul.msk.bf16.vlgmr.msra.gmra.mxu2 %vm2036_vm6, %v5514_v33 }
 0x44e   :  { %3498 = vmatpush.bf16.msrb.mxu2 %v3487_v44  ;;  %v3607_v34 = vsel %vm2326_vm10, %v3603_v39, %v3605_v14  ;;  %v2462_v44 = vadd.f32 %v7813_v28, %v7811_v8  ;;  %v2466_v28 = vadd.f32 %v7843_v2, %v7841_v4 }
 0x454   :  { %v3545_v48 = vpop.permute.xlu1 %3544  ;;  %v3481_v62 = vpop.permute.xlu0 %3480 }
 0x455   :  { %v3541_v40 = vpop.permute.xlu2 %3540  ;;  %3518 = vmatpush.bf16.msrb.mxu3 %v3481_v62  ;;  %3577 = vmatpush.bf16.msra.mxu1 %v3545_v48  ;;  %v3486_v23 = vsel %vm2162_vm8, %v3479_v49, %v3481_v62 }
 0x456   :  { %3499 = vmatpush.bf16.msrb.mxu2 %v3486_v23 }
 0x459   :  { %3637 = vmatpush.bf16.msra.mxu3 %v3605_v14  ;;  %3578 = vmatpush.bf16.msra.mxu1 %v3541_v40  ;;  %v2461_v14 = vadd.f32 %v7819_v11, %v7817_v50 }
 0x45a   :  { %3618 = vmatpush.bf16.msra.mxu2 %v3607_v34 }
 0x45b   :  { %v2543_v23 = vadd.f32 %v7863_v38, %v2461_v14  ;;  %v2465_v38 = vadd.f32 %v7849_v54, %v7847_v10  ;;  %v8775_v10 = vld [vmem:[#allocation15_spill] sm:$0xff] }
 0x45c   :  { %v3539_v41 = vpop.permute.xlu1 %3538  ;;  %v3543_v7 = vpop.permute.xlu0 %3542  ;;  %5127 = vmatmul.msk.bf16.gmra.mxu3 %vm2036_vm6, %v5515_v32  ;;  %5138 = vmatmul.msk.bf16.vlgmr.msra.gmra.mxu1 %vm2036_vm6, %v5516_v59  ;;  %v8789_v14 = vld [vmem:[#allocation31_spill] sm:$0xff] }
 0x45d   :  { %v3547_v6 = vsel %vm2244_vm9, %v3543_v7, %v3545_v48  ;;  %v3663_v42 = vpop.permute.xlu2 %3662  ;;  %5125 = vmatmul.msk.bf16.gmra.mxu2 %vm2036_vm6, %v5515_v32  ;;  %v3546_v37 = vsel %vm2244_vm9, %v3539_v41, %v3541_v40  ;;  %v2544_v40 = vadd.f32 %v7861_v18, %v2462_v44  ;;  %v2625_v8 = vadd.f32 %v7867_v22, %v2543_v23  ;;  %v5523_v41 = vld [vmem:[%s8439_s4 + $0x48] sm:$0xff]  ;;  %v5524_v18 = vld [vmem:[%s8439_s4 + $0x70] sm:$0xff] }
 0x45e   :  { %3558 = vmatpush.bf16.msra.mxu0 %v3547_v6  ;;  %v2548_v7 = vadd.f32 %v7871_v3, %v2466_v28  ;;  %v2547_v54 = vadd.f32 %v8775_v10, %v2465_v38  ;;  %v8140_v23 = vld [vmem:[%s8440_s5 + $0x28] sm:$0xff] }
 0x45f   :  { %v2626_v34 = vadd.f32 %v7865_v35, %v2544_v40  ;;  %v2707_v4 = vadd.f32 %v7883_v12, %v2625_v8  ;;  %v8135_v40 = vld [vmem:[%s8440_s5 + $0x8] sm:$0xff] }
 0x460   :  { %v8545_v10 = vunpack.c.h.bf16 %v8135_v40 }
 0x461   :  { %v2708_v35 = vadd.f32 %v7881_v52, %v2626_v34 }
 0x462   :  { %3559 = vmatpush.bf16.msra.mxu0 %v3546_v37 }
 0x464   :  { %v3719_v26 = vpop.permute.xlu1 %3718  ;;  %v3601_v56 = vpop.permute.xlu0 %3600 }
 0x465   :  { %v3721_v21 = vpop.permute.xlu2 %3720  ;;  %3638 = vmatpush.bf16.msra.mxu3 %v3601_v56  ;;  %v3606_v20 = vsel %vm2326_vm10, %v3599_v9, %v3601_v56  ;;  %5136 = vmatmul.msk.bf16.vlgmr.msra.gmra.mxu0 %vm2036_vm6, %v5516_v59  ;;  %v8774_v59 = vld [vmem:[#allocation8_spill] sm:$0xff] }
 0x466   :  { %3619 = vmatpush.bf16.msra.mxu2 %v3606_v20  ;;  %v3726_v53 = vsel %vm2490_vm12, %v3719_v26, %v3721_v21  ;;  %v8777_v26 = vld [vmem:[#allocation22_spill] sm:$0xff] }
 0x467   :  { %v2789_v56 = vadd.f32 %v8777_v26, %v2707_v4 }
 0x46c   :  { %v3725_v51 = vpop.permute.xlu1 %3724  ;;  %v3723_v31 = vpop.permute.xlu0 %3722  ;;  %5134 = vmatmul.msk.bf16.vlgmr.msrb.gmra.mxu3 %vm2036_vm6, %v5517_v60  ;;  %5139 = vmatmul.msk.bf16.gmra.mxu1 %vm2036_vm6, %v5518_v43 }
 0x46d   :  { %v3727_v25 = vsel %vm2490_vm12, %v3723_v31, %v3725_v51  ;;  %v3843_v17 = vpop.permute.xlu2 %3842  ;;  %5132 = vmatmul.msk.bf16.vlgmr.msrb.gmra.mxu2 %vm2036_vm6, %v5517_v60  ;;  %3757 = vmatpush.bf16.msrb.mxu3 %v3725_v51  ;;  %v8779_v31 = vld [vmem:[#allocation18_spill] sm:$0xff] }
 0x46e   :  { %3738 = vmatpush.bf16.msrb.mxu2 %v3727_v25  ;;  %v2629_v60 = vadd.f32 %v8779_v31, %v2547_v54  ;;  %v8542_v54 = vunpack.c.l.bf16 %v8140_v23 }
 0x471   :  { %3758 = vmatpush.bf16.msrb.mxu3 %v3721_v21  ;;  %v8778_v21 = vld [vmem:[#allocation19_spill] sm:$0xff] }
 0x472   :  { %3739 = vmatpush.bf16.msrb.mxu2 %v3726_v53 }
 0x474   :  { %v3661_v47 = vpop.permute.xlu1 %3660  ;;  %v3665_v55 = vpop.permute.xlu0 %3664 }
 0x475   :  { %v3667_v13 = vsel %vm2408_vm11, %v3663_v42, %v3665_v55  ;;  %v3785_v46 = vpop.permute.xlu2 %3784  ;;  %3697 = vmatpush.bf16.msrb.mxu1 %v3665_v55  ;;  %5137 = vmatmul.msk.bf16.gmra.mxu0 %vm2036_vm6, %v5518_v43  ;;  %v8776_v42 = vld [vmem:[#allocation23_spill] sm:$0xff] }
 0x476   :  { %3678 = vmatpush.bf16.msrb.mxu0 %v3667_v13  ;;  %v2790_v37 = vadd.f32 %v8776_v42, %v2708_v35  ;;  %v8780_v43 = vld [vmem:[#allocation27_spill] sm:$0xff]  ;;  %v8791_v35 = vld [vmem:[#allocation6_spill] sm:$0xff] }
 0x478   :  { %v2872_v25 = vadd.f32 %v8780_v43, %v2790_v37 }
 0x479   :  { %3698 = vmatpush.bf16.msrb.mxu1 %v3661_v47 }
 0x47c   :  { %v3783_v63 = vpop.permute.xlu1 %3782  ;;  %v3659_v36 = vpop.permute.xlu0 %3658  ;;  %5135 = vmatmul.msk.bf16.gmra.mxu3 %vm2036_vm6, %v5519_v58  ;;  %5146 = vmatmul.msk.bf16.vlgmr.msrb.gmra.mxu1 %vm2036_vm6, %v5520_v0 }
 0x47d   :  { %3817 = vmatpush.bf16.msra.mxu1 %v3785_v46  ;;  %v3787_v30 = vsel %vm2572_vm13, %v3783_v63, %v3785_v46  ;;  %v3779_v24 = vpop.permute.xlu2 %3778  ;;  %5133 = vmatmul.msk.bf16.gmra.mxu2 %vm2036_vm6, %v5519_v58  ;;  %v3666_v16 = vsel %vm2408_vm11, %v3659_v36, %v3661_v47  ;;  %v8782_v47 = vld [vmem:[#allocation26_spill] sm:$0xff]  ;;  %v8783_v63 = vld [vmem:[#allocation47_spill] sm:$0xff] }
 0x47e   :  { %3679 = vmatpush.bf16.msrb.mxu0 %v3666_v16  ;;  %v2711_v36 = vadd.f32 %v8783_v63, %v2629_v60  ;;  %v8784_v16 = vld [vmem:[#allocation28_spill] sm:$0xff]  ;;  %v8544_v60 = vunpack.c.h.bf16 %v8140_v23 }
 0x482   :  { %3798 = vmatpush.bf16.msra.mxu0 %v3787_v30 }
 0x484   :  { %v3841_v45 = vpop.permute.xlu1 %3840  ;;  %v3839_v49 = vpop.permute.xlu0 %3838 }
 0x485   :  { %v8037_v15 = vpop.permute.xlu2 %3958  ;;  %5144 = vmatmul.msk.bf16.vlgmr.msrb.gmra.mxu0 %vm2036_vm6, %v5520_v0  ;;  %v3846_v39 = vsel %vm2654_vm14, %v3839_v49, %v3841_v45  ;;  %v8785_v49 = vld [vmem:[#allocation50_spill] sm:$0xff] }
 0x48c   :  { %v8040_v57 = vpop.permute.xlu1 %3962  ;;  %v3845_v1 = vpop.permute.xlu0 %3844  ;;  %5142 = vmatmul.msk.bf16.vlgmr.msra.gmra.mxu3 %vm2036_vm6, %v5521_v27  ;;  %5147 = vmatmul.msk.bf16.gmra.mxu1 %vm2036_vm6, %v5522_v61 }
 0x48d   :  { %v3847_v9 = vsel %vm2654_vm14, %v3843_v17, %v3845_v1  ;;  %v8051_v29 = vpop.permute.xlu2 %3964  ;;  %5140 = vmatmul.msk.bf16.vlgmr.msra.gmra.mxu2 %vm2036_vm6, %v5521_v27  ;;  %3877 = vmatpush.bf16.msra.mxu3 %v3845_v1  ;;  %v8781_v17 = vld [vmem:[#allocation32_spill] sm:$0xff]  ;;  %v2793_v1 = vadd.f32 %v8785_v49, %v2711_v36 }
 0x48e   :  { %3858 = vmatpush.bf16.msra.mxu2 %v3847_v9  ;;  %v2871_v53 = vadd.f32 %v8781_v17, %v2789_v56  ;;  %v8120_v9 = vld [vmem:[%s8440_s5 + $0x10] sm:$0xff] }
 0x48f   :  { %8786 = vst [vmem:[#allocation36_spill] sm:$0xff] %v8120_v9 }
 0x491   :  { %3878 = vmatpush.bf16.msra.mxu3 %v3841_v45 }
 0x492   :  { %3859 = vmatpush.bf16.msra.mxu2 %v3846_v39  ;;  %v8125_v39 = vld [vmem:[%s8440_s5 + $0x30] sm:$0xff] }
 0x493   :  { %8787 = vst [vmem:[#allocation10_spill] sm:$0xff] %v8125_v39  ;;  %v8539_v56 = vunpack.c.l.bf16 %v8125_v39 }
 0x494   :  { %v3905_v5 = vpop.permute.xlu1 %3904  ;;  %v3781_v33 = vpop.permute.xlu0 %3780 }
 0x495   :  { %v3901_v48 = vpop.permute.xlu2 %3900  ;;  %3818 = vmatpush.bf16.msra.mxu1 %v3781_v33  ;;  %v3786_v62 = vsel %vm2572_vm13, %v3779_v24, %v3781_v33  ;;  %5145 = vmatmul.msk.bf16.gmra.mxu0 %vm2036_vm6, %v5522_v61  ;;  %v8788_v33 = vld [vmem:[#allocation7_spill] sm:$0xff] }
 0x496   :  { %3799 = vmatpush.bf16.msra.mxu0 %v3786_v62  ;;  %v3967_v62 = vsel %vm2818_vm0, %v8040_v57, %v8051_v29  ;;  %v5526_v57 = vld [vmem:[%s8439_s4 + $0x78] sm:$0xff] }
 0x499   :  { %3937 = vmatpush.bf16.msrb.mxu1 %v3905_v5 }
 0x49c   :  { %v3899_v50 = vpop.permute.xlu1 %3898  ;;  %v3903_v11 = vpop.permute.xlu0 %3902  ;;  %5143 = vmatmul.msk.bf16.gmra.mxu3 %vm2036_vm6, %v5523_v41  ;;  %5154 = vmatmul.msk.bf16.vlgmr.msra.gmra.mxu1 %vm2036_vm6, %v5524_v18 }
 0x49d   :  { %3938 = vmatpush.bf16.msrb.mxu1 %v3901_v48  ;;  %v3907_v2 = vsel %vm2736_vm15, %v3903_v11, %v3905_v5  ;;  %v8080_v22 = vpop.permute.xlu2 %2894  ;;  %5141 = vmatmul.msk.bf16.gmra.mxu2 %vm2036_vm6, %v5523_v41  ;;  %v3906_v3 = vsel %vm2736_vm15, %v3899_v50, %v3901_v48  ;;  %v2875_v48 = vadd.f32 %v8789_v14, %v2793_v1  ;;  %v5525_v50 = vld [vmem:[%s8439_s4 + $0x60] sm:$0xff]  ;;  %v8540_v11 = vunpack.c.h.bf16 %v8120_v9 }
 0x49e   :  { %v8086_v32 = vadd.f32 %v8080_v22, %v7909_v19  ;;  %v8090_v6 = vadd.f32 %v8080_v22, %v8774_v59  ;;  %3918 = vmatpush.bf16.msrb.mxu0 %v3907_v2  ;;  %v2630_v19 = vadd.f32 %v8778_v21, %v2548_v7  ;;  %v8541_v41 = vunpack.c.h.bf16 %v8125_v39 }
 0x49f   :  { %v8543_v59 = vunpack.c.l.bf16 %v8135_v40 }
 0x4a0   :  { %v2922_v52 = vmin.f32 %v8086_v32, 0.0  ;;  %v2923_v12 = vmin.f32 %v8090_v6, 0.0  ;;  %v2712_v55 = vadd.f32 %v8782_v47, %v2630_v19  ;;  %vm2914_vm8 = vcmp.gt.f32.partialorder %v8086_v32, 0.0 }
 0x4a1   :  { %vm2915_vm9 = vcmp.gt.f32.partialorder %v8090_v6, 0.0 }
 0x4a2   :  { %v2934_v20 = vmul.f32 1.442695, %v2922_v52  ;;  %v2936_v51 = vmul.f32 1.442695, %v2923_v12  ;;  %3919 = vmatpush.bf16.msrb.mxu0 %v3906_v3  ;;  %v2794_v45 = vadd.f32 %v8784_v16, %v2712_v55 }
 0x4a4   :  { %5480 = vpow2.f32 %v2936_v51  ;;  %v8103_v13 = vpop.permute.xlu1 %2889  ;;  %v3961_v46 = vpop.permute.xlu0 %3960  ;;  %v2876_v44 = vadd.f32 %v8788_v33, %v2794_v45 }
 0x4a5   :  { %v8107_v58 = vadd.f32 %v8103_v13, %v2871_v53  ;;  %v8110_v0 = vadd.f32 %v8103_v13, %v2872_v25  ;;  %5152 = vmatmul.msk.bf16.vlgmr.msra.gmra.mxu0 %vm2036_vm6, %v5524_v18  ;;  %5482 = vpow2.f32 %v2934_v20  ;;  %v8790_v18 = vld [vmem:[#allocation5_spill] sm:$0xff]  ;;  %v3966_v42 = vsel %vm2818_vm0, %v8037_v15, %v3961_v46 }
 0x4a7   :  { %v2920_v30 = vmin.f32 %v8107_v58, 0.0  ;;  %v2921_v24 = vmin.f32 %v8110_v0, 0.0  ;;  %vm2913_vm10 = vcmp.gt.f32.partialorder %v8110_v0, 0.0  ;;  %vm2912_vm11 = vcmp.gt.f32.partialorder %v8107_v58, 0.0 }
 0x4a9   :  { %v2930_v27 = vmul.f32 1.442695, %v2920_v30  ;;  %v2932_v61 = vmul.f32 1.442695, %v2921_v24 }
 0x4aa   :  { %v5481_v5 = vpop.eup %5480 }
 0x4ab   :  { %5484 = vpow2.f32 %v2932_v61  ;;  %v5121_v34 = vadd.f32 -1.0, %v5481_v5  ;;  %v5483_v8 = vpop.eup %5482  ;;  %v8216_v61 = vld [vmem:[%s8440_s5 + $0x20] sm:$0xff] }
 0x4ac   :  { %v8142_v28 = vpop.permute.xlu0 %2884  ;;  %5150 = vmatmul.msk.bf16.vlgmr.msrb.gmra.mxu3 %vm2036_vm6, %v5525_v50  ;;  %5486 = vpow2.f32 %v2930_v27  ;;  %5155 = vmatmul.msk.bf16.gmra.mxu1 %vm2036_vm6, %v5526_v57  ;;  %v5120_v2 = vadd.f32 -1.0, %v5483_v8 }
 0x4ad   :  { %v8156_v38 = vadd.f32 %v8142_v28, %v8790_v18  ;;  %v8160_v4 = vadd.f32 %v8142_v28, %v8791_v35  ;;  %3997 = vmatpush.bf16.msrb.mxu3 %v8051_v29  ;;  %5148 = vmatmul.msk.bf16.vlgmr.msrb.gmra.mxu2 %vm2036_vm6, %v5525_v50  ;;  %v2955_v7 = vmul.f32 0.001, %v5121_v34  ;;  %v8538_v29 = vunpack.c.l.bf16 %v8120_v9 }
 0x4ae   :  { %3978 = vmatpush.bf16.msrb.mxu2 %v3967_v62  ;;  %v2954_v37 = vmul.f32 0.001, %v5120_v2  ;;  %v8549_v18 = vunpack.c.h.bf16 %v8216_v61 }
 0x4af   :  { %v2918_v52 = vmin.f32 %v8156_v38, 0.0  ;;  %v2919_v12 = vmin.f32 %v8160_v4, 0.0  ;;  %v2963_v26 = vsel %vm2915_vm9, %v8090_v6, %v2955_v7  ;;  %vm2911_vm12 = vcmp.gt.f32.partialorder %v8160_v4, 0.0 }
 0x4b0   :  { %v2995_v20 = vmul.f32 %v8540_v11, %v2963_v26  ;;  %v3003_v51 = vmul.f32 %v8541_v41, %v2963_v26  ;;  %v2962_v6 = vsel %vm2914_vm8, %v8086_v32, %v2954_v37  ;;  %vm2910_vm13 = vcmp.gt.f32.partialorder %v8156_v38, 0.0 }
 0x4b1   :  { %v5485_v3 = vpop.eup %5484  ;;  %v2926_v21 = vmul.f32 1.442695, %v2918_v52  ;;  %v2928_v19 = vmul.f32 1.442695, %v2919_v12  ;;  %3998 = vmatpush.bf16.msrb.mxu3 %v3961_v46  ;;  %v2994_v25 = vmul.f32 %v8538_v29, %v2962_v6  ;;  %v3002_v55 = vmul.f32 %v8539_v56, %v2962_v6  ;;  %v5527_v52 = vld [vmem:[%s8439_s4 + $0x68] sm:$0xff]  ;;  %v8259_v6 = vld [vmem:[%s8440_s5 + $0x18] sm:$0xff] }
 0x4b2   :  { %v5487_v31 = vpop.eup %5486  ;;  %3979 = vmatpush.bf16.msrb.mxu2 %v3966_v42  ;;  %v5119_v15 = vadd.f32 -1.0, %v5485_v3  ;;  %v3015_v17 = vsel %vm3006_vm7, %v2995_v20, 0.0  ;;  %v3031_v46 = vsel %vm3006_vm7, %v3003_v51, 0.0  ;;  %v8547_v42 = vunpack.c.l.bf16 %v8216_v61  ;;  %v5528_v3 = vld [vmem:[%s8439_s4 + $0x90] sm:$0xff]  ;;  %8792 = vst [vmem:[#allocation9_spill] sm:$0xff] %v8259_v6 }
 0x4b3   :  { %5488 = vpow2.f32 %v2928_v19  ;;  %v5118_v43 = vadd.f32 -1.0, %v5487_v31  ;;  %v8200_v30 = vadd.f32 %v3015_v17, %v2994_v25  ;;  %v8206_v16 = vadd.f32 %v3031_v46, %v3002_v55 }
 0x4b4   :  { %v8188_v53 = vpop.permute.xlu0 %2899  ;;  %v2953_v47 = vmul.f32 0.001, %v5119_v15  ;;  %5490 = vpow2.f32 %v2926_v21  ;;  %vm3056_vm9 = vcmask 195712  }
 0x4b5   :  { %v8194_v63 = vadd.f32 %v8188_v53, %v2875_v48  ;;  %v8197_v32 = vadd.f32 %v8188_v53, %v2876_v44  ;;  %v2952_v36 = vmul.f32 0.001, %v5118_v43  ;;  %5153 = vmatmul.msk.bf16.gmra.mxu0 %vm2036_vm6, %v5526_v57 }
 0x4b6   :  { %v2961_v24 = vsel %vm2913_vm10, %v8110_v0, %v2953_v47  ;;  %vm3060_vm10 = vcmask 261312  }
 0x4b7   :  { %v2924_v45 = vmin.f32 %v8194_v63, 0.0  ;;  %v2925_v49 = vmin.f32 %v8197_v32, 0.0  ;;  %v2960_v1 = vsel %vm2912_vm11, %v8107_v58, %v2952_v36  ;;  %v2993_v27 = vmul.f32 %v8545_v10, %v2961_v24  ;;  %v8227_v58 = vld [vmem:[%s8440_s5] sm:$0xff]  ;;  %v3468_v36 = vpop.f32.mrf.mxu1 }
 0x4b8   :  { %v2992_v5 = vmul.f32 %v8543_v59, %v2960_v1  ;;  %v3000_v0 = vmul.f32 %v8542_v54, %v2960_v1  ;;  %v3001_v33 = vmul.f32 %v8544_v60, %v2961_v24  ;;  %v8548_v7 = vunpack.c.h.bf16 %v8227_v58  ;;  %v3449_v1 = vpop.f32.mrf.mxu0 }
 0x4b9   :  { %v5489_v44 = vpop.eup %5488  ;;  %v2938_v14 = vmul.f32 1.442695, %v2924_v45  ;;  %v2940_v48 = vmul.f32 1.442695, %v2925_v49  ;;  %v3011_v62 = vsel %vm3006_vm7, %v2993_v27, 0.0  ;;  %v8546_v37 = vunpack.c.l.bf16 %v8227_v58 }
 0x4ba   :  { %v5491_v34 = vpop.eup %5490  ;;  %v3012_v8 = vadd.f32 %v3011_v62, %v2992_v5  ;;  %v3027_v50 = vsel %vm3006_vm7, %v3001_v33, 0.0  ;;  %v5117_v57 = vadd.f32 -1.0, %v5489_v44  ;;  %v8537_v45 = vunpack.c.h.bf16 %v8259_v6 }
 0x4bb   :  { %5492 = vpow2.f32 %v2940_v48  ;;  %v3028_v35 = vadd.f32 %v3027_v50, %v3000_v0  ;;  %v5116_v2 = vadd.f32 -1.0, %v5491_v34  ;;  %v8535_v5 = vunpack.c.l.bf16 %v8259_v6 }
 0x4bc   :  { %5151 = vmatmul.msk.bf16.gmra.mxu3 %vm2036_vm6, %v5527_v52  ;;  %3013 = vadd.xlane.f32.xlu2 %v3012_v8  ;;  %v2951_v12 = vmul.f32 0.001, %v5117_v57  ;;  %5494 = vpow2.f32 %v2938_v14  ;;  %vm2917_vm14 = vcmp.gt.f32.partialorder %v8197_v32, 0.0  ;;  %vm2916_vm15 = vcmp.gt.f32.partialorder %v8194_v63, 0.0 }
 0x4bd   :  { %5149 = vmatmul.msk.bf16.gmra.mxu2 %vm2036_vm6, %v5527_v52  ;;  %v2950_v26 = vmul.f32 0.001, %v5116_v2  ;;  %5162 = vmatmul.msk.bf16.vlgmr.msrb.gmra.mxu1 %vm2036_vm6, %v5528_v3  ;;  %vm3069_vm11 = vcmask 1041409  }
 0x4be   :  { %v2959_v21 = vsel %vm2911_vm12, %v8160_v4, %v2951_v12  ;;  %v5530_v12 = vld [vmem:[%s8439_s4 + $0x98] sm:$0xff]  ;;  %vm3072_vm12 = vcmask 254976  }
 0x4bf   :  { %v2958_v19 = vsel %vm2910_vm13, %v8156_v38, %v2950_v26  ;;  %v2999_v20 = vmul.f32 %v8549_v18, %v2959_v21  ;;  %v2991_v51 = vmul.f32 %v8548_v7, %v2959_v21  ;;  %v8264_v38 = vld [vmem:[%s8440_s5 + $0x38] sm:$0xff]  ;;  %v3470_v2 = vpop.f32.mrf.mxu1  ;;  %vm4163_vm13 = vcmask 1040384  }
 0x4c0   :  { %v2998_v31 = vmul.f32 %v8547_v42, %v2958_v19  ;;  %v2990_v15 = vmul.f32 %v8546_v37, %v2958_v19  ;;  %8793 = vst [vmem:[#allocation35_spill] sm:$0xff] %v8264_v38  ;;  %v8536_v49 = vunpack.c.h.bf16 %v8264_v38  ;;  %v8534_v0 = vunpack.c.l.bf16 %v8264_v38  ;;  %v3451_v52 = vpop.f32.mrf.mxu0 }
 0x4c1   :  { %v5493_v4 = vpop.eup %5492  ;;  %v3023_v43 = vsel %vm3006_vm7, %v2999_v20, 0.0  ;;  %v3007_v25 = vsel %vm3006_vm7, %v2991_v51, 0.0 }
 0x4c2   :  { %v5495_v17 = vpop.eup %5494  ;;  %v3024_v47 = vadd.f32 %v3023_v43, %v2998_v31  ;;  %v3008_v55 = vadd.f32 %v3007_v25, %v2990_v15  ;;  %v5123_v46 = vadd.f32 -1.0, %v5493_v4  ;;  %v5531_v4 = vld [vmem:[%s8439_s4 + $0x88] sm:$0xff] }
 0x4c3   :  { %v5122_v24 = vadd.f32 -1.0, %v5495_v17 }
 0x4c4   :  { %3029 = vadd.xlane.f32.xlu2 %v3028_v35  ;;  %3025 = vadd.xlane.f32.xlu0 %v3024_v47  ;;  %v2957_v27 = vmul.f32 0.001, %v5123_v46 }
 0x4c5   :  { %3009 = vadd.xlane.f32.xlu1 %v3008_v55  ;;  %v2956_v33 = vmul.f32 0.001, %v5122_v24  ;;  %5160 = vmatmul.msk.bf16.vlgmr.msrb.gmra.mxu0 %vm2036_vm6, %v5528_v3 }
 0x4c6   :  { %v2965_v44 = vsel %vm2917_vm14, %v8197_v32, %v2957_v27  ;;  %vm4170_vm14 = vcmask 9216  }
 0x4c7   :  { %v2964_v14 = vsel %vm2916_vm15, %v8194_v63, %v2956_v33  ;;  %v2997_v48 = vmul.f32 %v8537_v45, %v2965_v44  ;;  %v3005_v62 = vmul.f32 %v8536_v49, %v2965_v44  ;;  %v5529_v63 = vld [vmem:[%s8439_s4 + $0x80] sm:$0xff]  ;;  %v3473_v20 = vpop.f32.mrf.mxu1 }
 0x4c8   :  { %v2996_v34 = vmul.f32 %v8535_v5, %v2964_v14  ;;  %v3004_v8 = vmul.f32 %v8534_v0, %v2964_v14  ;;  %v3454_v31 = vpop.f32.mrf.mxu0  ;;  %v5532_v14 = vld [vmem:[%s8439_s4 + $0xa0] sm:$0xff] }
 0x4c9   :  { %v3019_v50 = vsel %vm3006_vm7, %v2997_v48, 0.0  ;;  %v3035_v57 = vsel %vm3006_vm7, %v3005_v62, 0.0 }
 0x4ca   :  { %v3020_v35 = vadd.f32 %v3019_v50, %v2996_v34  ;;  %v8287_v32 = vadd.f32 %v3035_v57, %v3004_v8 }
 0x4cc   :  { %8794 = vst [vmem:[#allocation41_spill] sm:$0xff] %v8287_v32  ;;  %5158 = vmatmul.msk.bf16.vlgmr.msra.gmra.mxu3 %vm2036_vm6, %v5529_v63  ;;  %3017 = vadd.xlane.f32.xlu2 %v8200_v30 }
 0x4cd   :  { %3033 = vadd.xlane.f32.xlu0 %v8206_v16  ;;  %5156 = vmatmul.msk.bf16.vlgmr.msra.gmra.mxu2 %vm2036_vm6, %v5529_v63 }
 0x4ce   :  { %5163 = vmatmul.msk.bf16.gmra.mxu1 %vm2036_vm6, %v5530_v12 }
 0x4cf   :  { %v3426_v26 = vpop.f32.mrf.mxu3  ;;  %v3475_v55 = vpop.f32.mrf.mxu1 }
 0x4d0   :  { %v3407_v3 = vpop.f32.mrf.mxu2  ;;  %v3469_v21 = vadd.f32 %v3468_v36, %v3426_v26  ;;  %v3456_v46 = vpop.f32.mrf.mxu0 }
 0x4d1   :  { %v3450_v19 = vadd.f32 %v3449_v1, %v3407_v3 }
 0x4d5   :  { %3021 = vadd.xlane.f32.xlu0 %v3020_v35  ;;  %5161 = vmatmul.msk.bf16.gmra.mxu0 %vm2036_vm6, %v5530_v12 }
 0x4d7   :  { %v3428_v30 = vpop.f32.mrf.mxu3 }
 0x4d8   :  { %v3409_v16 = vpop.f32.mrf.mxu2  ;;  %v3471_v51 = vadd.f32 %v3470_v2, %v3428_v30 }
 0x4d9   :  { %v3452_v15 = vadd.f32 %v3451_v52, %v3409_v16  ;;  %v3580_v33 = vpop.f32.mrf.mxu1 }
 0x4dc   :  { %5159 = vmatmul.msk.bf16.gmra.mxu3 %vm2036_vm6, %v5531_v4 }
 0x4dd   :  { %5157 = vmatmul.msk.bf16.gmra.mxu2 %vm2036_vm6, %v5531_v4 }
 0x4df   :  { %v3431_v43 = vpop.f32.mrf.mxu3 }
 0x4e0   :  { %v3412_v25 = vpop.f32.mrf.mxu2  ;;  %v3474_v17 = vadd.f32 %v3473_v20, %v3431_v43  ;;  %v5533_v20 = vld [vmem:[%s8439_s4 + $0xa8] sm:$0xff] }
 0x4e1   :  { %v3455_v47 = vadd.f32 %v3454_v31, %v3412_v25  ;;  %v3582_v35 = vpop.f32.mrf.mxu1 }
 0x4e2   :  { %v3561_v44 = vpop.f32.mrf.mxu0 }
 0x4e7   :  { %v3433_v36 = vpop.f32.mrf.mxu3 }
 0x4e8   :  { %v3414_v24 = vpop.f32.mrf.mxu2  ;;  %v3476_v1 = vadd.f32 %v3475_v55, %v3433_v36 }
 0x4e9   :  { %v3457_v27 = vadd.f32 %v3456_v46, %v3414_v24 }
 0x4ea   :  { %v3563_v63 = vpop.f32.mrf.mxu0 }
 0x4ec   :  { %5166 = vmatmul.msk.bf16.vlgmr.msrb.gmra.mxu3 %vm2036_vm6, %v5532_v14 }
 0x4ed   :  { %5164 = vmatmul.msk.bf16.vlgmr.msrb.gmra.mxu2 %vm2036_vm6, %v5532_v14 }
 0x4ef   :  { %v3520_v48 = vpop.f32.mrf.mxu3 }
 0x4f0   :  { %v3531_v62 = vadd.f32 %v3520_v48, %v3469_v21  ;;  %v3501_v34 = vpop.f32.mrf.mxu2  ;;  %v3585_v21 = vpop.f32.mrf.mxu1 }
 0x4f1   :  { %v3530_v8 = vadd.f32 %v3501_v34, %v3450_v19 }
 0x4f2   :  { %v3591_v50 = vadd.f32 %v3580_v33, %v3531_v62  ;;  %v3566_v19 = vpop.f32.mrf.mxu0 }
 0x4f3   :  { %v3590_v57 = vadd.f32 %v3561_v44, %v3530_v8 }
 0x4f7   :  { %v3522_v2 = vpop.f32.mrf.mxu3 }
 0x4f8   :  { %v3533_v52 = vadd.f32 %v3522_v2, %v3471_v51  ;;  %v3503_v12 = vpop.f32.mrf.mxu2 }
 0x4f9   :  { %v3532_v26 = vadd.f32 %v3503_v12, %v3452_v15  ;;  %v3587_v15 = vpop.f32.mrf.mxu1 }
 0x4fa   :  { %v3593_v3 = vadd.f32 %v3582_v35, %v3533_v52  ;;  %v3568_v24 = vpop.f32.mrf.mxu0 }
 0x4fb   :  { %v3592_v30 = vadd.f32 %v3563_v63, %v3532_v26 }
 0x4fc   :  { %5167 = vmatmul.msk.bf16.gmra.mxu3 %vm2036_vm6, %v5533_v20 }
 0x4fd   :  { %5165 = vmatmul.msk.bf16.gmra.mxu2 %vm2036_vm6, %v5533_v20 }
 0x4ff   :  { %v3525_v16 = vpop.f32.mrf.mxu3 }
 0x500   :  { %v3535_v31 = vadd.f32 %v3525_v16, %v3474_v17  ;;  %v3506_v4 = vpop.f32.mrf.mxu2 }
 0x501   :  { %v3534_v43 = vadd.f32 %v3506_v4, %v3455_v47  ;;  %v3700_v35 = vpop.f32.mrf.mxu1 }
 0x502   :  { %v3595_v25 = vadd.f32 %v3585_v21, %v3535_v31  ;;  %v3681_v63 = vpop.f32.mrf.mxu0 }
 0x503   :  { %v3594_v51 = vadd.f32 %v3566_v19, %v3534_v43 }
 0x507   :  { %v3527_v55 = vpop.f32.mrf.mxu3 }
 0x508   :  { %v3537_v46 = vadd.f32 %v3527_v55, %v3476_v1  ;;  %v3508_v36 = vpop.f32.mrf.mxu2 }
 0x509   :  { %v3536_v33 = vadd.f32 %v3508_v36, %v3457_v27  ;;  %v3702_v12 = vpop.f32.mrf.mxu1 }
 0x50a   :  { %v3597_v44 = vadd.f32 %v3587_v15, %v3537_v46  ;;  %v3683_v20 = vpop.f32.mrf.mxu0 }
 0x50b   :  { %v3596_v14 = vadd.f32 %v3568_v24, %v3536_v33 }
 0x50f   :  { %v3640_v48 = vpop.f32.mrf.mxu3 }
 0x510   :  { %v3651_v62 = vadd.f32 %v3640_v48, %v3591_v50  ;;  %v3621_v34 = vpop.f32.mrf.mxu2 }
 0x511   :  { %v3650_v8 = vadd.f32 %v3621_v34, %v3590_v57  ;;  %v3705_v27 = vpop.f32.mrf.mxu1 }
 0x512   :  { %v3686_v57 = vpop.f32.mrf.mxu0  ;;  %v3711_v45 = vadd.f32 %v3700_v35, %v3651_v62 }
 0x513   :  { %v3710_v29 = vadd.f32 %v3681_v63, %v3650_v8 }
 0x517   :  { %v3642_v2 = vpop.f32.mrf.mxu3 }
 0x518   :  { %v3653_v17 = vadd.f32 %v3642_v2, %v3593_v3  ;;  %v3623_v52 = vpop.f32.mrf.mxu2 }
 0x519   :  { %v3652_v47 = vadd.f32 %v3623_v52, %v3592_v30  ;;  %v8320_v15 = vpop.f32.mrf.mxu1 }
 0x51a   :  { %v8322_v3 = vpop.f32.mrf.mxu0  ;;  %v3713_v37 = vadd.f32 %v3702_v12, %v3653_v17 }
 0x51b   :  { %v3712_v18 = vadd.f32 %v3683_v20, %v3652_v47 }
 0x51f   :  { %v3645_v26 = vpop.f32.mrf.mxu3 }
 0x520   :  { %v3655_v21 = vadd.f32 %v3645_v26, %v3595_v25  ;;  %v3626_v1 = vpop.f32.mrf.mxu2 }
 0x521   :  { %v3654_v19 = vadd.f32 %v3626_v1, %v3594_v51  ;;  %v3820_v36 = vpop.f32.mrf.mxu1 }
 0x522   :  { %v3801_v25 = vpop.f32.mrf.mxu0  ;;  %v3715_v63 = vadd.f32 %v3705_v27, %v3655_v21 }
 0x527   :  { %v3647_v16 = vpop.f32.mrf.mxu3 }
 0x528   :  { %v8316_v31 = vadd.f32 %v3647_v16, %v3597_v44  ;;  %v3628_v4 = vpop.f32.mrf.mxu2 }
 0x529   :  { %v8318_v50 = vadd.f32 %v3628_v4, %v3596_v14  ;;  %v3822_v33 = vpop.f32.mrf.mxu1 }
 0x52a   :  { %v3803_v44 = vpop.f32.mrf.mxu0  ;;  %v3717_v21 = vadd.f32 %v8320_v15, %v8316_v31 }
 0x52f   :  { %v3760_v43 = vpop.f32.mrf.mxu3 }
 0x530   :  { %v3741_v55 = vpop.f32.mrf.mxu2  ;;  %v3771_v56 = vadd.f32 %v3760_v43, %v3711_v45 }
 0x531   :  { %v3825_v2 = vpop.f32.mrf.mxu1  ;;  %v3770_v41 = vadd.f32 %v3741_v55, %v3710_v29 }
 0x532   :  { %v3806_v26 = vpop.f32.mrf.mxu0  ;;  %v3831_v60 = vadd.f32 %v3820_v36, %v3771_v56 }
 0x533   :  { %v3830_v42 = vadd.f32 %v3801_v25, %v3770_v41  ;;  %v3714_v41 = vadd.f32 %v3686_v57, %v3654_v19 }
 0x537   :  { %v3762_v30 = vpop.f32.mrf.mxu3 }
 0x538   :  { %v3743_v46 = vpop.f32.mrf.mxu2  ;;  %v3773_v32 = vadd.f32 %v3762_v30, %v3713_v37 }
 0x539   :  { %v8328_v4 = vpop.f32.mrf.mxu1  ;;  %v3772_v6 = vadd.f32 %v3743_v46, %v3712_v18  ;;  %v3716_v46 = vadd.f32 %v8322_v3, %v8318_v50 }
 0x53a   :  { %v8330_v0 = vpop.f32.mrf.mxu0  ;;  %v3833_v8 = vadd.f32 %v3822_v33, %v3773_v32 }
 0x53b   :  { %v3832_v55 = vadd.f32 %v3803_v44, %v3772_v6 }
 0x53f   :  { %v3765_v24 = vpop.f32.mrf.mxu3 }
 0x540   :  { %v3746_v51 = vpop.f32.mrf.mxu2 }
 0x541   :  { %v3940_v11 = vpop.f32.mrf.mxu1 }
 0x542   :  { %v3921_v54 = vpop.f32.mrf.mxu0 }
 0x547   :  { %v8324_v48 = vpop.f32.mrf.mxu3 }
 0x548   :  { %v8326_v34 = vpop.f32.mrf.mxu2  ;;  %v3777_v25 = vadd.f32 %v8324_v48, %v3717_v21 }
 0x549   :  { %v3942_v39 = vpop.f32.mrf.mxu1  ;;  %v3776_v31 = vadd.f32 %v8326_v34, %v3716_v46 }
 0x54a   :  { %v3923_v35 = vpop.f32.mrf.mxu0 }
 0x54f   :  { %v3880_v14 = vpop.f32.mrf.mxu3 }
 0x550   :  { %v3861_v52 = vpop.f32.mrf.mxu2  ;;  %v3891_v7 = vadd.f32 %v3880_v14, %v3831_v60  ;;  %v3775_v60 = vadd.f32 %v3765_v24, %v3715_v63 }
 0x551   :  { %v3890_v38 = vadd.f32 %v3861_v52, %v3830_v42  ;;  %v3945_v12 = vpop.f32.mrf.mxu1 }
 0x552   :  { %v3951_v9 = vadd.f32 %v3940_v11, %v3891_v7  ;;  %v3774_v11 = vadd.f32 %v3746_v51, %v3714_v41  ;;  %v3926_v30 = vpop.f32.mrf.mxu0 }
 0x553   :  { %v3950_v45 = vadd.f32 %v3921_v54, %v3890_v38  ;;  %v3835_v54 = vadd.f32 %v3825_v2, %v3775_v60  ;;  %v3837_v2 = vadd.f32 %v8328_v4, %v3777_v25  ;;  %v8796_v60 = vunpack.c.h.bf16 %v8227_v58 }
 0x554   :  { %v3834_v19 = vadd.f32 %v3806_v26, %v3774_v11 }
 0x557   :  { %v3882_v1 = vpop.f32.mrf.mxu3 }
 0x558   :  { %v3863_v16 = vpop.f32.mrf.mxu2  ;;  %v3893_v56 = vadd.f32 %v3882_v1, %v3833_v8  ;;  %v3836_v1 = vadd.f32 %v8330_v0, %v3776_v31 }
 0x559   :  { %v3892_v47 = vadd.f32 %v3863_v16, %v3832_v55  ;;  %v3947_v8 = vpop.f32.mrf.mxu1 }
 0x55a   :  { %v3953_v7 = vadd.f32 %v3942_v39, %v3893_v56 }
 0x55f   :  { %v3885_v5 = vpop.f32.mrf.mxu3 }
 0x560   :  { %v3866_v49 = vpop.f32.mrf.mxu2  ;;  %v3895_v57 = vadd.f32 %v3885_v5, %v3835_v54 }
 0x561   :  { %v3894_v24 = vadd.f32 %v3866_v49, %v3834_v19 }
 0x562   :  { %v3955_v15 = vadd.f32 %v3945_v12, %v3895_v57 }
 0x563   :  { %v3954_v3 = vadd.f32 %v3926_v30, %v3894_v24 }
 0x567   :  { %v8332_v59 = vpop.f32.mrf.mxu3 }
 0x568   :  { %v8334_v10 = vpop.f32.mrf.mxu2 }
 0x56f   :  { %v4000_v62 = vpop.f32.mrf.mxu3 }
 0x570   :  { %v4011_v29 = vadd.f32 %v4000_v62, %v3951_v9  ;;  %v3981_v43 = vpop.f32.mrf.mxu2  ;;  %v3952_v9 = vadd.f32 %v3923_v35, %v3892_v47  ;;  %v3896_v35 = vadd.f32 %v8334_v10, %v3836_v1 }
 0x571   :  { %v4010_v17 = vadd.f32 %v3981_v43, %v3950_v45  ;;  %v3928_v43 = vpop.f32.mrf.mxu0 }
 0x572   :  { %v4019_v36 = vadd.f32 %v4011_v29, %v8142_v28 }
 0x573   :  { %v4018_v18 = vadd.f32 %v4010_v17, %v8142_v28 }
 0x574   :  { %v4035_v37 = vmin.f32 %v4019_v36, 0.0  ;;  %vm4027_vm6 = vcmp.gt.f32.partialorder %v4019_v36, 0.0 }
 0x575   :  { %v4034_v32 = vmin.f32 %v4018_v18, 0.0  ;;  %vm4026_vm0 = vcmp.gt.f32.partialorder %v4018_v18, 0.0 }
 0x576   :  { %v4044_v42 = vmul.f32 1.442695, %v4035_v37 }
 0x577   :  { %v4002_v38 = vpop.f32.mrf.mxu3  ;;  %v4042_v6 = vmul.f32 1.442695, %v4034_v32 }
 0x578   :  { %5496 = vpow2.f32 %v4044_v42  ;;  %v4013_v20 = vadd.f32 %v4002_v38, %v3953_v7  ;;  %v3983_v27 = vpop.f32.mrf.mxu2  ;;  %v8798_v38 = vunpack.c.l.bf16 %v8227_v58 }
 0x579   :  { %5498 = vpow2.f32 %v4042_v6  ;;  %v4012_v39 = vadd.f32 %v3983_v27, %v3952_v9 }
 0x57a   :  { %v8341_v28 = vadd.f32 %v4013_v20, %v8103_v13 }
 0x57b   :  { %v8348_v33 = vadd.f32 %v4012_v39, %v8103_v13  ;;  %v3897_v13 = vadd.f32 %v8332_v59, %v3837_v2  ;;  %v8795_v59 = vunpack.c.h.bf16 %v8216_v61 }
 0x57c   :  { %v4037_v51 = vmin.f32 %v8341_v28, 0.0  ;;  %vm4029_vm3 = vcmp.gt.f32.partialorder %v8341_v28, 0.0 }
 0x57d   :  { %v4036_v14 = vmin.f32 %v8348_v33, 0.0  ;;  %v3957_v17 = vadd.f32 %v3947_v8, %v3897_v13  ;;  %vm4028_vm4 = vcmp.gt.f32.partialorder %v8348_v33, 0.0 }
 0x57e   :  { %v5497_v5 = vpop.eup %5496  ;;  %v4048_v44 = vmul.f32 1.442695, %v4037_v51  ;;  %v8799_v51 = vunpack.c.h.bf16 %v8135_v40 }
 0x57f   :  { %v5169_v52 = vadd.f32 -1.0, %v5497_v5  ;;  %v4005_v26 = vpop.f32.mrf.mxu3  ;;  %v5499_v50 = vpop.eup %5498  ;;  %v4046_v49 = vmul.f32 1.442695, %v4036_v14 }
 0x580   :  { %5500 = vpow2.f32 %v4048_v44  ;;  %v4015_v48 = vadd.f32 %v4005_v26, %v3955_v15  ;;  %v3986_v16 = vpop.f32.mrf.mxu2  ;;  %v5168_v34 = vadd.f32 -1.0, %v5499_v50  ;;  %v8800_v15 = vunpack.c.h.bf16 %v8140_v23 }
 0x581   :  { %v4067_v62 = vmul.f32 0.001, %v5169_v52  ;;  %5502 = vpow2.f32 %v4046_v49  ;;  %v4014_v4 = vadd.f32 %v3986_v16, %v3954_v3  ;;  %v8801_v26 = vunpack.c.l.bf16 %v8135_v40 }
 0x582   :  { %v8356_v45 = vadd.f32 %v4015_v48, %v8080_v22  ;;  %v4066_v29 = vmul.f32 0.001, %v5168_v34 }
 0x583   :  { %v4075_v63 = vsel %vm4027_vm6, %v4019_v36, %v4067_v62  ;;  %v8361_v0 = vadd.f32 %v4014_v4, %v8080_v22  ;;  %v8797_v36 = vunpack.c.l.bf16 %v8216_v61  ;;  %v3956_v22 = vadd.f32 %v3928_v43, %v3896_v35 }
 0x584   :  { %v4039_v55 = vmin.f32 %v8356_v45, 0.0  ;;  %v4091_v56 = vmul.f32 %v4075_v63, %v8795_v59  ;;  %v4074_v41 = vsel %vm4026_vm0, %v4018_v18, %v4066_v29  ;;  %v4083_v47 = vmul.f32 %v4075_v63, %v8796_v60  ;;  %v8805_v29 = vld [vmem:[#allocation36_spill] sm:$0xff] }
 0x585   :  { %v4038_v10 = vmin.f32 %v8361_v0, 0.0  ;;  %v4090_v7 = vmul.f32 %v4074_v41, %v8797_v36  ;;  %v4082_v9 = vmul.f32 %v4074_v41, %v8798_v38  ;;  %vm4031_vm5 = vcmp.gt.f32.partialorder %v8356_v45, 0.0 }
 0x586   :  { %v5501_v37 = vpop.eup %5500  ;;  %v4052_v11 = vmul.f32 1.442695, %v4039_v55  ;;  %v4114_v42 = vsel %vm3006_vm7, %v4091_v56, 0.0  ;;  %v4098_v18 = vsel %vm3006_vm7, %v4083_v47, 0.0  ;;  %vm4030_vm1 = vcmp.gt.f32.partialorder %v8361_v0, 0.0 }
 0x587   :  { %v5171_v32 = vadd.f32 -1.0, %v5501_v37  ;;  %v4007_v54 = vpop.f32.mrf.mxu3  ;;  %v5503_v12 = vpop.eup %5502  ;;  %v4050_v6 = vmul.f32 1.442695, %v4038_v10  ;;  %v4115_v21 = vadd.f32 %v4114_v42, %v4090_v7  ;;  %v4099_v27 = vadd.f32 %v4098_v18, %v4082_v9  ;;  %v8811_v9 = vld [vmem:[#allocation35_spill] sm:$0xff] }
 0x588   :  { %5504 = vpow2.f32 %v4052_v11  ;;  %v4017_v20 = vadd.f32 %v4007_v54, %v3957_v17  ;;  %v3988_v19 = vpop.f32.mrf.mxu2  ;;  %v5170_v57 = vadd.f32 -1.0, %v5503_v12  ;;  %v8806_v63 = vunpack.c.h.bf16 %v8805_v29 }
 0x589   :  { %v4069_v61 = vmul.f32 0.001, %v5171_v32  ;;  %5506 = vpow2.f32 %v4050_v6  ;;  %v4016_v39 = vadd.f32 %v3988_v19, %v3956_v22  ;;  %4116 = vadd.xlane.f32.xlu0 %v4115_v21  ;;  %4100 = vadd.xlane.f32.xlu1 %v4099_v27  ;;  %v8808_v60 = vunpack.c.l.bf16 %v8805_v29  ;;  %v8809_v32 = vld [vmem:[#allocation9_spill] sm:$0xff] }
 0x58a   :  { %v4025_v30 = vadd.f32 %v4017_v20, %v8188_v53  ;;  %v4068_v58 = vmul.f32 0.001, %v5170_v57  ;;  %v8810_v54 = vunpack.c.h.bf16 %v8809_v32  ;;  %v8812_v18 = vunpack.c.h.bf16 %v8811_v9 }
 0x58b   :  { %v4077_v46 = vsel %vm4029_vm3, %v8341_v28, %v4069_v61  ;;  %v4024_v24 = vadd.f32 %v4016_v39, %v8188_v53  ;;  %v8802_v53 = vunpack.c.l.bf16 %v8140_v23  ;;  %v8803_v23 = vld [vmem:[#allocation10_spill] sm:$0xff]  ;;  %v8813_v20 = vunpack.c.l.bf16 %v8809_v32 }
 0x58c   :  { %v4041_v25 = vmin.f32 %v4025_v30, 0.0  ;;  %v4085_v31 = vmul.f32 %v4077_v46, %v8799_v51  ;;  %v4076_v5 = vsel %vm4028_vm4, %v8348_v33, %v4068_v58  ;;  %v4093_v44 = vmul.f32 %v4077_v46, %v8800_v15  ;;  %v8815_v58 = vld [vmem:[#allocation41_spill] sm:$0xff]  ;;  %v3014_v46 = vpop.xlane.xlu2 %3013 }
 0x58d   :  { %v4040_v52 = vmin.f32 %v4024_v24, 0.0  ;;  %v4084_v50 = vmul.f32 %v4076_v5, %v8801_v26  ;;  %v4092_v49 = vmul.f32 %v4076_v5, %v8802_v53  ;;  %v8804_v4 = vunpack.c.h.bf16 %v8803_v23 }
 0x58e   :  { %v5505_v14 = vpop.eup %5504  ;;  %v4056_v2 = vmul.f32 1.442695, %v4041_v25  ;;  %v4102_v28 = vsel %vm3006_vm7, %v4085_v31, 0.0  ;;  %v4118_v48 = vsel %vm3006_vm7, %v4093_v44, 0.0  ;;  %v8807_v56 = vunpack.c.l.bf16 %v8803_v23  ;;  %v3026_v25 = vpop.xlane.xlu0 %3025 }
 0x58f   :  { %v5173_v3 = vadd.f32 -1.0, %v5505_v14  ;;  %v5507_v1 = vpop.eup %5506  ;;  %v4054_v33 = vmul.f32 1.442695, %v4040_v52  ;;  %v4103_v13 = vadd.f32 %v4102_v28, %v4084_v50  ;;  %v4119_v16 = vadd.f32 %v4118_v48, %v4092_v49 }
 0x590   :  { %5508 = vpow2.f32 %v4056_v2  ;;  %v5172_v34 = vadd.f32 -1.0, %v5507_v1  ;;  %vm4033_vm2 = vcmp.gt.f32.partialorder %v4025_v30, 0.0  ;;  %vm4032_vm8 = vcmp.gt.f32.partialorder %v4024_v24, 0.0 }
 0x591   :  { %v4071_v62 = vmul.f32 0.001, %v5173_v3  ;;  %5510 = vpow2.f32 %v4054_v33  ;;  %4104 = vadd.xlane.f32.xlu2 %v4103_v13  ;;  %4120 = vadd.xlane.f32.xlu1 %v4119_v16  ;;  %v8814_v27 = vunpack.c.l.bf16 %v8811_v9  ;;  %v3047_v44 = vlaneseq }
 0x592   :  { %v4070_v40 = vmul.f32 0.001, %v5172_v34 }
 0x593   :  { %v4079_v8 = vsel %vm4031_vm5, %v8356_v45, %v4071_v62  ;;  %v3048_v26 = vand.u32 127, %v3047_v44 }
 0x594   :  { %v4095_v35 = vmul.f32 %v4079_v8, %v8804_v4  ;;  %v4087_v43 = vmul.f32 %v4079_v8, %v8806_v63  ;;  %v4078_v55 = vsel %vm4030_vm1, %v8361_v0, %v4070_v40  ;;  %v3030_v51 = vpop.xlane.xlu2 %3029 }
 0x595   :  { %v4094_v17 = vmul.f32 %v4078_v55, %v8807_v56  ;;  %v4086_v47 = vmul.f32 %v4078_v55, %v8808_v60  ;;  %v3050_v50 = vadd.s32 4294967288, %v3048_v26  ;;  %v3062_v48 = vperm.slane %v3026_v25, %v3048_v26 }
 0x596   :  { %v5509_v59 = vpop.eup %5508  ;;  %v4122_v41 = vsel %vm3006_vm7, %v4095_v35, 0.0  ;;  %v4106_v45 = vsel %vm3006_vm7, %v4087_v43, 0.0  ;;  %v3034_v31 = vpop.xlane.xlu0 %3033  ;;  %v3054_v1 = vadd.s32 4294967280, %v3048_v26  ;;  %v3058_v13 = vadd.s32 4294967272, %v3048_v26 }
 0x597   :  { %v5175_v37 = vadd.f32 -1.0, %v5509_v59  ;;  %v5511_v11 = vpop.eup %5510  ;;  %v4123_v10 = vadd.f32 %v4122_v41, %v4094_v17  ;;  %v4107_v36 = vadd.f32 %v4106_v45, %v4086_v47  ;;  %v3063_v49 = vperm.slane %v3030_v51, %v3050_v50 }
 0x598   :  { %v5174_v7 = vadd.f32 -1.0, %v5511_v11  ;;  %v3051_v62 = vperm.slane %v3014_v46, %v3050_v50  ;;  %v3065_v35 = vperm.slane %v3034_v31, %v3054_v1 }
 0x599   :  { %v4073_v42 = vmul.f32 0.001, %v5175_v37  ;;  %4124 = vadd.xlane.f32.xlu2 %v4123_v10  ;;  %4108 = vadd.xlane.f32.xlu1 %v4107_v36 }
 0x59a   :  { %v4072_v0 = vmul.f32 0.001, %v5174_v7 }
 0x59b   :  { %v4081_v22 = vsel %vm4033_vm2, %v4025_v30, %v4073_v42 }
 0x59c   :  { %v4089_v38 = vmul.f32 %v4081_v22, %v8810_v54  ;;  %v4097_v12 = vmul.f32 %v4081_v22, %v8812_v18  ;;  %v4080_v6 = vsel %vm4032_vm8, %v4024_v24, %v4072_v0  ;;  %v3010_v24 = vpop.xlane.xlu1 %3009  ;;  %v3018_v5 = vpop.xlane.xlu2 %3017 }
 0x59d   :  { %v4088_v21 = vmul.f32 %v4080_v6, %v8813_v20  ;;  %v4096_v57 = vmul.f32 %v4080_v6, %v8814_v27  ;;  %v3049_v33 = vperm.slane %v3010_v24, %v3048_v26  ;;  %v3055_v4 = vperm.slane %v3018_v5, %v3054_v1 }
 0x59e   :  { %v4110_v19 = vsel %vm3006_vm7, %v4089_v38, 0.0  ;;  %v4126_v61 = vsel %vm3006_vm7, %v4097_v12, 0.0  ;;  %v3022_v14 = vpop.xlane.xlu0 %3021  ;;  %vm3052_vm7 = vcmask 130112  }
 0x59f   :  { %v4111_v39 = vadd.f32 %v4110_v19, %v4088_v21  ;;  %v4127_v30 = vadd.f32 %v4126_v61, %v4096_v57  ;;  %v3064_v40 = vsel %vm3052_vm7, %v3063_v49, %v3062_v48  ;;  %v3053_v43 = vsel %vm3052_vm7, %v3051_v62, %v3049_v33  ;;  %v5383_v21 = vld [vmem:[%s8441_s6] ss:$0 sm:$0xff] }
 0x5a0   :  { %v3059_v55 = vperm.slane %v3022_v14, %v3058_v13  ;;  %v3057_v36 = vsel %vm3056_vm9, %v3055_v4, %v3053_v43  ;;  %v3066_v7 = vsel %vm3056_vm9, %v3065_v35, %v3064_v40 }
 0x5a1   :  { %4112 = vadd.xlane.f32.xlu2 %v4111_v39  ;;  %4128 = vadd.xlane.f32.xlu0 %v4127_v30 }
 0x5a2   :  { %3037 = vadd.xlane.f32.xlu1 %v8815_v58  ;;  %v3061_v32 = vsel %vm3060_vm10, %v3059_v55, %v3057_v36 }
 0x5fc   :  { %v4101_v15 = vpop.xlane.xlu1 %4100  ;;  %v4117_v28 = vpop.xlane.xlu0 %4116 }
 0x5fd   :  { %v4145_v29 = vperm.slane %v4117_v28, %v3048_v26  ;;  %v4138_v63 = vperm.slane %v4101_v15, %v3048_v26 }
 0x604   :  { %v4105_v2 = vpop.xlane.xlu2 %4104  ;;  %v4121_v52 = vpop.xlane.xlu1 %4120 }
 0x605   :  { %v4139_v16 = vperm.slane %v4105_v2, %v3050_v50  ;;  %v4146_v34 = vperm.slane %v4121_v52, %v3050_v50 }
 0x607   :  { %v4140_v17 = vsel %vm3052_vm7, %v4139_v16, %v4138_v63  ;;  %v4147_v41 = vsel %vm3052_vm7, %v4146_v34, %v4145_v29 }
 0x60c   :  { %v4125_v3 = vpop.xlane.xlu2 %4124  ;;  %v4109_v53 = vpop.xlane.xlu1 %4108 }
 0x60d   :  { %v4148_v8 = vperm.slane %v4125_v3, %v3054_v1  ;;  %v4141_v23 = vperm.slane %v4109_v53, %v3054_v1 }
 0x60f   :  { %v4149_v37 = vsel %vm3056_vm9, %v4148_v8, %v4147_v41  ;;  %v4142_v11 = vsel %vm3056_vm9, %v4141_v23, %v4140_v17 }
 0x614   :  { %v4113_v59 = vpop.xlane.xlu2 %4112  ;;  %v4129_v56 = vpop.xlane.xlu0 %4128 }
 0x615   :  { %v4143_v60 = vperm.slane %v4113_v59, %v3058_v13  ;;  %v4150_v47 = vperm.slane %v4129_v56, %v3058_v13  ;;  %v3038_v45 = vpop.xlane.xlu1 %3037 }
 0x616   :  { %v3067_v10 = vperm.slane %v3038_v45, %v3058_v13 }
 0x617   :  { %v4144_v42 = vsel %vm3060_vm10, %v4143_v60, %v4142_v11  ;;  %v4151_v0 = vsel %vm3060_vm10, %v4150_v47, %v4149_v37 }
 0x618   :  { %v4152_v22 = vsel %vm3069_vm11, %v4151_v0, %v4144_v42  ;;  %v3068_v54 = vsel %vm3060_vm10, %v3067_v10, %v3066_v7 }
 0x619   :  { %v4154_v38 = vsel %vm3072_vm12, %v4152_v22, 0.0  ;;  %v3070_v9 = vsel %vm3069_vm11, %v3068_v54, %v3061_v32 }
 0x61a   :  { %4155 = vadd.xlane.f32.xlu2 %v4154_v38  ;;  %v3073_v18 = vsel %vm3072_vm12, %v3070_v9, 0.0 }
 0x61b   :  { %3074 = vadd.xlane.f32.xlu1 %v3073_v18 }
 0x68d   :  { %v4156_v12 = vpop.xlane.xlu2 %4155 }
 0x68e   :  { %v4161_v6 = vperm.slane %v4156_v12, %v3048_v26  ;;  %v3075_v20 = vpop.xlane.xlu1 %3074 }
 0x68f   :  { %v4158_v19 = vperm.slane %v3075_v20, %v3048_v26 }
 0x691   :  { %v4164_v27 = vsel %vm4163_vm13, %v4158_v19, %v4161_v6 }
 0x692   :  { %v4169_v57 = vadd.f32 %v5383_v21, %v4164_v27 }
 0x694   :  { %4171 = vst.msk [vmem:[#allocation2] sm:$0x3] %vm4170_vm14, %v4169_v57 }
 0x695   :  { %4182 = dma.vmem_to_hbm [thread:$0]  %s4178_s12, 32, %s4180_s16, [#allocation3]  }
 0x696   :  { %5558 = dma.done.wait [#allocation3], 32  }
 0x697   :  { %5559 = vsyncadd [#allocation3], 4294967264 }
 0x698   :  { %4187 = vsyncpa [#allocation3], 1 }

</bundles_post_ra>
